<compile_context>
chip_gen: v7x
topology: tpu7x:2x2x1
jax: 0.10.0
libtpu: 0.0.40
codegen_flags: <defaults>
</compile_context>

<pallas_src>
import math

import jax
import jax.numpy as jnp
from jax.experimental import pallas as pl
from jax.experimental.pallas import tpu as pltpu  # noqa: F401 (TPU backend assumed)

# ----------------------------- configuration --------------------------------
B = 2              # batch
C = 1              # channels
IMG = 32           # image_size (scaled down from 240)
FRAMES = 4         # frames ('d' axis); num_patches = frames
FRAME_PATCH = 2    # frame_patch_size (only used for divisibility assert)
PATCH2D = 16       # inner SimpleViT patch_size
DIM_INNER = 64     # inner SimpleViT dim      (1024 in the original)
MLP_INNER = 128    # inner SimpleViT mlp_dim  (2048 in the original)
HEADS_INNER = 1
DH_INNER = 32      # inner attention dim_head
DIM = 64           # outer ViT dim == fc-head width (1024 in the original)
DEPTH = 2
HEADS = 2
DH = 32            # outer attention dim_head
MLP = 128          # outer mlp_dim
ORDER_N_CLASS = 6
NUM_CUBES = 8
POOL = "cls"

PATCH_DIM = C * PATCH2D * PATCH2D          # 256
N2D = (IMG // PATCH2D) ** 2                # tokens per frame in the inner ViT
N_OUT = FRAMES + 1                         # outer sequence length (cls + frames)

# packed lane-dense head-output layout (single (B, 128) slab)
HEAD_OUT_W = 128
OFF_ORDER = 0
OFF_HOR = ORDER_N_CLASS
OFF_VER = ORDER_N_CLASS + NUM_CUBES
OFF_MASK = ORDER_N_CLASS + 2 * NUM_CUBES
SIG_LO = OFF_HOR
SIG_HI = OFF_MASK + NUM_CUBES

assert IMG % PATCH2D == 0
assert FRAMES % FRAME_PATCH == 0
assert SIG_HI <= HEAD_OUT_W


# ----------------------------- parameter slab layout -------------------------
def _round_up(x, m):
    return (x + m - 1) // m * m


def _layer_f32_entries(p, dim, mlp):
    return [(p + "a_ln_g", 1, dim), (p + "a_ln_b", 1, dim), (p + "a_bout", 1, dim),
            (p + "f_ln_g", 1, dim), (p + "f_ln_b", 1, dim),
            (p + "f_b1", 1, mlp), (p + "f_b2", 1, dim)]


def _layer_w_entries(p, dim, mlp, heads, dh):
    inner = heads * dh
    return [(p + "a_wqkv", dim, 3 * inner), (p + "a_wout", inner, dim),
            (p + "f_w1", dim, mlp), (p + "f_w2", mlp, dim)]


def _f32_entries():
    e = [("pe_ln1_g", 1, PATCH_DIM), ("pe_ln1_b", 1, PATCH_DIM),
         ("pe_b", 1, DIM_INNER), ("pe_ln2_g", 1, DIM_INNER), ("pe_ln2_b", 1, DIM_INNER),
         ("pos2d", N2D, DIM_INNER)]
    e += _layer_f32_entries("i_", DIM_INNER, MLP_INNER)
    e += [("head_b", 1, DIM), ("cls", 1, DIM), ("pos", N_OUT, DIM)]
    for l in range(DEPTH):
        e += _layer_f32_entries("o%d_" % l, DIM, MLP)
    e += [("ob1", 1, DIM), ("ob2", 1, DIM),
          ("hvm_b1", 1, 3 * DIM), ("b_fin", 1, HEAD_OUT_W)]
    return e


def _w_entries():
    e = [("pe_w", PATCH_DIM, DIM_INNER)]
    e += _layer_w_entries("i_", DIM_INNER, MLP_INNER, HEADS_INNER, DH_INNER)
    e += [("head_w", DIM_INNER, DIM)]
    for l in range(DEPTH):
        e += _layer_w_entries("o%d_" % l, DIM, MLP, HEADS, DH)
    e += [("ow1", DIM, DIM), ("ow2", DIM, DIM), ("hvm_w1", DIM, 3 * DIM),
          ("w_fin_order", DIM, HEAD_OUT_W), ("w_fin_hvm", 3 * DIM, HEAD_OUT_W)]
    return e


def _build_layout(entries, row_align):
    layout, off = {}, 0
    for name, r, c in entries:
        layout[name] = (off, r, c)
        off += _round_up(r, row_align)
    return layout, off


F32_ENTRIES = _f32_entries()
W_ENTRIES = _w_entries()
# f32 slab rows aligned to the (8,128) sublane tile; bf16 slab rows to 16
# (bf16 sublane packing) so every static slice is tile-aligned on sublanes.
F32_LAYOUT, F32_ROWS = _build_layout(F32_ENTRIES, 8)
W_LAYOUT, W_ROWS = _build_layout(W_ENTRIES, 16)
F32_SLAB_W = _round_up(max(c for _, _, c in F32_ENTRIES), 128)
W_SLAB_W = _round_up(max(c for _, _, c in W_ENTRIES), 128)


# ----------------------------- in-kernel helpers -----------------------------
def _ln(x, g, b, eps=1e-5):
    # PyTorch nn.LayerNorm: biased variance, eps inside sqrt. Kept in f32.
    mu = jnp.mean(x, axis=-1, keepdims=True)
    var = jnp.mean(jnp.square(x - mu), axis=-1, keepdims=True)
    return (x - mu) * jax.lax.rsqrt(var + eps) * g + b


_GELU_C = math.sqrt(2.0 / math.pi)


def _gelu(x):
    # tanh-approx GELU: tanh runs on the EUP slot instead of a VALU-heavy erf
    # rational approximation (error << bf16 matmul noise).
    return 0.5 * x * (1.0 + jnp.tanh(_GELU_C * (x + 0.044715 * x * x * x)))


def _bf16(x):
    return x.astype(jnp.bfloat16)


def _read(ref, layout, name):
    off, r, c = layout[name]
    return ref[off:off + r, 0:c]          # static, tile-aligned ref slice


def _layer_params(f, w, p):
    return dict(a_ln_g=f(p + "a_ln_g"), a_ln_b=f(p + "a_ln_b"),
                a_wqkv=w(p + "a_wqkv"), a_wout=w(p + "a_wout"),
                a_bout=f(p + "a_bout"),
                f_ln_g=f(p + "f_ln_g"), f_ln_b=f(p + "f_ln_b"),
                f_w1=w(p + "f_w1"), f_b1=f(p + "f_b1"),
                f_w2=w(p + "f_w2"), f_b2=f(p + "f_b2"))


def _transformer_layer(x2d, bsz, ntok, lp, heads, dim_head):
    """Pre-LN attention + pre-LN GELU MLP with fused residuals.

    x2d: (bsz*ntok, D) f32; weights bf16, biases/LN params f32.
    """
    inner = heads * dim_head
    scale = dim_head ** -0.5

    # ---- attention ----
    xl = _ln(x2d, lp["a_ln_g"], lp["a_ln_b"])
    qkv = _bf16(jnp.dot(_bf16(xl), lp["a_wqkv"],
                        preferred_element_type=jnp.float32))       # cast qkv once
    qkv = qkv.reshape(bsz, ntok, 3 * inner)
    head_outs = []
    for h in range(heads):                                         # tiny static loop
        q = qkv[:, :, h * dim_head:(h + 1) * dim_head]
        k = qkv[:, :, inner + h * dim_head:inner + (h + 1) * dim_head]
        v = qkv[:, :, 2 * inner + h * dim_head:2 * inner + (h + 1) * dim_head]
        dots = jnp.einsum("bqd,bkd->bqk", q, k,
                          preferred_element_type=jnp.float32) * scale
        m = jnp.max(dots, axis=-1, keepdims=True)
        p = jnp.exp(dots - m)
        sm = p * pl.reciprocal(jnp.sum(p, axis=-1, keepdims=True), approx=True)
        head_outs.append(jnp.einsum("bqk,bkd->bqd", _bf16(sm), v,
                                    preferred_element_type=jnp.float32))
    o = head_outs[0] if heads == 1 else jnp.concatenate(head_outs, axis=-1)
    # single out-projection matmul over the full K=heads*dim_head (no per-head
    # K=32 matmuls, no zeros-initialized accumulator).
    attn = jnp.dot(_bf16(o.reshape(bsz * ntok, inner)), lp["a_wout"],
                   preferred_element_type=jnp.float32)
    x2d = attn + lp["a_bout"] + x2d                                # residual

    # ---- feed-forward ----
    xl = _ln(x2d, lp["f_ln_g"], lp["f_ln_b"])
    hdn = _gelu(jnp.dot(_bf16(xl), lp["f_w1"],
                        preferred_element_type=jnp.float32) + lp["f_b1"])
    y = jnp.dot(_bf16(hdn), lp["f_w2"], preferred_element_type=jnp.float32) + lp["f_b2"]
    return y + x2d                                                 # residual


# ----------------------------- the single fused kernel -----------------------
def _my3dvit_kernel(patches_ref, fslab_ref, wslab_ref, o_ref):
    f = lambda name: _read(fslab_ref, F32_LAYOUT, name)    # f32 vectors / biases
    w = lambda name: _read(wslab_ref, W_LAYOUT, name)      # bf16 matmul weights

    M, N2, PD = patches_ref.shape                           # (B*FRAMES, tokens, patch_dim)

    # --- inner SimpleViT over all B*FRAMES frames at once --------------------
    x = patches_ref[...].reshape(M * N2, PD)
    x = _ln(x, f("pe_ln1_g"), f("pe_ln1_b"))
    x = jnp.dot(_bf16(x), w("pe_w"), preferred_element_type=jnp.float32) + f("pe_b")
    x = _ln(x, f("pe_ln2_g"), f("pe_ln2_b"))
    x = (x.reshape(M, N2, DIM_INNER) + f("pos2d")[None]).reshape(M * N2, DIM_INNER)
    x = _transformer_layer(x, M, N2, _layer_params(f, w, "i_"),
                           HEADS_INNER, DH_INNER)
    xm = jnp.mean(x.reshape(M, N2, DIM_INNER), axis=1)      # mean-pool tokens
    frames = (jnp.dot(_bf16(xm), w("head_w"), preferred_element_type=jnp.float32)
              + f("head_b"))                                 # (M, DIM)

    # --- outer transformer: [cls | frames] + learned pos, assembled in vregs -
    Bv = M // FRAMES
    pos = f("pos")                                           # (N_OUT, DIM)
    cls_row = jnp.broadcast_to((f("cls") + pos[0:1, :])[None], (Bv, 1, DIM))
    xo = jnp.concatenate(
        [cls_row, frames.reshape(Bv, FRAMES, DIM) + pos[1:N_OUT, :][None]],
        axis=1).reshape(Bv * N_OUT, DIM)
    for l in range(DEPTH):
        xo = _transformer_layer(xo, Bv, N_OUT, _layer_params(f, w, "o%d_" % l),
                                HEADS, DH)
    cls_out = xo.reshape(Bv, N_OUT, DIM)[:, 0, :]            # cls pooling (B, DIM)

    # --- fused heads -> lane-dense (B, 128) slab ------------------------------
    #   cols [0:6)=order logits, [6:14)=hor, [14:22)=ver, [22:30)=mask, rest pad.
    xb = _bf16(cls_out)
    h = jnp.maximum(jnp.dot(xb, w("ow1"), preferred_element_type=jnp.float32)
                    + f("ob1"), 0.0)
    h = jnp.maximum(jnp.dot(_bf16(h), w("ow2"), preferred_element_type=jnp.float32)
                    + f("ob2"), 0.0)
    g = jnp.maximum(jnp.dot(xb, w("hvm_w1"), preferred_element_type=jnp.float32)
                    + f("hvm_b1"), 0.0)
    y = (jnp.dot(_bf16(h), w("w_fin_order"), preferred_element_type=jnp.float32)
         + jnp.dot(_bf16(g), w("w_fin_hvm"), preferred_element_type=jnp.float32)
         + f("b_fin"))
    col = jax.lax.broadcasted_iota(jnp.int32, y.shape, 1)
    y = jnp.where((col >= SIG_LO) & (col < SIG_HI), jax.nn.sigmoid(y), y)
    o_ref[...] = y.astype(o_ref.dtype)


# ----------------------------- wrapper ----------------------------------------
@jax.jit
def my3dvit_forward(video, fslab, wslab):
    Bv, Cv, H, W, Dfr = video.shape
    hb, wb = H // PATCH2D, W // PATCH2D
    # 'b c h w d -> (b d) c h w' and 'b c (h p1) (w p2) -> b (h w) (p1 p2 c)'
    # fused into ONE layout-only XLA transpose/reshape (negligible at toy size).
    patches = jnp.transpose(
        video.reshape(Bv, Cv, hb, PATCH2D, wb, PATCH2D, Dfr),
        (0, 6, 2, 4, 3, 5, 1)).reshape(Bv * Dfr, hb * wb, PATCH2D * PATCH2D * Cv)

    # One fused pallas_call, no grid: total VMEM footprint ~1.3 MiB (patches
    # 32 KiB + f32 slab ~280 KiB + bf16 weight slab ~870 KiB + activations),
    # well inside every generation's scoped VMEM limit.
    out = pl.pallas_call(
        _my3dvit_kernel,
        out_shape=jax.ShapeDtypeStruct((Bv, HEAD_OUT_W), jnp.float32),
    )(patches, fslab, wslab)

    order = out[:, OFF_ORDER:OFF_ORDER + ORDER_N_CLASS]
    hor = out[:, OFF_HOR:OFF_HOR + NUM_CUBES]
    ver = out[:, OFF_VER:OFF_VER + NUM_CUBES]
    mask = out[:, OFF_MASK:OFF_MASK + NUM_CUBES]
    return order, hor, ver, mask


# ----------------------------- parameter init / packing ----------------------
def posemb_sincos_2d(h, w, dim, temperature=10000.0):
    y, x = jnp.meshgrid(jnp.arange(h), jnp.arange(w), indexing="ij")
    omega = jnp.arange(dim // 4, dtype=jnp.float32) / (dim // 4 - 1)
    omega = 1.0 / (temperature ** omega)
    y = y.reshape(-1)[:, None].astype(jnp.float32) * omega[None, :]
    x = x.reshape(-1)[:, None].astype(jnp.float32) * omega[None, :]
    return jnp.concatenate([jnp.sin(x), jnp.cos(x), jnp.sin(y), jnp.cos(y)], axis=1)


def init_params(key):
    keys = iter(jax.random.split(key, 128))

    def nrm(*shape, scale=0.02):
        return scale * jax.random.normal(next(keys), shape, dtype=jnp.float32)

    def zeros(*shape):
        return jnp.zeros(shape, jnp.float32)

    def ones(*shape):
        return jnp.ones(shape, jnp.float32)

    def attn_params(dim, heads, dim_head):
        inner = heads * dim_head
        return dict(ln_g=ones(1, dim), ln_b=zeros(1, dim),
                    w_qkv=nrm(dim, 3 * inner),                 # to_qkv: no bias
                    w_out=nrm(inner, dim), b_out=zeros(1, dim))

    def ff_params(dim, hidden):
        return dict(ln_g=ones(1, dim), ln_b=zeros(1, dim),
                    w1=nrm(dim, hidden), b1=zeros(1, hidden),
                    w2=nrm(hidden, dim), b2=zeros(1, dim))

    twodvit = dict(
        pe_ln1_g=ones(1, PATCH_DIM), pe_ln1_b=zeros(1, PATCH_DIM),
        pe_w=nrm(PATCH_DIM, DIM_INNER), pe_b=zeros(1, DIM_INNER),
        pe_ln2_g=ones(1, DIM_INNER), pe_ln2_b=zeros(1, DIM_INNER),
        pos2d=posemb_sincos_2d(IMG // PATCH2D, IMG // PATCH2D, DIM_INNER),
        layers=[dict(attn=attn_params(DIM_INNER, HEADS_INNER, DH_INNER),
                     ff=ff_params(DIM_INNER, MLP_INNER)) for _ in range(1)],
        head_w=nrm(DIM_INNER, DIM), head_b=zeros(1, DIM),
    )
    return dict(
        twodvit=twodvit,
        cls_token=nrm(1, 1, DIM, scale=1.0),                   # torch.randn
        pos_embedding=nrm(1, FRAMES + 1, DIM, scale=1.0),      # torch.randn
        layers=[dict(attn=attn_params(DIM, HEADS, DH),
                     ff=ff_params(DIM, MLP)) for _ in range(DEPTH)],
        order_fc=dict(w1=nrm(DIM, DIM), b1=zeros(1, DIM),
                      w2=nrm(DIM, DIM), b2=zeros(1, DIM),
                      w3=nrm(DIM, ORDER_N_CLASS), b3=zeros(1, ORDER_N_CLASS)),
        hor_rot_fc=dict(w1=nrm(DIM, DIM), b1=zeros(1, DIM),
                        w2=nrm(DIM, NUM_CUBES), b2=zeros(1, NUM_CUBES)),
        ver_rot_fc=dict(w1=nrm(DIM, DIM), b1=zeros(1, DIM),
                        w2=nrm(DIM, NUM_CUBES), b2=zeros(1, NUM_CUBES)),
        mask_fc=dict(w1=nrm(DIM, DIM), b1=zeros(1, DIM),
                     w2=nrm(DIM, NUM_CUBES), b2=zeros(1, NUM_CUBES)),
    )


def _pack_slab(values, entries, layout, total_rows, width, dtype):
    slab = jnp.zeros((total_rows, width), dtype)
    for name, r, c in entries:
        off = layout[name][0]
        v = jnp.asarray(values[name], jnp.float32).reshape(r, c).astype(dtype)
        slab = slab.at[off:off + r, 0:c].set(v)
    return slab


def prepare_params(P):
    """Pack raw f32 params into one f32 slab + one bf16 weight slab (host-side)."""
    tv = P["twodvit"]
    f32_vals = {
        "pe_ln1_g": tv["pe_ln1_g"], "pe_ln1_b": tv["pe_ln1_b"],
        "pe_b": tv["pe_b"], "pe_ln2_g": tv["pe_ln2_g"], "pe_ln2_b": tv["pe_ln2_b"],
        "pos2d": tv["pos2d"], "head_b": tv["head_b"],
        "cls": P["cls_token"].reshape(1, DIM),
        "pos": P["pos_embedding"].reshape(FRAMES + 1, DIM),
    }
    w_vals = {"pe_w": tv["pe_w"], "head_w": tv["head_w"]}

    def add_layer(prefix, layer):
        a, ffp = layer["attn"], layer["ff"]
        f32_vals.update({prefix + "a_ln_g": a["ln_g"], prefix + "a_ln_b": a["ln_b"],
                         prefix + "a_bout": a["b_out"],
                         prefix + "f_ln_g": ffp["ln_g"], prefix + "f_ln_b": ffp["ln_b"],
                         prefix + "f_b1": ffp["b1"], prefix + "f_b2": ffp["b2"]})
        w_vals.update({prefix + "a_wqkv": a["w_qkv"], prefix + "a_wout": a["w_out"],
                       prefix + "f_w1": ffp["w1"], prefix + "f_w2": ffp["w2"]})

    add_layer("i_", tv["layers"][0])
    for l, layer in enumerate(P["layers"]):
        add_layer("o%d_" % l, layer)

    ofc, hfc, vfc, mfc = P["order_fc"], P["hor_rot_fc"], P["ver_rot_fc"], P["mask_fc"]
    D = DIM
    # hor/ver/mask first layers fused along the output dim
    hvm_w1 = jnp.concatenate([hfc["w1"], vfc["w1"], mfc["w1"]], axis=1)   # (D, 3D)
    hvm_b1 = jnp.concatenate([hfc["b1"], vfc["b1"], mfc["b1"]], axis=1)   # (1, 3D)
    # final projections scattered into one lane-dense 128-wide output slab
    w_fin_order = jnp.zeros((D, HEAD_OUT_W), jnp.float32)
    w_fin_order = w_fin_order.at[:, OFF_ORDER:OFF_ORDER + ORDER_N_CLASS].set(ofc["w3"])
    w_fin_hvm = jnp.zeros((3 * D, HEAD_OUT_W), jnp.float32)
    w_fin_hvm = w_fin_hvm.at[0:D, OFF_HOR:OFF_HOR + NUM_CUBES].set(hfc["w2"])
    w_fin_hvm = w_fin_hvm.at[D:2 * D, OFF_VER:OFF_VER + NUM_CUBES].set(vfc["w2"])
    w_fin_hvm = w_fin_hvm.at[2 * D:3 * D, OFF_MASK:OFF_MASK + NUM_CUBES].set(mfc["w2"])
    b_fin = jnp.zeros((1, HEAD_OUT_W), jnp.float32)
    b_fin = b_fin.at[:, OFF_ORDER:OFF_ORDER + ORDER_N_CLASS].set(ofc["b3"])
    b_fin = b_fin.at[:, OFF_HOR:OFF_HOR + NUM_CUBES].set(hfc["b2"])
    b_fin = b_fin.at[:, OFF_VER:OFF_VER + NUM_CUBES].set(vfc["b2"])
    b_fin = b_fin.at[:, OFF_MASK:OFF_MASK + NUM_CUBES].set(mfc["b2"])

    f32_vals.update({"ob1": ofc["b1"], "ob2": ofc["b2"],
                     "hvm_b1": hvm_b1, "b_fin": b_fin})
    w_vals.update({"ow1": ofc["w1"], "ow2": ofc["w2"], "hvm_w1": hvm_w1,
                   "w_fin_order": w_fin_order, "w_fin_hvm": w_fin_hvm})

    fslab = _pack_slab(f32_vals, F32_ENTRIES, F32_LAYOUT, F32_ROWS,
                       F32_SLAB_W, jnp.float32)
    wslab = _pack_slab(w_vals, W_ENTRIES, W_LAYOUT, W_ROWS,
                       W_SLAB_W, jnp.bfloat16)
    return fslab, wslab


# ----------------------------- main ------------------------------------------
if __name__ == "__main__":
    key = jax.random.PRNGKey(0)
    k_video, k_params = jax.random.split(key)
    video = jax.random.normal(k_video, (B, C, IMG, IMG, FRAMES), dtype=jnp.float32)
    fslab, wslab = prepare_params(init_params(k_params))

    outs = my3dvit_forward(video, fslab, wslab)
    outs = jax.block_until_ready(outs)

    order_logits, hor_rot_logits, ver_rot_logits, mask_logits = outs
    assert order_logits.shape == (B, ORDER_N_CLASS)
    assert hor_rot_logits.shape == (B, NUM_CUBES)
    assert ver_rot_logits.shape == (B, NUM_CUBES)
    assert mask_logits.shape == (B, NUM_CUBES)
    for o in outs:
        assert bool(jnp.all(jnp.isfinite(o)))
    # sigmoid outputs must live in (0, 1)
    for o in (hor_rot_logits, ver_rot_logits, mask_logits):
        assert bool(jnp.all((o > 0.0) & (o < 1.0)))

    print("KERNEL_OK")
</pallas_src>

<mosaic_0001>
module attributes {stable_mosaic.version = 11 : i64} {
  func.func @_my3dvit_kernel(%arg0: memref<8x4x256xf32, #tpu.memory_space<vmem>>, %arg1: memref<272x256xf32, #tpu.memory_space<vmem>>, %arg2: memref<1696x256xbf16, #tpu.memory_space<vmem>>, %arg3: memref<2x128xf32, #tpu.memory_space<vmem>>) attributes {dimension_semantics = [], scalar_prefetch = 0 : i64, scratch_operands = 0 : i64, tpu.core_type = #tpu.core_type<tc>} {
    %c0 = arith.constant 0 : index
    %c0_0 = arith.constant 0 : index
    %c0_1 = arith.constant 0 : index
    %0 = vector.load %arg0[%c0, %c0_0, %c0_1] : memref<8x4x256xf32, #tpu.memory_space<vmem>>, vector<8x4x256xf32>
    %1 = vector.shape_cast %0 : vector<8x4x256xf32> to vector<32x256xf32>
    %c0_2 = arith.constant 0 : index
    %c0_3 = arith.constant 0 : index
    %2 = vector.load %arg1[%c0_2, %c0_3] : memref<272x256xf32, #tpu.memory_space<vmem>>, vector<1x256xf32>
    %c8 = arith.constant 8 : index
    %c0_4 = arith.constant 0 : index
    %3 = vector.load %arg1[%c8, %c0_4] : memref<272x256xf32, #tpu.memory_space<vmem>>, vector<1x256xf32>
    %cst = arith.constant dense<0.000000e+00> : vector<32xf32>
    %4 = vector.multi_reduction <add>, %1, %cst [1] : vector<32x256xf32> to vector<32xf32>
    %5 = vector.shape_cast %4 : vector<32xf32> to vector<32x1xf32>
    %cst_5 = arith.constant 2.560000e+02 : f32
    %6 = vector.broadcast %cst_5 : f32 to vector<32x1xf32>
    %7 = arith.divf %5, %6 : vector<32x1xf32>
    %8 = vector.broadcast %7 : vector<32x1xf32> to vector<32x256xf32>
    %9 = arith.subf %1, %8 : vector<32x256xf32>
    %10 = arith.mulf %9, %9 : vector<32x256xf32>
    %cst_6 = arith.constant dense<0.000000e+00> : vector<32xf32>
    %11 = vector.multi_reduction <add>, %10, %cst_6 [1] : vector<32x256xf32> to vector<32xf32>
    %12 = vector.shape_cast %11 : vector<32xf32> to vector<32x1xf32>
    %cst_7 = arith.constant 2.560000e+02 : f32
    %13 = vector.broadcast %cst_7 : f32 to vector<32x1xf32>
    %14 = arith.divf %12, %13 : vector<32x1xf32>
    %15 = vector.broadcast %7 : vector<32x1xf32> to vector<32x256xf32>
    %16 = arith.subf %1, %15 : vector<32x256xf32>
    %cst_8 = arith.constant 9.99999974E-6 : f32
    %17 = vector.broadcast %cst_8 : f32 to vector<32x1xf32>
    %18 = arith.addf %14, %17 : vector<32x1xf32>
    %19 = math.rsqrt %18 : vector<32x1xf32>
    %20 = vector.broadcast %19 : vector<32x1xf32> to vector<32x256xf32>
    %21 = arith.mulf %16, %20 : vector<32x256xf32>
    %22 = vector.broadcast %2 : vector<1x256xf32> to vector<32x256xf32>
    %23 = arith.mulf %21, %22 : vector<32x256xf32>
    %24 = vector.broadcast %3 : vector<1x256xf32> to vector<32x256xf32>
    %25 = arith.addf %23, %24 : vector<32x256xf32>
    %26 = arith.truncf %25 : vector<32x256xf32> to vector<32x256xbf16>
    %c0_9 = arith.constant 0 : index
    %c0_10 = arith.constant 0 : index
    %27 = vector.load %arg2[%c0_9, %c0_10] : memref<1696x256xbf16, #tpu.memory_space<vmem>>, vector<256x64xbf16>
    %cst_11 = arith.constant dense<0.000000e+00> : vector<32x64xf32>
    %28 = tpu.matmul %26, %27, %cst_11 {dimension_numbers = #tpu.dot_dimension_numbers<[1], [0], [0], [1], [0, 0, 1, 1], [], []>} : vector<32x256xbf16>, vector<256x64xbf16>, vector<32x64xf32> -> vector<32x64xf32>
    %c16 = arith.constant 16 : index
    %c0_12 = arith.constant 0 : index
    %29 = vector.load %arg1[%c16, %c0_12] : memref<272x256xf32, #tpu.memory_space<vmem>>, vector<1x64xf32>
    %30 = vector.broadcast %29 : vector<1x64xf32> to vector<32x64xf32>
    %31 = arith.addf %28, %30 : vector<32x64xf32>
    %c24 = arith.constant 24 : index
    %c0_13 = arith.constant 0 : index
    %32 = vector.load %arg1[%c24, %c0_13] : memref<272x256xf32, #tpu.memory_space<vmem>>, vector<1x64xf32>
    %c32 = arith.constant 32 : index
    %c0_14 = arith.constant 0 : index
    %33 = vector.load %arg1[%c32, %c0_14] : memref<272x256xf32, #tpu.memory_space<vmem>>, vector<1x64xf32>
    %cst_15 = arith.constant dense<0.000000e+00> : vector<32xf32>
    %34 = vector.multi_reduction <add>, %31, %cst_15 [1] : vector<32x64xf32> to vector<32xf32>
    %35 = vector.shape_cast %34 : vector<32xf32> to vector<32x1xf32>
    %cst_16 = arith.constant 6.400000e+01 : f32
    %36 = vector.broadcast %cst_16 : f32 to vector<32x1xf32>
    %37 = arith.divf %35, %36 : vector<32x1xf32>
    %38 = vector.broadcast %37 : vector<32x1xf32> to vector<32x64xf32>
    %39 = arith.subf %31, %38 : vector<32x64xf32>
    %40 = arith.mulf %39, %39 : vector<32x64xf32>
    %cst_17 = arith.constant dense<0.000000e+00> : vector<32xf32>
    %41 = vector.multi_reduction <add>, %40, %cst_17 [1] : vector<32x64xf32> to vector<32xf32>
    %42 = vector.shape_cast %41 : vector<32xf32> to vector<32x1xf32>
    %cst_18 = arith.constant 6.400000e+01 : f32
    %43 = vector.broadcast %cst_18 : f32 to vector<32x1xf32>
    %44 = arith.divf %42, %43 : vector<32x1xf32>
    %45 = vector.broadcast %37 : vector<32x1xf32> to vector<32x64xf32>
    %46 = arith.subf %31, %45 : vector<32x64xf32>
    %cst_19 = arith.constant 9.99999974E-6 : f32
    %47 = vector.broadcast %cst_19 : f32 to vector<32x1xf32>
    %48 = arith.addf %44, %47 : vector<32x1xf32>
    %49 = math.rsqrt %48 : vector<32x1xf32>
    %50 = vector.broadcast %49 : vector<32x1xf32> to vector<32x64xf32>
    %51 = arith.mulf %46, %50 : vector<32x64xf32>
    %52 = vector.broadcast %32 : vector<1x64xf32> to vector<32x64xf32>
    %53 = arith.mulf %51, %52 : vector<32x64xf32>
    %54 = vector.broadcast %33 : vector<1x64xf32> to vector<32x64xf32>
    %55 = arith.addf %53, %54 : vector<32x64xf32>
    %56 = vector.shape_cast %55 : vector<32x64xf32> to vector<8x4x64xf32>
    %c40 = arith.constant 40 : index
    %c0_20 = arith.constant 0 : index
    %57 = vector.load %arg1[%c40, %c0_20] : memref<272x256xf32, #tpu.memory_space<vmem>>, vector<4x64xf32>
    %58 = vector.shape_cast %57 : vector<4x64xf32> to vector<1x4x64xf32>
    %59 = vector.broadcast %58 : vector<1x4x64xf32> to vector<8x4x64xf32>
    %60 = arith.addf %56, %59 : vector<8x4x64xf32>
    %61 = vector.shape_cast %60 : vector<8x4x64xf32> to vector<32x64xf32>
    %c48 = arith.constant 48 : index
    %c0_21 = arith.constant 0 : index
    %62 = vector.load %arg1[%c48, %c0_21] : memref<272x256xf32, #tpu.memory_space<vmem>>, vector<1x64xf32>
    %c56 = arith.constant 56 : index
    %c0_22 = arith.constant 0 : index
    %63 = vector.load %arg1[%c56, %c0_22] : memref<272x256xf32, #tpu.memory_space<vmem>>, vector<1x64xf32>
    %c256 = arith.constant 256 : index
    %c0_23 = arith.constant 0 : index
    %64 = vector.load %arg2[%c256, %c0_23] : memref<1696x256xbf16, #tpu.memory_space<vmem>>, vector<64x96xbf16>
    %c320 = arith.constant 320 : index
    %c0_24 = arith.constant 0 : index
    %65 = vector.load %arg2[%c320, %c0_24] : memref<1696x256xbf16, #tpu.memory_space<vmem>>, vector<32x64xbf16>
    %c64 = arith.constant 64 : index
    %c0_25 = arith.constant 0 : index
    %66 = vector.load %arg1[%c64, %c0_25] : memref<272x256xf32, #tpu.memory_space<vmem>>, vector<1x64xf32>
    %c72 = arith.constant 72 : index
    %c0_26 = arith.constant 0 : index
    %67 = vector.load %arg1[%c72, %c0_26] : memref<272x256xf32, #tpu.memory_space<vmem>>, vector<1x64xf32>
    %c80 = arith.constant 80 : index
    %c0_27 = arith.constant 0 : index
    %68 = vector.load %arg1[%c80, %c0_27] : memref<272x256xf32, #tpu.memory_space<vmem>>, vector<1x64xf32>
    %c352 = arith.constant 352 : index
    %c0_28 = arith.constant 0 : index
    %69 = vector.load %arg2[%c352, %c0_28] : memref<1696x256xbf16, #tpu.memory_space<vmem>>, vector<64x128xbf16>
    %c88 = arith.constant 88 : index
    %c0_29 = arith.constant 0 : index
    %70 = vector.load %arg1[%c88, %c0_29] : memref<272x256xf32, #tpu.memory_space<vmem>>, vector<1x128xf32>
    %c416 = arith.constant 416 : index
    %c0_30 = arith.constant 0 : index
    %71 = vector.load %arg2[%c416, %c0_30] : memref<1696x256xbf16, #tpu.memory_space<vmem>>, vector<128x64xbf16>
    %c96 = arith.constant 96 : index
    %c0_31 = arith.constant 0 : index
    %72 = vector.load %arg1[%c96, %c0_31] : memref<272x256xf32, #tpu.memory_space<vmem>>, vector<1x64xf32>
    %cst_32 = arith.constant dense<0.000000e+00> : vector<32xf32>
    %73 = vector.multi_reduction <add>, %61, %cst_32 [1] : vector<32x64xf32> to vector<32xf32>
    %74 = vector.shape_cast %73 : vector<32xf32> to vector<32x1xf32>
    %cst_33 = arith.constant 6.400000e+01 : f32
    %75 = vector.broadcast %cst_33 : f32 to vector<32x1xf32>
    %76 = arith.divf %74, %75 : vector<32x1xf32>
    %77 = vector.broadcast %76 : vector<32x1xf32> to vector<32x64xf32>
    %78 = arith.subf %61, %77 : vector<32x64xf32>
    %79 = arith.mulf %78, %78 : vector<32x64xf32>
    %cst_34 = arith.constant dense<0.000000e+00> : vector<32xf32>
    %80 = vector.multi_reduction <add>, %79, %cst_34 [1] : vector<32x64xf32> to vector<32xf32>
    %81 = vector.shape_cast %80 : vector<32xf32> to vector<32x1xf32>
    %cst_35 = arith.constant 6.400000e+01 : f32
    %82 = vector.broadcast %cst_35 : f32 to vector<32x1xf32>
    %83 = arith.divf %81, %82 : vector<32x1xf32>
    %84 = vector.broadcast %76 : vector<32x1xf32> to vector<32x64xf32>
    %85 = arith.subf %61, %84 : vector<32x64xf32>
    %cst_36 = arith.constant 9.99999974E-6 : f32
    %86 = vector.broadcast %cst_36 : f32 to vector<32x1xf32>
    %87 = arith.addf %83, %86 : vector<32x1xf32>
    %88 = math.rsqrt %87 : vector<32x1xf32>
    %89 = vector.broadcast %88 : vector<32x1xf32> to vector<32x64xf32>
    %90 = arith.mulf %85, %89 : vector<32x64xf32>
    %91 = vector.broadcast %62 : vector<1x64xf32> to vector<32x64xf32>
    %92 = arith.mulf %90, %91 : vector<32x64xf32>
    %93 = vector.broadcast %63 : vector<1x64xf32> to vector<32x64xf32>
    %94 = arith.addf %92, %93 : vector<32x64xf32>
    %95 = arith.truncf %94 : vector<32x64xf32> to vector<32x64xbf16>
    %cst_37 = arith.constant dense<0.000000e+00> : vector<32x96xf32>
    %96 = tpu.matmul %95, %64, %cst_37 {dimension_numbers = #tpu.dot_dimension_numbers<[1], [0], [0], [1], [0, 0, 1, 1], [], []>} : vector<32x64xbf16>, vector<64x96xbf16>, vector<32x96xf32> -> vector<32x96xf32>
    %97 = arith.truncf %96 : vector<32x96xf32> to vector<32x96xbf16>
    %98 = vector.shape_cast %97 : vector<32x96xbf16> to vector<8x4x96xbf16>
    %99 = vector.extract_strided_slice %98 {offsets = [0, 0, 0], sizes = [8, 4, 32], strides = [1, 1, 1]} : vector<8x4x96xbf16> to vector<8x4x32xbf16>
    %100 = vector.extract_strided_slice %98 {offsets = [0, 0, 32], sizes = [8, 4, 32], strides = [1, 1, 1]} : vector<8x4x96xbf16> to vector<8x4x32xbf16>
    %101 = vector.extract_strided_slice %98 {offsets = [0, 0, 64], sizes = [8, 4, 32], strides = [1, 1, 1]} : vector<8x4x96xbf16> to vector<8x4x32xbf16>
    "tpu.trace_start"() <{level = 10 : i32, message = "bqd,bkd->bqk"}> : () -> ()
    %cst_38 = arith.constant dense<0.000000e+00> : vector<8x4x4xf32>
    %102 = tpu.matmul %99, %100, %cst_38 {dimension_numbers = #tpu.dot_dimension_numbers<[2], [2], [1], [1], [0, 0, 0, 1, 1, 1], [0], [0]>} : vector<8x4x32xbf16>, vector<8x4x32xbf16>, vector<8x4x4xf32> -> vector<8x4x4xf32>
    "tpu.trace_stop"() : () -> ()
    %cst_39 = arith.constant 0.176776692 : f32
    %103 = vector.broadcast %cst_39 : f32 to vector<8x4x4xf32>
    %104 = arith.mulf %102, %103 : vector<8x4x4xf32>
    %cst_40 = arith.constant dense<0xFF800000> : vector<8x4xf32>
    %105 = vector.multi_reduction <maximumf>, %104, %cst_40 [2] : vector<8x4x4xf32> to vector<8x4xf32>
    %106 = vector.shape_cast %105 : vector<8x4xf32> to vector<8x4x1xf32>
    %107 = vector.broadcast %106 : vector<8x4x1xf32> to vector<8x4x4xf32>
    %108 = arith.subf %104, %107 : vector<8x4x4xf32>
    %109 = math.exp %108 : vector<8x4x4xf32>
    %cst_41 = arith.constant dense<0.000000e+00> : vector<8x4xf32>
    %110 = vector.multi_reduction <add>, %109, %cst_41 [2] : vector<8x4x4xf32> to vector<8x4xf32>
    %111 = vector.shape_cast %110 : vector<8x4xf32> to vector<8x4x1xf32>
    %112 = tpu.reciprocal %111 {approx = true} : vector<8x4x1xf32> -> vector<8x4x1xf32>
    %113 = vector.broadcast %112 : vector<8x4x1xf32> to vector<8x4x4xf32>
    %114 = arith.mulf %109, %113 : vector<8x4x4xf32>
    %115 = arith.truncf %114 : vector<8x4x4xf32> to vector<8x4x4xbf16>
    "tpu.trace_start"() <{level = 10 : i32, message = "bqk,bkd->bqd"}> : () -> ()
    %cst_42 = arith.constant dense<0.000000e+00> : vector<8x4x32xf32>
    %116 = tpu.matmul %115, %101, %cst_42 {dimension_numbers = #tpu.dot_dimension_numbers<[2], [1], [1], [2], [0, 0, 0, 1, 1, 2], [0], [0]>} : vector<8x4x4xbf16>, vector<8x4x32xbf16>, vector<8x4x32xf32> -> vector<8x4x32xf32>
    "tpu.trace_stop"() : () -> ()
    %117 = vector.shape_cast %116 : vector<8x4x32xf32> to vector<32x32xf32>
    %118 = arith.truncf %117 : vector<32x32xf32> to vector<32x32xbf16>
    %cst_43 = arith.constant dense<0.000000e+00> : vector<32x64xf32>
    %119 = tpu.matmul %118, %65, %cst_43 {dimension_numbers = #tpu.dot_dimension_numbers<[1], [0], [0], [1], [0, 0, 1, 1], [], []>} : vector<32x32xbf16>, vector<32x64xbf16>, vector<32x64xf32> -> vector<32x64xf32>
    %120 = vector.broadcast %66 : vector<1x64xf32> to vector<32x64xf32>
    %121 = arith.addf %119, %120 : vector<32x64xf32>
    %122 = arith.addf %121, %61 : vector<32x64xf32>
    %cst_44 = arith.constant dense<0.000000e+00> : vector<32xf32>
    %123 = vector.multi_reduction <add>, %122, %cst_44 [1] : vector<32x64xf32> to vector<32xf32>
    %124 = vector.shape_cast %123 : vector<32xf32> to vector<32x1xf32>
    %cst_45 = arith.constant 6.400000e+01 : f32
    %125 = vector.broadcast %cst_45 : f32 to vector<32x1xf32>
    %126 = arith.divf %124, %125 : vector<32x1xf32>
    %127 = vector.broadcast %126 : vector<32x1xf32> to vector<32x64xf32>
    %128 = arith.subf %122, %127 : vector<32x64xf32>
    %129 = arith.mulf %128, %128 : vector<32x64xf32>
    %cst_46 = arith.constant dense<0.000000e+00> : vector<32xf32>
    %130 = vector.multi_reduction <add>, %129, %cst_46 [1] : vector<32x64xf32> to vector<32xf32>
    %131 = vector.shape_cast %130 : vector<32xf32> to vector<32x1xf32>
    %cst_47 = arith.constant 6.400000e+01 : f32
    %132 = vector.broadcast %cst_47 : f32 to vector<32x1xf32>
    %133 = arith.divf %131, %132 : vector<32x1xf32>
    %134 = vector.broadcast %126 : vector<32x1xf32> to vector<32x64xf32>
    %135 = arith.subf %122, %134 : vector<32x64xf32>
    %cst_48 = arith.constant 9.99999974E-6 : f32
    %136 = vector.broadcast %cst_48 : f32 to vector<32x1xf32>
    %137 = arith.addf %133, %136 : vector<32x1xf32>
    %138 = math.rsqrt %137 : vector<32x1xf32>
    %139 = vector.broadcast %138 : vector<32x1xf32> to vector<32x64xf32>
    %140 = arith.mulf %135, %139 : vector<32x64xf32>
    %141 = vector.broadcast %67 : vector<1x64xf32> to vector<32x64xf32>
    %142 = arith.mulf %140, %141 : vector<32x64xf32>
    %143 = vector.broadcast %68 : vector<1x64xf32> to vector<32x64xf32>
    %144 = arith.addf %142, %143 : vector<32x64xf32>
    %145 = arith.truncf %144 : vector<32x64xf32> to vector<32x64xbf16>
    %cst_49 = arith.constant dense<0.000000e+00> : vector<32x128xf32>
    %146 = tpu.matmul %145, %69, %cst_49 {dimension_numbers = #tpu.dot_dimension_numbers<[1], [0], [0], [1], [0, 0, 1, 1], [], []>} : vector<32x64xbf16>, vector<64x128xbf16>, vector<32x128xf32> -> vector<32x128xf32>
    %147 = vector.broadcast %70 : vector<1x128xf32> to vector<32x128xf32>
    %148 = arith.addf %146, %147 : vector<32x128xf32>
    %cst_50 = arith.constant 5.000000e-01 : f32
    %149 = vector.broadcast %cst_50 : f32 to vector<32x128xf32>
    %150 = arith.mulf %149, %148 : vector<32x128xf32>
    %cst_51 = arith.constant 4.471500e-02 : f32
    %151 = vector.broadcast %cst_51 : f32 to vector<32x128xf32>
    %152 = arith.mulf %151, %148 : vector<32x128xf32>
    %153 = arith.mulf %152, %148 : vector<32x128xf32>
    %154 = arith.mulf %153, %148 : vector<32x128xf32>
    %155 = arith.addf %148, %154 : vector<32x128xf32>
    %cst_52 = arith.constant 0.797884583 : f32
    %156 = vector.broadcast %cst_52 : f32 to vector<32x128xf32>
    %157 = arith.mulf %156, %155 : vector<32x128xf32>
    %158 = math.tanh %157 : vector<32x128xf32>
    %cst_53 = arith.constant 1.000000e+00 : f32
    %159 = vector.broadcast %cst_53 : f32 to vector<32x128xf32>
    %160 = arith.addf %159, %158 : vector<32x128xf32>
    %161 = arith.mulf %150, %160 : vector<32x128xf32>
    %162 = arith.truncf %161 : vector<32x128xf32> to vector<32x128xbf16>
    %cst_54 = arith.constant dense<0.000000e+00> : vector<32x64xf32>
    %163 = tpu.matmul %162, %71, %cst_54 {dimension_numbers = #tpu.dot_dimension_numbers<[1], [0], [0], [1], [0, 0, 1, 1], [], []>} : vector<32x128xbf16>, vector<128x64xbf16>, vector<32x64xf32> -> vector<32x64xf32>
    %164 = vector.broadcast %72 : vector<1x64xf32> to vector<32x64xf32>
    %165 = arith.addf %163, %164 : vector<32x64xf32>
    %166 = arith.addf %165, %122 : vector<32x64xf32>
    %167 = vector.shape_cast %166 : vector<32x64xf32> to vector<8x4x64xf32>
    %cst_55 = arith.constant dense<0.000000e+00> : vector<8x64xf32>
    %168 = vector.multi_reduction <add>, %167, %cst_55 [1] : vector<8x4x64xf32> to vector<8x64xf32>
    %cst_56 = arith.constant 4.000000e+00 : f32
    %169 = vector.broadcast %cst_56 : f32 to vector<8x64xf32>
    %170 = arith.divf %168, %169 : vector<8x64xf32>
    %171 = arith.truncf %170 : vector<8x64xf32> to vector<8x64xbf16>
    %c544 = arith.constant 544 : index
    %c0_57 = arith.constant 0 : index
    %172 = vector.load %arg2[%c544, %c0_57] : memref<1696x256xbf16, #tpu.memory_space<vmem>>, vector<64x64xbf16>
    %cst_58 = arith.constant dense<0.000000e+00> : vector<8x64xf32>
    %173 = tpu.matmul %171, %172, %cst_58 {dimension_numbers = #tpu.dot_dimension_numbers<[1], [0], [0], [1], [0, 0, 1, 1], [], []>} : vector<8x64xbf16>, vector<64x64xbf16>, vector<8x64xf32> -> vector<8x64xf32>
    %c104 = arith.constant 104 : index
    %c0_59 = arith.constant 0 : index
    %174 = vector.load %arg1[%c104, %c0_59] : memref<272x256xf32, #tpu.memory_space<vmem>>, vector<1x64xf32>
    %175 = vector.broadcast %174 : vector<1x64xf32> to vector<8x64xf32>
    %176 = arith.addf %173, %175 : vector<8x64xf32>
    %c120 = arith.constant 120 : index
    %c0_60 = arith.constant 0 : index
    %177 = vector.load %arg1[%c120, %c0_60] : memref<272x256xf32, #tpu.memory_space<vmem>>, vector<5x64xf32>
    %c112 = arith.constant 112 : index
    %c0_61 = arith.constant 0 : index
    %178 = vector.load %arg1[%c112, %c0_61] : memref<272x256xf32, #tpu.memory_space<vmem>>, vector<1x64xf32>
    %179 = vector.extract_strided_slice %177 {offsets = [0, 0], sizes = [1, 64], strides = [1, 1]} : vector<5x64xf32> to vector<1x64xf32>
    %180 = arith.addf %178, %179 : vector<1x64xf32>
    %181 = vector.shape_cast %180 : vector<1x64xf32> to vector<1x1x64xf32>
    %182 = vector.shape_cast %181 : vector<1x1x64xf32> to vector<1x1x64xf32>
    %183 = vector.broadcast %182 : vector<1x1x64xf32> to vector<2x1x64xf32>
    %184 = vector.shape_cast %176 : vector<8x64xf32> to vector<2x4x64xf32>
    %185 = vector.extract_strided_slice %177 {offsets = [1, 0], sizes = [4, 64], strides = [1, 1]} : vector<5x64xf32> to vector<4x64xf32>
    %186 = vector.shape_cast %185 : vector<4x64xf32> to vector<1x4x64xf32>
    %187 = vector.broadcast %186 : vector<1x4x64xf32> to vector<2x4x64xf32>
    %188 = arith.addf %184, %187 : vector<2x4x64xf32>
    %189 = tpu.concatenate %183, %188 in 1 : vector<2x1x64xf32>, vector<2x4x64xf32> -> vector<2x5x64xf32>
    %190 = vector.shape_cast %189 : vector<2x5x64xf32> to vector<10x64xf32>
    %c128 = arith.constant 128 : index
    %c0_62 = arith.constant 0 : index
    %191 = vector.load %arg1[%c128, %c0_62] : memref<272x256xf32, #tpu.memory_space<vmem>>, vector<1x64xf32>
    %c136 = arith.constant 136 : index
    %c0_63 = arith.constant 0 : index
    %192 = vector.load %arg1[%c136, %c0_63] : memref<272x256xf32, #tpu.memory_space<vmem>>, vector<1x64xf32>
    %c608 = arith.constant 608 : index
    %c0_64 = arith.constant 0 : index
    %193 = vector.load %arg2[%c608, %c0_64] : memref<1696x256xbf16, #tpu.memory_space<vmem>>, vector<64x192xbf16>
    %c672 = arith.constant 672 : index
    %c0_65 = arith.constant 0 : index
    %194 = vector.load %arg2[%c672, %c0_65] : memref<1696x256xbf16, #tpu.memory_space<vmem>>, vector<64x64xbf16>
    %c144 = arith.constant 144 : index
    %c0_66 = arith.constant 0 : index
    %195 = vector.load %arg1[%c144, %c0_66] : memref<272x256xf32, #tpu.memory_space<vmem>>, vector<1x64xf32>
    %c152 = arith.constant 152 : index
    %c0_67 = arith.constant 0 : index
    %196 = vector.load %arg1[%c152, %c0_67] : memref<272x256xf32, #tpu.memory_space<vmem>>, vector<1x64xf32>
    %c160 = arith.constant 160 : index
    %c0_68 = arith.constant 0 : index
    %197 = vector.load %arg1[%c160, %c0_68] : memref<272x256xf32, #tpu.memory_space<vmem>>, vector<1x64xf32>
    %c736 = arith.constant 736 : index
    %c0_69 = arith.constant 0 : index
    %198 = vector.load %arg2[%c736, %c0_69] : memref<1696x256xbf16, #tpu.memory_space<vmem>>, vector<64x128xbf16>
    %c168 = arith.constant 168 : index
    %c0_70 = arith.constant 0 : index
    %199 = vector.load %arg1[%c168, %c0_70] : memref<272x256xf32, #tpu.memory_space<vmem>>, vector<1x128xf32>
    %c800 = arith.constant 800 : index
    %c0_71 = arith.constant 0 : index
    %200 = vector.load %arg2[%c800, %c0_71] : memref<1696x256xbf16, #tpu.memory_space<vmem>>, vector<128x64xbf16>
    %c176 = arith.constant 176 : index
    %c0_72 = arith.constant 0 : index
    %201 = vector.load %arg1[%c176, %c0_72] : memref<272x256xf32, #tpu.memory_space<vmem>>, vector<1x64xf32>
    %cst_73 = arith.constant dense<0.000000e+00> : vector<10xf32>
    %202 = vector.multi_reduction <add>, %190, %cst_73 [1] : vector<10x64xf32> to vector<10xf32>
    %203 = vector.shape_cast %202 : vector<10xf32> to vector<10x1xf32>
    %cst_74 = arith.constant 6.400000e+01 : f32
    %204 = vector.broadcast %cst_74 : f32 to vector<10x1xf32>
    %205 = arith.divf %203, %204 : vector<10x1xf32>
    %206 = vector.broadcast %205 : vector<10x1xf32> to vector<10x64xf32>
    %207 = arith.subf %190, %206 : vector<10x64xf32>
    %208 = arith.mulf %207, %207 : vector<10x64xf32>
    %cst_75 = arith.constant dense<0.000000e+00> : vector<10xf32>
    %209 = vector.multi_reduction <add>, %208, %cst_75 [1] : vector<10x64xf32> to vector<10xf32>
    %210 = vector.shape_cast %209 : vector<10xf32> to vector<10x1xf32>
    %cst_76 = arith.constant 6.400000e+01 : f32
    %211 = vector.broadcast %cst_76 : f32 to vector<10x1xf32>
    %212 = arith.divf %210, %211 : vector<10x1xf32>
    %213 = vector.broadcast %205 : vector<10x1xf32> to vector<10x64xf32>
    %214 = arith.subf %190, %213 : vector<10x64xf32>
    %cst_77 = arith.constant 9.99999974E-6 : f32
    %215 = vector.broadcast %cst_77 : f32 to vector<10x1xf32>
    %216 = arith.addf %212, %215 : vector<10x1xf32>
    %217 = math.rsqrt %216 : vector<10x1xf32>
    %218 = vector.broadcast %217 : vector<10x1xf32> to vector<10x64xf32>
    %219 = arith.mulf %214, %218 : vector<10x64xf32>
    %220 = vector.broadcast %191 : vector<1x64xf32> to vector<10x64xf32>
    %221 = arith.mulf %219, %220 : vector<10x64xf32>
    %222 = vector.broadcast %192 : vector<1x64xf32> to vector<10x64xf32>
    %223 = arith.addf %221, %222 : vector<10x64xf32>
    %224 = arith.truncf %223 : vector<10x64xf32> to vector<10x64xbf16>
    %cst_78 = arith.constant dense<0.000000e+00> : vector<10x192xf32>
    %225 = tpu.matmul %224, %193, %cst_78 {dimension_numbers = #tpu.dot_dimension_numbers<[1], [0], [0], [1], [0, 0, 1, 1], [], []>} : vector<10x64xbf16>, vector<64x192xbf16>, vector<10x192xf32> -> vector<10x192xf32>
    %226 = arith.truncf %225 : vector<10x192xf32> to vector<10x192xbf16>
    %227 = vector.shape_cast %226 : vector<10x192xbf16> to vector<2x5x192xbf16>
    %228 = vector.extract_strided_slice %227 {offsets = [0, 0, 0], sizes = [2, 5, 32], strides = [1, 1, 1]} : vector<2x5x192xbf16> to vector<2x5x32xbf16>
    %229 = vector.extract_strided_slice %227 {offsets = [0, 0, 64], sizes = [2, 5, 32], strides = [1, 1, 1]} : vector<2x5x192xbf16> to vector<2x5x32xbf16>
    %230 = vector.extract_strided_slice %227 {offsets = [0, 0, 128], sizes = [2, 5, 32], strides = [1, 1, 1]} : vector<2x5x192xbf16> to vector<2x5x32xbf16>
    "tpu.trace_start"() <{level = 10 : i32, message = "bqd,bkd->bqk"}> : () -> ()
    %cst_79 = arith.constant dense<0.000000e+00> : vector<2x5x5xf32>
    %231 = tpu.matmul %228, %229, %cst_79 {dimension_numbers = #tpu.dot_dimension_numbers<[2], [2], [1], [1], [0, 0, 0, 1, 1, 1], [0], [0]>} : vector<2x5x32xbf16>, vector<2x5x32xbf16>, vector<2x5x5xf32> -> vector<2x5x5xf32>
    "tpu.trace_stop"() : () -> ()
    %cst_80 = arith.constant 0.176776692 : f32
    %232 = vector.broadcast %cst_80 : f32 to vector<2x5x5xf32>
    %233 = arith.mulf %231, %232 : vector<2x5x5xf32>
    %cst_81 = arith.constant dense<0xFF800000> : vector<2x5xf32>
    %234 = vector.multi_reduction <maximumf>, %233, %cst_81 [2] : vector<2x5x5xf32> to vector<2x5xf32>
    %235 = vector.shape_cast %234 : vector<2x5xf32> to vector<2x5x1xf32>
    %236 = vector.broadcast %235 : vector<2x5x1xf32> to vector<2x5x5xf32>
    %237 = arith.subf %233, %236 : vector<2x5x5xf32>
    %238 = math.exp %237 : vector<2x5x5xf32>
    %cst_82 = arith.constant dense<0.000000e+00> : vector<2x5xf32>
    %239 = vector.multi_reduction <add>, %238, %cst_82 [2] : vector<2x5x5xf32> to vector<2x5xf32>
    %240 = vector.shape_cast %239 : vector<2x5xf32> to vector<2x5x1xf32>
    %241 = tpu.reciprocal %240 {approx = true} : vector<2x5x1xf32> -> vector<2x5x1xf32>
    %242 = vector.broadcast %241 : vector<2x5x1xf32> to vector<2x5x5xf32>
    %243 = arith.mulf %238, %242 : vector<2x5x5xf32>
    %244 = arith.truncf %243 : vector<2x5x5xf32> to vector<2x5x5xbf16>
    "tpu.trace_start"() <{level = 10 : i32, message = "bqk,bkd->bqd"}> : () -> ()
    %cst_83 = arith.constant dense<0.000000e+00> : vector<2x5x32xf32>
    %245 = tpu.matmul %244, %230, %cst_83 {dimension_numbers = #tpu.dot_dimension_numbers<[2], [1], [1], [2], [0, 0, 0, 1, 1, 2], [0], [0]>} : vector<2x5x5xbf16>, vector<2x5x32xbf16>, vector<2x5x32xf32> -> vector<2x5x32xf32>
    "tpu.trace_stop"() : () -> ()
    %246 = vector.extract_strided_slice %227 {offsets = [0, 0, 32], sizes = [2, 5, 32], strides = [1, 1, 1]} : vector<2x5x192xbf16> to vector<2x5x32xbf16>
    %247 = vector.extract_strided_slice %227 {offsets = [0, 0, 96], sizes = [2, 5, 32], strides = [1, 1, 1]} : vector<2x5x192xbf16> to vector<2x5x32xbf16>
    %248 = vector.extract_strided_slice %227 {offsets = [0, 0, 160], sizes = [2, 5, 32], strides = [1, 1, 1]} : vector<2x5x192xbf16> to vector<2x5x32xbf16>
    "tpu.trace_start"() <{level = 10 : i32, message = "bqd,bkd->bqk"}> : () -> ()
    %cst_84 = arith.constant dense<0.000000e+00> : vector<2x5x5xf32>
    %249 = tpu.matmul %246, %247, %cst_84 {dimension_numbers = #tpu.dot_dimension_numbers<[2], [2], [1], [1], [0, 0, 0, 1, 1, 1], [0], [0]>} : vector<2x5x32xbf16>, vector<2x5x32xbf16>, vector<2x5x5xf32> -> vector<2x5x5xf32>
    "tpu.trace_stop"() : () -> ()
    %cst_85 = arith.constant 0.176776692 : f32
    %250 = vector.broadcast %cst_85 : f32 to vector<2x5x5xf32>
    %251 = arith.mulf %249, %250 : vector<2x5x5xf32>
    %cst_86 = arith.constant dense<0xFF800000> : vector<2x5xf32>
    %252 = vector.multi_reduction <maximumf>, %251, %cst_86 [2] : vector<2x5x5xf32> to vector<2x5xf32>
    %253 = vector.shape_cast %252 : vector<2x5xf32> to vector<2x5x1xf32>
    %254 = vector.broadcast %253 : vector<2x5x1xf32> to vector<2x5x5xf32>
    %255 = arith.subf %251, %254 : vector<2x5x5xf32>
    %256 = math.exp %255 : vector<2x5x5xf32>
    %cst_87 = arith.constant dense<0.000000e+00> : vector<2x5xf32>
    %257 = vector.multi_reduction <add>, %256, %cst_87 [2] : vector<2x5x5xf32> to vector<2x5xf32>
    %258 = vector.shape_cast %257 : vector<2x5xf32> to vector<2x5x1xf32>
    %259 = tpu.reciprocal %258 {approx = true} : vector<2x5x1xf32> -> vector<2x5x1xf32>
    %260 = vector.broadcast %259 : vector<2x5x1xf32> to vector<2x5x5xf32>
    %261 = arith.mulf %256, %260 : vector<2x5x5xf32>
    %262 = arith.truncf %261 : vector<2x5x5xf32> to vector<2x5x5xbf16>
    "tpu.trace_start"() <{level = 10 : i32, message = "bqk,bkd->bqd"}> : () -> ()
    %cst_88 = arith.constant dense<0.000000e+00> : vector<2x5x32xf32>
    %263 = tpu.matmul %262, %248, %cst_88 {dimension_numbers = #tpu.dot_dimension_numbers<[2], [1], [1], [2], [0, 0, 0, 1, 1, 2], [0], [0]>} : vector<2x5x5xbf16>, vector<2x5x32xbf16>, vector<2x5x32xf32> -> vector<2x5x32xf32>
    "tpu.trace_stop"() : () -> ()
    %264 = tpu.concatenate %245, %263 in 2 : vector<2x5x32xf32>, vector<2x5x32xf32> -> vector<2x5x64xf32>
    %265 = vector.shape_cast %264 : vector<2x5x64xf32> to vector<10x64xf32>
    %266 = arith.truncf %265 : vector<10x64xf32> to vector<10x64xbf16>
    %cst_89 = arith.constant dense<0.000000e+00> : vector<10x64xf32>
    %267 = tpu.matmul %266, %194, %cst_89 {dimension_numbers = #tpu.dot_dimension_numbers<[1], [0], [0], [1], [0, 0, 1, 1], [], []>} : vector<10x64xbf16>, vector<64x64xbf16>, vector<10x64xf32> -> vector<10x64xf32>
    %268 = vector.broadcast %195 : vector<1x64xf32> to vector<10x64xf32>
    %269 = arith.addf %267, %268 : vector<10x64xf32>
    %270 = arith.addf %269, %190 : vector<10x64xf32>
    %cst_90 = arith.constant dense<0.000000e+00> : vector<10xf32>
    %271 = vector.multi_reduction <add>, %270, %cst_90 [1] : vector<10x64xf32> to vector<10xf32>
    %272 = vector.shape_cast %271 : vector<10xf32> to vector<10x1xf32>
    %cst_91 = arith.constant 6.400000e+01 : f32
    %273 = vector.broadcast %cst_91 : f32 to vector<10x1xf32>
    %274 = arith.divf %272, %273 : vector<10x1xf32>
    %275 = vector.broadcast %274 : vector<10x1xf32> to vector<10x64xf32>
    %276 = arith.subf %270, %275 : vector<10x64xf32>
    %277 = arith.mulf %276, %276 : vector<10x64xf32>
    %cst_92 = arith.constant dense<0.000000e+00> : vector<10xf32>
    %278 = vector.multi_reduction <add>, %277, %cst_92 [1] : vector<10x64xf32> to vector<10xf32>
    %279 = vector.shape_cast %278 : vector<10xf32> to vector<10x1xf32>
    %cst_93 = arith.constant 6.400000e+01 : f32
    %280 = vector.broadcast %cst_93 : f32 to vector<10x1xf32>
    %281 = arith.divf %279, %280 : vector<10x1xf32>
    %282 = vector.broadcast %274 : vector<10x1xf32> to vector<10x64xf32>
    %283 = arith.subf %270, %282 : vector<10x64xf32>
    %cst_94 = arith.constant 9.99999974E-6 : f32
    %284 = vector.broadcast %cst_94 : f32 to vector<10x1xf32>
    %285 = arith.addf %281, %284 : vector<10x1xf32>
    %286 = math.rsqrt %285 : vector<10x1xf32>
    %287 = vector.broadcast %286 : vector<10x1xf32> to vector<10x64xf32>
    %288 = arith.mulf %283, %287 : vector<10x64xf32>
    %289 = vector.broadcast %196 : vector<1x64xf32> to vector<10x64xf32>
    %290 = arith.mulf %288, %289 : vector<10x64xf32>
    %291 = vector.broadcast %197 : vector<1x64xf32> to vector<10x64xf32>
    %292 = arith.addf %290, %291 : vector<10x64xf32>
    %293 = arith.truncf %292 : vector<10x64xf32> to vector<10x64xbf16>
    %cst_95 = arith.constant dense<0.000000e+00> : vector<10x128xf32>
    %294 = tpu.matmul %293, %198, %cst_95 {dimension_numbers = #tpu.dot_dimension_numbers<[1], [0], [0], [1], [0, 0, 1, 1], [], []>} : vector<10x64xbf16>, vector<64x128xbf16>, vector<10x128xf32> -> vector<10x128xf32>
    %295 = vector.broadcast %199 : vector<1x128xf32> to vector<10x128xf32>
    %296 = arith.addf %294, %295 : vector<10x128xf32>
    %cst_96 = arith.constant 5.000000e-01 : f32
    %297 = vector.broadcast %cst_96 : f32 to vector<10x128xf32>
    %298 = arith.mulf %297, %296 : vector<10x128xf32>
    %cst_97 = arith.constant 4.471500e-02 : f32
    %299 = vector.broadcast %cst_97 : f32 to vector<10x128xf32>
    %300 = arith.mulf %299, %296 : vector<10x128xf32>
    %301 = arith.mulf %300, %296 : vector<10x128xf32>
    %302 = arith.mulf %301, %296 : vector<10x128xf32>
    %303 = arith.addf %296, %302 : vector<10x128xf32>
    %cst_98 = arith.constant 0.797884583 : f32
    %304 = vector.broadcast %cst_98 : f32 to vector<10x128xf32>
    %305 = arith.mulf %304, %303 : vector<10x128xf32>
    %306 = math.tanh %305 : vector<10x128xf32>
    %cst_99 = arith.constant 1.000000e+00 : f32
    %307 = vector.broadcast %cst_99 : f32 to vector<10x128xf32>
    %308 = arith.addf %307, %306 : vector<10x128xf32>
    %309 = arith.mulf %298, %308 : vector<10x128xf32>
    %310 = arith.truncf %309 : vector<10x128xf32> to vector<10x128xbf16>
    %cst_100 = arith.constant dense<0.000000e+00> : vector<10x64xf32>
    %311 = tpu.matmul %310, %200, %cst_100 {dimension_numbers = #tpu.dot_dimension_numbers<[1], [0], [0], [1], [0, 0, 1, 1], [], []>} : vector<10x128xbf16>, vector<128x64xbf16>, vector<10x64xf32> -> vector<10x64xf32>
    %312 = vector.broadcast %201 : vector<1x64xf32> to vector<10x64xf32>
    %313 = arith.addf %311, %312 : vector<10x64xf32>
    %314 = arith.addf %313, %270 : vector<10x64xf32>
    %c184 = arith.constant 184 : index
    %c0_101 = arith.constant 0 : index
    %315 = vector.load %arg1[%c184, %c0_101] : memref<272x256xf32, #tpu.memory_space<vmem>>, vector<1x64xf32>
    %c192 = arith.constant 192 : index
    %c0_102 = arith.constant 0 : index
    %316 = vector.load %arg1[%c192, %c0_102] : memref<272x256xf32, #tpu.memory_space<vmem>>, vector<1x64xf32>
    %c928 = arith.constant 928 : index
    %c0_103 = arith.constant 0 : index
    %317 = vector.load %arg2[%c928, %c0_103] : memref<1696x256xbf16, #tpu.memory_space<vmem>>, vector<64x192xbf16>
    %c992 = arith.constant 992 : index
    %c0_104 = arith.constant 0 : index
    %318 = vector.load %arg2[%c992, %c0_104] : memref<1696x256xbf16, #tpu.memory_space<vmem>>, vector<64x64xbf16>
    %c200 = arith.constant 200 : index
    %c0_105 = arith.constant 0 : index
    %319 = vector.load %arg1[%c200, %c0_105] : memref<272x256xf32, #tpu.memory_space<vmem>>, vector<1x64xf32>
    %c208 = arith.constant 208 : index
    %c0_106 = arith.constant 0 : index
    %320 = vector.load %arg1[%c208, %c0_106] : memref<272x256xf32, #tpu.memory_space<vmem>>, vector<1x64xf32>
    %c216 = arith.constant 216 : index
    %c0_107 = arith.constant 0 : index
    %321 = vector.load %arg1[%c216, %c0_107] : memref<272x256xf32, #tpu.memory_space<vmem>>, vector<1x64xf32>
    %c1056 = arith.constant 1056 : index
    %c0_108 = arith.constant 0 : index
    %322 = vector.load %arg2[%c1056, %c0_108] : memref<1696x256xbf16, #tpu.memory_space<vmem>>, vector<64x128xbf16>
    %c224 = arith.constant 224 : index
    %c0_109 = arith.constant 0 : index
    %323 = vector.load %arg1[%c224, %c0_109] : memref<272x256xf32, #tpu.memory_space<vmem>>, vector<1x128xf32>
    %c1120 = arith.constant 1120 : index
    %c0_110 = arith.constant 0 : index
    %324 = vector.load %arg2[%c1120, %c0_110] : memref<1696x256xbf16, #tpu.memory_space<vmem>>, vector<128x64xbf16>
    %c232 = arith.constant 232 : index
    %c0_111 = arith.constant 0 : index
    %325 = vector.load %arg1[%c232, %c0_111] : memref<272x256xf32, #tpu.memory_space<vmem>>, vector<1x64xf32>
    %cst_112 = arith.constant dense<0.000000e+00> : vector<10xf32>
    %326 = vector.multi_reduction <add>, %314, %cst_112 [1] : vector<10x64xf32> to vector<10xf32>
    %327 = vector.shape_cast %326 : vector<10xf32> to vector<10x1xf32>
    %cst_113 = arith.constant 6.400000e+01 : f32
    %328 = vector.broadcast %cst_113 : f32 to vector<10x1xf32>
    %329 = arith.divf %327, %328 : vector<10x1xf32>
    %330 = vector.broadcast %329 : vector<10x1xf32> to vector<10x64xf32>
    %331 = arith.subf %314, %330 : vector<10x64xf32>
    %332 = arith.mulf %331, %331 : vector<10x64xf32>
    %cst_114 = arith.constant dense<0.000000e+00> : vector<10xf32>
    %333 = vector.multi_reduction <add>, %332, %cst_114 [1] : vector<10x64xf32> to vector<10xf32>
    %334 = vector.shape_cast %333 : vector<10xf32> to vector<10x1xf32>
    %cst_115 = arith.constant 6.400000e+01 : f32
    %335 = vector.broadcast %cst_115 : f32 to vector<10x1xf32>
    %336 = arith.divf %334, %335 : vector<10x1xf32>
    %337 = vector.broadcast %329 : vector<10x1xf32> to vector<10x64xf32>
    %338 = arith.subf %314, %337 : vector<10x64xf32>
    %cst_116 = arith.constant 9.99999974E-6 : f32
    %339 = vector.broadcast %cst_116 : f32 to vector<10x1xf32>
    %340 = arith.addf %336, %339 : vector<10x1xf32>
    %341 = math.rsqrt %340 : vector<10x1xf32>
    %342 = vector.broadcast %341 : vector<10x1xf32> to vector<10x64xf32>
    %343 = arith.mulf %338, %342 : vector<10x64xf32>
    %344 = vector.broadcast %315 : vector<1x64xf32> to vector<10x64xf32>
    %345 = arith.mulf %343, %344 : vector<10x64xf32>
    %346 = vector.broadcast %316 : vector<1x64xf32> to vector<10x64xf32>
    %347 = arith.addf %345, %346 : vector<10x64xf32>
    %348 = arith.truncf %347 : vector<10x64xf32> to vector<10x64xbf16>
    %cst_117 = arith.constant dense<0.000000e+00> : vector<10x192xf32>
    %349 = tpu.matmul %348, %317, %cst_117 {dimension_numbers = #tpu.dot_dimension_numbers<[1], [0], [0], [1], [0, 0, 1, 1], [], []>} : vector<10x64xbf16>, vector<64x192xbf16>, vector<10x192xf32> -> vector<10x192xf32>
    %350 = arith.truncf %349 : vector<10x192xf32> to vector<10x192xbf16>
    %351 = vector.shape_cast %350 : vector<10x192xbf16> to vector<2x5x192xbf16>
    %352 = vector.extract_strided_slice %351 {offsets = [0, 0, 0], sizes = [2, 5, 32], strides = [1, 1, 1]} : vector<2x5x192xbf16> to vector<2x5x32xbf16>
    %353 = vector.extract_strided_slice %351 {offsets = [0, 0, 64], sizes = [2, 5, 32], strides = [1, 1, 1]} : vector<2x5x192xbf16> to vector<2x5x32xbf16>
    %354 = vector.extract_strided_slice %351 {offsets = [0, 0, 128], sizes = [2, 5, 32], strides = [1, 1, 1]} : vector<2x5x192xbf16> to vector<2x5x32xbf16>
    "tpu.trace_start"() <{level = 10 : i32, message = "bqd,bkd->bqk"}> : () -> ()
    %cst_118 = arith.constant dense<0.000000e+00> : vector<2x5x5xf32>
    %355 = tpu.matmul %352, %353, %cst_118 {dimension_numbers = #tpu.dot_dimension_numbers<[2], [2], [1], [1], [0, 0, 0, 1, 1, 1], [0], [0]>} : vector<2x5x32xbf16>, vector<2x5x32xbf16>, vector<2x5x5xf32> -> vector<2x5x5xf32>
    "tpu.trace_stop"() : () -> ()
    %cst_119 = arith.constant 0.176776692 : f32
    %356 = vector.broadcast %cst_119 : f32 to vector<2x5x5xf32>
    %357 = arith.mulf %355, %356 : vector<2x5x5xf32>
    %cst_120 = arith.constant dense<0xFF800000> : vector<2x5xf32>
    %358 = vector.multi_reduction <maximumf>, %357, %cst_120 [2] : vector<2x5x5xf32> to vector<2x5xf32>
    %359 = vector.shape_cast %358 : vector<2x5xf32> to vector<2x5x1xf32>
    %360 = vector.broadcast %359 : vector<2x5x1xf32> to vector<2x5x5xf32>
    %361 = arith.subf %357, %360 : vector<2x5x5xf32>
    %362 = math.exp %361 : vector<2x5x5xf32>
    %cst_121 = arith.constant dense<0.000000e+00> : vector<2x5xf32>
    %363 = vector.multi_reduction <add>, %362, %cst_121 [2] : vector<2x5x5xf32> to vector<2x5xf32>
    %364 = vector.shape_cast %363 : vector<2x5xf32> to vector<2x5x1xf32>
    %365 = tpu.reciprocal %364 {approx = true} : vector<2x5x1xf32> -> vector<2x5x1xf32>
    %366 = vector.broadcast %365 : vector<2x5x1xf32> to vector<2x5x5xf32>
    %367 = arith.mulf %362, %366 : vector<2x5x5xf32>
    %368 = arith.truncf %367 : vector<2x5x5xf32> to vector<2x5x5xbf16>
    "tpu.trace_start"() <{level = 10 : i32, message = "bqk,bkd->bqd"}> : () -> ()
    %cst_122 = arith.constant dense<0.000000e+00> : vector<2x5x32xf32>
    %369 = tpu.matmul %368, %354, %cst_122 {dimension_numbers = #tpu.dot_dimension_numbers<[2], [1], [1], [2], [0, 0, 0, 1, 1, 2], [0], [0]>} : vector<2x5x5xbf16>, vector<2x5x32xbf16>, vector<2x5x32xf32> -> vector<2x5x32xf32>
    "tpu.trace_stop"() : () -> ()
    %370 = vector.extract_strided_slice %351 {offsets = [0, 0, 32], sizes = [2, 5, 32], strides = [1, 1, 1]} : vector<2x5x192xbf16> to vector<2x5x32xbf16>
    %371 = vector.extract_strided_slice %351 {offsets = [0, 0, 96], sizes = [2, 5, 32], strides = [1, 1, 1]} : vector<2x5x192xbf16> to vector<2x5x32xbf16>
    %372 = vector.extract_strided_slice %351 {offsets = [0, 0, 160], sizes = [2, 5, 32], strides = [1, 1, 1]} : vector<2x5x192xbf16> to vector<2x5x32xbf16>
    "tpu.trace_start"() <{level = 10 : i32, message = "bqd,bkd->bqk"}> : () -> ()
    %cst_123 = arith.constant dense<0.000000e+00> : vector<2x5x5xf32>
    %373 = tpu.matmul %370, %371, %cst_123 {dimension_numbers = #tpu.dot_dimension_numbers<[2], [2], [1], [1], [0, 0, 0, 1, 1, 1], [0], [0]>} : vector<2x5x32xbf16>, vector<2x5x32xbf16>, vector<2x5x5xf32> -> vector<2x5x5xf32>
    "tpu.trace_stop"() : () -> ()
    %cst_124 = arith.constant 0.176776692 : f32
    %374 = vector.broadcast %cst_124 : f32 to vector<2x5x5xf32>
    %375 = arith.mulf %373, %374 : vector<2x5x5xf32>
    %cst_125 = arith.constant dense<0xFF800000> : vector<2x5xf32>
    %376 = vector.multi_reduction <maximumf>, %375, %cst_125 [2] : vector<2x5x5xf32> to vector<2x5xf32>
    %377 = vector.shape_cast %376 : vector<2x5xf32> to vector<2x5x1xf32>
    %378 = vector.broadcast %377 : vector<2x5x1xf32> to vector<2x5x5xf32>
    %379 = arith.subf %375, %378 : vector<2x5x5xf32>
    %380 = math.exp %379 : vector<2x5x5xf32>
    %cst_126 = arith.constant dense<0.000000e+00> : vector<2x5xf32>
    %381 = vector.multi_reduction <add>, %380, %cst_126 [2] : vector<2x5x5xf32> to vector<2x5xf32>
    %382 = vector.shape_cast %381 : vector<2x5xf32> to vector<2x5x1xf32>
    %383 = tpu.reciprocal %382 {approx = true} : vector<2x5x1xf32> -> vector<2x5x1xf32>
    %384 = vector.broadcast %383 : vector<2x5x1xf32> to vector<2x5x5xf32>
    %385 = arith.mulf %380, %384 : vector<2x5x5xf32>
    %386 = arith.truncf %385 : vector<2x5x5xf32> to vector<2x5x5xbf16>
    "tpu.trace_start"() <{level = 10 : i32, message = "bqk,bkd->bqd"}> : () -> ()
    %cst_127 = arith.constant dense<0.000000e+00> : vector<2x5x32xf32>
    %387 = tpu.matmul %386, %372, %cst_127 {dimension_numbers = #tpu.dot_dimension_numbers<[2], [1], [1], [2], [0, 0, 0, 1, 1, 2], [0], [0]>} : vector<2x5x5xbf16>, vector<2x5x32xbf16>, vector<2x5x32xf32> -> vector<2x5x32xf32>
    "tpu.trace_stop"() : () -> ()
    %388 = tpu.concatenate %369, %387 in 2 : vector<2x5x32xf32>, vector<2x5x32xf32> -> vector<2x5x64xf32>
    %389 = vector.shape_cast %388 : vector<2x5x64xf32> to vector<10x64xf32>
    %390 = arith.truncf %389 : vector<10x64xf32> to vector<10x64xbf16>
    %cst_128 = arith.constant dense<0.000000e+00> : vector<10x64xf32>
    %391 = tpu.matmul %390, %318, %cst_128 {dimension_numbers = #tpu.dot_dimension_numbers<[1], [0], [0], [1], [0, 0, 1, 1], [], []>} : vector<10x64xbf16>, vector<64x64xbf16>, vector<10x64xf32> -> vector<10x64xf32>
    %392 = vector.broadcast %319 : vector<1x64xf32> to vector<10x64xf32>
    %393 = arith.addf %391, %392 : vector<10x64xf32>
    %394 = arith.addf %393, %314 : vector<10x64xf32>
    %cst_129 = arith.constant dense<0.000000e+00> : vector<10xf32>
    %395 = vector.multi_reduction <add>, %394, %cst_129 [1] : vector<10x64xf32> to vector<10xf32>
    %396 = vector.shape_cast %395 : vector<10xf32> to vector<10x1xf32>
    %cst_130 = arith.constant 6.400000e+01 : f32
    %397 = vector.broadcast %cst_130 : f32 to vector<10x1xf32>
    %398 = arith.divf %396, %397 : vector<10x1xf32>
    %399 = vector.broadcast %398 : vector<10x1xf32> to vector<10x64xf32>
    %400 = arith.subf %394, %399 : vector<10x64xf32>
    %401 = arith.mulf %400, %400 : vector<10x64xf32>
    %cst_131 = arith.constant dense<0.000000e+00> : vector<10xf32>
    %402 = vector.multi_reduction <add>, %401, %cst_131 [1] : vector<10x64xf32> to vector<10xf32>
    %403 = vector.shape_cast %402 : vector<10xf32> to vector<10x1xf32>
    %cst_132 = arith.constant 6.400000e+01 : f32
    %404 = vector.broadcast %cst_132 : f32 to vector<10x1xf32>
    %405 = arith.divf %403, %404 : vector<10x1xf32>
    %406 = vector.broadcast %398 : vector<10x1xf32> to vector<10x64xf32>
    %407 = arith.subf %394, %406 : vector<10x64xf32>
    %cst_133 = arith.constant 9.99999974E-6 : f32
    %408 = vector.broadcast %cst_133 : f32 to vector<10x1xf32>
    %409 = arith.addf %405, %408 : vector<10x1xf32>
    %410 = math.rsqrt %409 : vector<10x1xf32>
    %411 = vector.broadcast %410 : vector<10x1xf32> to vector<10x64xf32>
    %412 = arith.mulf %407, %411 : vector<10x64xf32>
    %413 = vector.broadcast %320 : vector<1x64xf32> to vector<10x64xf32>
    %414 = arith.mulf %412, %413 : vector<10x64xf32>
    %415 = vector.broadcast %321 : vector<1x64xf32> to vector<10x64xf32>
    %416 = arith.addf %414, %415 : vector<10x64xf32>
    %417 = arith.truncf %416 : vector<10x64xf32> to vector<10x64xbf16>
    %cst_134 = arith.constant dense<0.000000e+00> : vector<10x128xf32>
    %418 = tpu.matmul %417, %322, %cst_134 {dimension_numbers = #tpu.dot_dimension_numbers<[1], [0], [0], [1], [0, 0, 1, 1], [], []>} : vector<10x64xbf16>, vector<64x128xbf16>, vector<10x128xf32> -> vector<10x128xf32>
    %419 = vector.broadcast %323 : vector<1x128xf32> to vector<10x128xf32>
    %420 = arith.addf %418, %419 : vector<10x128xf32>
    %cst_135 = arith.constant 5.000000e-01 : f32
    %421 = vector.broadcast %cst_135 : f32 to vector<10x128xf32>
    %422 = arith.mulf %421, %420 : vector<10x128xf32>
    %cst_136 = arith.constant 4.471500e-02 : f32
    %423 = vector.broadcast %cst_136 : f32 to vector<10x128xf32>
    %424 = arith.mulf %423, %420 : vector<10x128xf32>
    %425 = arith.mulf %424, %420 : vector<10x128xf32>
    %426 = arith.mulf %425, %420 : vector<10x128xf32>
    %427 = arith.addf %420, %426 : vector<10x128xf32>
    %cst_137 = arith.constant 0.797884583 : f32
    %428 = vector.broadcast %cst_137 : f32 to vector<10x128xf32>
    %429 = arith.mulf %428, %427 : vector<10x128xf32>
    %430 = math.tanh %429 : vector<10x128xf32>
    %cst_138 = arith.constant 1.000000e+00 : f32
    %431 = vector.broadcast %cst_138 : f32 to vector<10x128xf32>
    %432 = arith.addf %431, %430 : vector<10x128xf32>
    %433 = arith.mulf %422, %432 : vector<10x128xf32>
    %434 = arith.truncf %433 : vector<10x128xf32> to vector<10x128xbf16>
    %cst_139 = arith.constant dense<0.000000e+00> : vector<10x64xf32>
    %435 = tpu.matmul %434, %324, %cst_139 {dimension_numbers = #tpu.dot_dimension_numbers<[1], [0], [0], [1], [0, 0, 1, 1], [], []>} : vector<10x128xbf16>, vector<128x64xbf16>, vector<10x64xf32> -> vector<10x64xf32>
    %436 = vector.broadcast %325 : vector<1x64xf32> to vector<10x64xf32>
    %437 = arith.addf %435, %436 : vector<10x64xf32>
    %438 = arith.addf %437, %394 : vector<10x64xf32>
    %439 = vector.shape_cast %438 : vector<10x64xf32> to vector<2x5x64xf32>
    %440 = vector.extract_strided_slice %439 {offsets = [0, 0, 0], sizes = [2, 1, 64], strides = [1, 1, 1]} : vector<2x5x64xf32> to vector<2x1x64xf32>
    %441 = vector.shape_cast %440 : vector<2x1x64xf32> to vector<2x64xf32>
    %442 = arith.truncf %441 : vector<2x64xf32> to vector<2x64xbf16>
    %c1248 = arith.constant 1248 : index
    %c0_140 = arith.constant 0 : index
    %443 = vector.load %arg2[%c1248, %c0_140] : memref<1696x256xbf16, #tpu.memory_space<vmem>>, vector<64x64xbf16>
    %cst_141 = arith.constant dense<0.000000e+00> : vector<2x64xf32>
    %444 = tpu.matmul %442, %443, %cst_141 {dimension_numbers = #tpu.dot_dimension_numbers<[1], [0], [0], [1], [0, 0, 1, 1], [], []>} : vector<2x64xbf16>, vector<64x64xbf16>, vector<2x64xf32> -> vector<2x64xf32>
    %c240 = arith.constant 240 : index
    %c0_142 = arith.constant 0 : index
    %445 = vector.load %arg1[%c240, %c0_142] : memref<272x256xf32, #tpu.memory_space<vmem>>, vector<1x64xf32>
    %446 = vector.broadcast %445 : vector<1x64xf32> to vector<2x64xf32>
    %447 = arith.addf %444, %446 : vector<2x64xf32>
    %cst_143 = arith.constant 0.000000e+00 : f32
    %448 = vector.broadcast %cst_143 : f32 to vector<2x64xf32>
    %449 = arith.maximumf %447, %448 : vector<2x64xf32>
    %450 = arith.truncf %449 : vector<2x64xf32> to vector<2x64xbf16>
    %c1312 = arith.constant 1312 : index
    %c0_144 = arith.constant 0 : index
    %451 = vector.load %arg2[%c1312, %c0_144] : memref<1696x256xbf16, #tpu.memory_space<vmem>>, vector<64x64xbf16>
    %cst_145 = arith.constant dense<0.000000e+00> : vector<2x64xf32>
    %452 = tpu.matmul %450, %451, %cst_145 {dimension_numbers = #tpu.dot_dimension_numbers<[1], [0], [0], [1], [0, 0, 1, 1], [], []>} : vector<2x64xbf16>, vector<64x64xbf16>, vector<2x64xf32> -> vector<2x64xf32>
    %c248 = arith.constant 248 : index
    %c0_146 = arith.constant 0 : index
    %453 = vector.load %arg1[%c248, %c0_146] : memref<272x256xf32, #tpu.memory_space<vmem>>, vector<1x64xf32>
    %454 = vector.broadcast %453 : vector<1x64xf32> to vector<2x64xf32>
    %455 = arith.addf %452, %454 : vector<2x64xf32>
    %cst_147 = arith.constant 0.000000e+00 : f32
    %456 = vector.broadcast %cst_147 : f32 to vector<2x64xf32>
    %457 = arith.maximumf %455, %456 : vector<2x64xf32>
    %c1376 = arith.constant 1376 : index
    %c0_148 = arith.constant 0 : index
    %458 = vector.load %arg2[%c1376, %c0_148] : memref<1696x256xbf16, #tpu.memory_space<vmem>>, vector<64x192xbf16>
    %cst_149 = arith.constant dense<0.000000e+00> : vector<2x192xf32>
    %459 = tpu.matmul %442, %458, %cst_149 {dimension_numbers = #tpu.dot_dimension_numbers<[1], [0], [0], [1], [0, 0, 1, 1], [], []>} : vector<2x64xbf16>, vector<64x192xbf16>, vector<2x192xf32> -> vector<2x192xf32>
    %c256_150 = arith.constant 256 : index
    %c0_151 = arith.constant 0 : index
    %460 = vector.load %arg1[%c256_150, %c0_151] : memref<272x256xf32, #tpu.memory_space<vmem>>, vector<1x192xf32>
    %461 = vector.broadcast %460 : vector<1x192xf32> to vector<2x192xf32>
    %462 = arith.addf %459, %461 : vector<2x192xf32>
    %cst_152 = arith.constant 0.000000e+00 : f32
    %463 = vector.broadcast %cst_152 : f32 to vector<2x192xf32>
    %464 = arith.maximumf %462, %463 : vector<2x192xf32>
    %465 = arith.truncf %457 : vector<2x64xf32> to vector<2x64xbf16>
    %c1440 = arith.constant 1440 : index
    %c0_153 = arith.constant 0 : index
    %466 = vector.load %arg2[%c1440, %c0_153] : memref<1696x256xbf16, #tpu.memory_space<vmem>>, vector<64x128xbf16>
    %cst_154 = arith.constant dense<0.000000e+00> : vector<2x128xf32>
    %467 = tpu.matmul %465, %466, %cst_154 {dimension_numbers = #tpu.dot_dimension_numbers<[1], [0], [0], [1], [0, 0, 1, 1], [], []>} : vector<2x64xbf16>, vector<64x128xbf16>, vector<2x128xf32> -> vector<2x128xf32>
    %468 = arith.truncf %464 : vector<2x192xf32> to vector<2x192xbf16>
    %c1504 = arith.constant 1504 : index
    %c0_155 = arith.constant 0 : index
    %469 = vector.load %arg2[%c1504, %c0_155] : memref<1696x256xbf16, #tpu.memory_space<vmem>>, vector<192x128xbf16>
    %cst_156 = arith.constant dense<0.000000e+00> : vector<2x128xf32>
    %470 = tpu.matmul %468, %469, %cst_156 {dimension_numbers = #tpu.dot_dimension_numbers<[1], [0], [0], [1], [0, 0, 1, 1], [], []>} : vector<2x192xbf16>, vector<192x128xbf16>, vector<2x128xf32> -> vector<2x128xf32>
    %471 = arith.addf %467, %470 : vector<2x128xf32>
    %c264 = arith.constant 264 : index
    %c0_157 = arith.constant 0 : index
    %472 = vector.load %arg1[%c264, %c0_157] : memref<272x256xf32, #tpu.memory_space<vmem>>, vector<1x128xf32>
    %473 = vector.broadcast %472 : vector<1x128xf32> to vector<2x128xf32>
    %474 = arith.addf %471, %473 : vector<2x128xf32>
    %475 = tpu.iota {dimensions = array<i32: 1>} : vector<2x128xi32>
    %c6_i32 = arith.constant 6 : i32
    %476 = vector.broadcast %c6_i32 : i32 to vector<2x128xi32>
    %477 = arith.cmpi sge, %475, %476 : vector<2x128xi32>
    %c30_i32 = arith.constant 30 : i32
    %478 = vector.broadcast %c30_i32 : i32 to vector<2x128xi32>
    %479 = arith.cmpi slt, %475, %478 : vector<2x128xi32>
    %480 = arith.andi %477, %479 : vector<2x128xi1>
    %481 = arith.negf %474 : vector<2x128xf32>
    %482 = math.exp %481 : vector<2x128xf32>
    %cst_158 = arith.constant 1.000000e+00 : f32
    %483 = vector.broadcast %cst_158 : f32 to vector<2x128xf32>
    %484 = arith.addf %483, %482 : vector<2x128xf32>
    %485 = arith.divf %483, %484 : vector<2x128xf32>
    %486 = arith.select %480, %485, %474 : vector<2x128xi1>, vector<2x128xf32>
    %c0_159 = arith.constant 0 : index
    %c0_160 = arith.constant 0 : index
    %487 = vector.load %arg3[%c0_159, %c0_160] : memref<2x128xf32, #tpu.memory_space<vmem>>, vector<2x128xf32>
    tpu.vector_store %arg3[%c0_159, %c0_160], %486 {strides = array<i32>} : memref<2x128xf32, #tpu.memory_space<vmem>>, vector<2x128xf32>,
    return
  }
}

</mosaic_0001>

<bundles_post_ra>
// kernel: my3dvit_forward.1
= control target key start
LH: loop header
LB: loop body
LE: loop exit
PB: predicated region body
PF: predicated region fallthrough
CT: control target
= control target key end

     0   :  { %v7008_v20 = vmov 839922192   ;;  %v74_v22 = vlaneseq  ;;  %v7009_v23 = vmov 1985246804   ;;  %vm525_vm0 = vcmask 523264   ;;  %s7014_s28 = smov 64   ;;  %s8429_s0 = inlined_call_operand.vmem [shape: f32[8,4,256], index: 0, kind: input, shape index: {}]   ;;  %s8430_s2 = inlined_call_operand.vmem [shape: bf16[1696,256], index: 2, kind: input, shape index: {}]   ;;  %s8431_s1 = inlined_call_operand.vmem [shape: f32[272,256], index: 1, kind: input, shape index: {}]   ;;  %s8432_s3 = inlined_call_operand.vmem [shape: f32[2,128], index: 3, kind: output, shape index: {}]  }
   0x1   :  { %v15_v0 = vld [vmem:[%s8429_s0] sm:$0xff]  ;;  %v16_v1 = vld [vmem:[%s8429_s0 + $0x8] sm:$0xff]  ;;  %v17_v6 = vld [vmem:[%s8429_s0 + $0x10] sm:$0xff]  ;;  %v72_v21 = vunpack.c.l.s4 %v7008_v20  ;;  %v79_v24 = vunpack.c.l.s4 %v7009_v23  ;;  %vm7012_vm1 = vmmov 0   ;;  %vm1049_vm2 = vcmask 261120   ;;  %s7018_s22 = smov 32  }
   0x2   :  { %v19_v2 = vld [vmem:[%s8429_s0 + $0x20] sm:$0xff]  ;;  %v34_v3 = vcombine.low %v15_v0, %v16_v1  ;;  %v35_v4 = vcombine.high %v15_v0, %v16_v1  ;;  %v20_v5 = vld [vmem:[%s8429_s0 + $0x28] sm:$0xff]  ;;  %v18_v7 = vld [vmem:[%s8429_s0 + $0x18] sm:$0xff]  ;;  %v7064_v26 = vshrl.u32 %v74_v22, 7  ;;  %vm1489_vm3 = vcmask 27648  }
   0x3   :  { %v38_v8 = vcombine.low %v19_v2, %v20_v5  ;;  %v39_v9 = vcombine.high %v19_v2, %v20_v5  ;;  %v36_v10 = vcombine.low %v17_v6, %v18_v7  ;;  %v37_v11 = vcombine.high %v17_v6, %v18_v7  ;;  %v21_v12 = vld [vmem:[%s8429_s0 + $0x30] sm:$0xff]  ;;  %v22_v13 = vld [vmem:[%s8429_s0 + $0x38] sm:$0xff]  ;;  %v6757_v23 = vld [vmem:[%s8430_s2 + $0xe0] ss:$8 sps:$4 sm:$0xff]   ;;  %s7013_s0 = smov 96  }
   0x4   :  { %v50_v14 = vadd.f32 %v35_v4, %v34_v3  ;;  %v40_v15 = vcombine.low %v21_v12, %v22_v13  ;;  %v41_v16 = vcombine.high %v21_v12, %v22_v13  ;;  %v73_v25 = vunpack.c.0.s8 %v72_v21  ;;  %v6755_v20 = vld [vmem:[%s8430_s2 + $0xd0] ss:$8 sps:$4 sm:$0xff]  }
   0x5   :  { %v56_v17 = vadd.f32 %v39_v9, %v38_v8  ;;  %v53_v18 = vadd.f32 %v37_v11, %v36_v10  ;;  %v80_v27 = vunpack.c.0.s8 %v79_v24  ;;  %v6745_v10 = vld [vmem:[%s8430_s2 + $0x80] ss:$8 sps:$4 sm:$0xff]   ;;  %v6756_v21 = vld [vmem:[%s8430_s2 + $0x50] ss:$8 sps:$4 sm:$0xff]   ;;  %vm1592_vm4 = vcmask 1041408  }
   0x6   :  { %51 = vadd.xlane.f32.xlu0 %v50_v14  ;;  %v59_v19 = vadd.f32 %v41_v16, %v40_v15  ;;  %v7067_v28 = vsub.s32 %v73_v25, %v7064_v26  ;;  %v6746_v11 = vld [vmem:[%s8430_s2] ss:$8 sps:$4 sm:$0xff]   ;;  %6170 = vmatprep.subr.bf16.mxu0 %v6745_v10  ;;  %v6751_v16 = vld [vmem:[%s8430_s2 + $0xb0] ss:$8 sps:$4 sm:$0xff]   ;;  %vm1588_vm5 = vcmask 31744   ;;  %vm2353_vm6 = vcmask 519168  }
   0x7   :  { %57 = vadd.xlane.f32.xlu1 %v56_v17  ;;  %v7070_v29 = vsub.s32 %v80_v27, %v7064_v26  ;;  %6171 = vmatpush3.bf16.msra.mxu0 %v6746_v11  ;;  %v6749_v14 = vld [vmem:[%s8430_s2 + $0xa0] ss:$8 sps:$4 sm:$0xff]   ;;  %v6752_v17 = vld [vmem:[%s8430_s2 + $0x30] ss:$8 sps:$4 sm:$0xff]   ;;  %vm2452_vm7 = vcmask 1041409   ;;  %vm2454_vm8 = vcmask 1042434  }
   0x8   :  { %v6750_v15 = vld [vmem:[%s8430_s2 + $0x20] ss:$8 sps:$4 sm:$0xff]   ;;  %v6759_v25 = vld [vmem:[%s8430_s2 + $0xf0] ss:$8 sps:$4 sm:$0xff]   ;;  %vm2456_vm9 = vcmask 1043459   ;;  %vm2458_vm10 = vcmask 1044484  }
   0x9   :  { %v6758_v24 = vld [vmem:[%s8430_s2 + $0x60] ss:$8 sps:$4 sm:$0xff]   ;;  %v6760_v27 = vld [vmem:[%s8430_s2 + $0x70] ss:$8 sps:$4 sm:$0xff]   ;;  %vm2460_vm11 = vcmask 1045509   ;;  %vm2462_vm12 = vcmask 1046534  }
   0xa   :  { %54 = vadd.xlane.f32.xlu0 %v53_v18  ;;  %v6753_v18 = vld [vmem:[%s8430_s2 + $0xc0] ss:$8 sps:$4 sm:$0xff]   ;;  %vm2464_vm13 = vcmask 1047559   ;;  %vm2542_vm14 = vcmask 1042432   ;;  %vm2543_vm15 = vcmask 1046532  }
   0xb   :  { %60 = vadd.xlane.f32.xlu1 %v59_v19  ;;  %v6754_v19 = vld [vmem:[%s8430_s2 + $0x40] ss:$8 sps:$4 sm:$0xff]  }
  0x93   :  { %v52_v30 = vpop.xlane.xlu0 %51 }
  0x94   :  { %v63_v31 = vmul.f32 0.00390625, %v52_v30  ;;  %v58_v32 = vpop.xlane.xlu1 %57 }
  0x95   :  { %v65_v33 = vmul.f32 0.00390625, %v58_v32 }
  0x96   :  { %v77_v34 = vrot.slane %v63_v31, %v7067_v28  ;;  %v84_v35 = vrot.slane %v63_v31, %v7070_v29 }
  0x97   :  { %v105_v36 = vrot.slane %v65_v33, %v7067_v28  ;;  %v112_v37 = vrot.slane %v65_v33, %v7070_v29  ;;  %v55_v38 = vpop.xlane.xlu0 %54 }
  0x98   :  { %v7076_v39 = vsub.f32 %v15_v0, %v77_v34  ;;  %v7078_v40 = vsub.f32 %v16_v1, %v84_v35  ;;  %v64_v41 = vmul.f32 0.00390625, %v55_v38  ;;  %v61_v42 = vpop.xlane.xlu1 %60 }
  0x99   :  { %v7080_v43 = vsub.f32 %v19_v2, %v105_v36  ;;  %v7082_v44 = vsub.f32 %v20_v5, %v112_v37  ;;  %v66_v45 = vmul.f32 0.00390625, %v61_v42  ;;  %v7161_v42 = vsub.s32 0, %v7064_v26 }
  0x9a   :  { %v91_v46 = vrot.slane %v64_v41, %v7067_v28  ;;  %v98_v47 = vrot.slane %v64_v41, %v7070_v29  ;;  %v143_v48 = vmul.f32 %v7076_v39, %v7076_v39  ;;  %v144_v49 = vmul.f32 %v7078_v40, %v7078_v40 }
  0x9b   :  { %v119_v50 = vrot.slane %v66_v45, %v7067_v28  ;;  %v126_v51 = vrot.slane %v66_v45, %v7070_v29  ;;  %v147_v52 = vmul.f32 %v7080_v43, %v7080_v43  ;;  %v148_v53 = vmul.f32 %v7082_v44, %v7082_v44 }
  0x9c   :  { %v7096_v54 = vsub.f32 %v17_v6, %v91_v46  ;;  %v7098_v55 = vsub.f32 %v18_v7, %v98_v47  ;;  %v159_v56 = vcombine.low %v143_v48, %v144_v49  ;;  %v160_v57 = vcombine.high %v143_v48, %v144_v49  ;;  %v23_v47 = vld [vmem:[%s8431_s1] ss:$8 sm:$0x3]  ;;  %v5985_v49 = vld [vmem:[%s8431_s1 + $0x10] ss:$8 sm:$0x3] }
  0x9d   :  { %v7100_v58 = vsub.f32 %v21_v12, %v119_v50  ;;  %v7102_v59 = vsub.f32 %v22_v13, %v126_v51  ;;  %v163_v60 = vcombine.low %v147_v52, %v148_v53  ;;  %v164_v61 = vcombine.high %v147_v52, %v148_v53  ;;  %v6747_v12 = vld [vmem:[%s8430_s2 + $0x90] ss:$8 sps:$4 sm:$0xff]  }
  0x9e   :  { %v175_v62 = vadd.f32 %v160_v57, %v159_v56  ;;  %v145_v63 = vmul.f32 %v7096_v54, %v7096_v54  ;;  %v146_v0 = vmul.f32 %v7098_v55, %v7098_v55  ;;  %v6748_v13 = vld [vmem:[%s8430_s2 + $0x10] ss:$8 sps:$4 sm:$0xff]   ;;  %6172 = vmatprep.subr.bf16.mxu0 %v6747_v12  ;;  %v7164_v45 = vsub.s32 1, %v7064_v26 }
  0x9f   :  { %v149_v1 = vmul.f32 %v7100_v58, %v7100_v58  ;;  %v150_v2 = vmul.f32 %v7102_v59, %v7102_v59  ;;  %v181_v3 = vadd.f32 %v164_v61, %v163_v60  ;;  %6173 = vmatpush3.bf16.msra.mxu0 %v6748_v13  ;;  %v279_v50 = vrot.slane %v23_v47, %v7161_v42 }
  0xa0   :  { %176 = vadd.xlane.f32.xlu0 %v175_v62  ;;  %v161_v4 = vcombine.low %v145_v63, %v146_v0  ;;  %v162_v5 = vcombine.high %v145_v63, %v146_v0  ;;  %6174 = vmatprep.subr.bf16.mxu0 %v6749_v14  ;;  %v283_v51 = vrot.slane %v23_v47, %v7164_v45 }
  0xa1   :  { %v165_v6 = vcombine.low %v149_v1, %v150_v2  ;;  %v166_v7 = vcombine.high %v149_v1, %v150_v2  ;;  %v300_v53 = vrot.slane %v5985_v49, %v7161_v42  ;;  %v304_v56 = vrot.slane %v5985_v49, %v7164_v45 }
  0xa2   :  { %v178_v8 = vadd.f32 %v162_v5, %v161_v4  ;;  %v284_v61 = vcombine.low %v279_v50, %v283_v51  ;;  %v285_v62 = vcombine.high %v279_v50, %v283_v51  ;;  %v377_v50 = vld [vmem:[%s8431_s1 + $0x20] ss:$0 sm:$0xff] }
  0xa3   :  { %v184_v9 = vadd.f32 %v166_v7, %v165_v6  ;;  %6175 = vmatpush3.bf16.msra.mxu0 %v6750_v15  ;;  %v305_v2 = vcombine.low %v300_v53, %v304_v56 }
  0xa4   :  { %182 = vadd.xlane.f32.xlu0 %v181_v3  ;;  %179 = vadd.xlane.f32.xlu1 %v178_v8  ;;  %v306_v3 = vcombine.high %v300_v53, %v304_v56 }
  0xa5   :  { %6176 = vmatprep.subr.bf16.mxu0 %v6751_v16 }
  0xa7   :  { %6177 = vmatpush3.bf16.msra.mxu0 %v6752_v17 }
  0xa8   :  { %185 = vadd.xlane.f32.xlu1 %v184_v9  ;;  %6178 = vmatprep.subr.bf16.mxu0 %v6753_v18 }
  0xab   :  { %6179 = vmatpush3.bf16.msra.mxu0 %v6754_v19 }
  0xac   :  { %6180 = vmatprep.subr.bf16.mxu0 %v6755_v20 }
  0xaf   :  { %6181 = vmatpush3.bf16.msra.mxu0 %v6756_v21 }
  0xb0   :  { %6182 = vmatprep.subr.bf16.mxu0 %v6757_v23 }
  0xb3   :  { %6183 = vmatpush3.bf16.msra.mxu0 %v6758_v24 }
  0xb4   :  { %6184 = vmatprep.subr.bf16.mxu0 %v6759_v25 }
  0xb7   :  { %6185 = vmatpush3.bf16.msra.mxu0 %v6760_v27 }
 0x12d   :  { %v177_v30 = vpop.xlane.xlu0 %176 }
 0x12e   :  { %v187_v31 = vmul.f32 0.00390625, %v177_v30 }
 0x130   :  { %v191_v32 = vadd.f32 1e-05, %v187_v31 }
 0x131   :  { %v180_v33 = vpop.xlane.xlu1 %179  ;;  %v183_v34 = vpop.xlane.xlu0 %182 }
 0x132   :  { %6876 = vrsqrt.f32 %v191_v32  ;;  %v188_v35 = vmul.f32 0.00390625, %v180_v33  ;;  %v189_v36 = vmul.f32 0.00390625, %v183_v34 }
 0x134   :  { %v192_v37 = vadd.f32 1e-05, %v188_v35  ;;  %v193_v38 = vadd.f32 1e-05, %v189_v36 }
 0x135   :  { %v186_v41 = vpop.xlane.xlu1 %185 }
 0x136   :  { %6878 = vrsqrt.f32 %v192_v37  ;;  %v190_v46 = vmul.f32 0.00390625, %v186_v41 }
 0x137   :  { %6880 = vrsqrt.f32 %v193_v38 }
 0x138   :  { %v194_v48 = vadd.f32 1e-05, %v190_v46 }
 0x13a   :  { %6882 = vrsqrt.f32 %v194_v48 }
 0x13c   :  { %v6877_v52 = vpop.eup %6876 }
 0x13d   :  { %v209_v57 = vrot.slane %v6877_v52, %v7067_v28  ;;  %v216_v60 = vrot.slane %v6877_v52, %v7070_v29 }
 0x13f   :  { %v267_v63 = vmul.f32 %v209_v57, %v7076_v39  ;;  %v268_v0 = vmul.f32 %v216_v60, %v7078_v40 }
 0x140   :  { %v6879_v1 = vpop.eup %6878 }
 0x141   :  { %v6881_v4 = vpop.eup %6880  ;;  %v223_v5 = vrot.slane %v6879_v1, %v7067_v28  ;;  %v230_v6 = vrot.slane %v6879_v1, %v7070_v29  ;;  %v288_v7 = vmul.f32 %v284_v61, %v267_v63  ;;  %v289_v8 = vmul.f32 %v285_v62, %v268_v0 }
 0x142   :  { %v237_v9 = vrot.slane %v6881_v4, %v7067_v28  ;;  %v244_v10 = vrot.slane %v6881_v4, %v7070_v29 }
 0x143   :  { %v269_v11 = vmul.f32 %v223_v5, %v7096_v54  ;;  %v270_v39 = vmul.f32 %v230_v6, %v7098_v55  ;;  %v309_v40 = vadd.f32 %v305_v2, %v288_v7  ;;  %v310_v13 = vadd.f32 %v306_v3, %v289_v8 }
 0x144   :  { %v6883_v12 = vpop.eup %6882  ;;  %v271_v14 = vmul.f32 %v237_v9, %v7080_v43  ;;  %v272_v15 = vmul.f32 %v244_v10, %v7082_v44 }
 0x145   :  { %v251_v16 = vrot.slane %v6883_v12, %v7067_v28  ;;  %v258_v17 = vrot.slane %v6883_v12, %v7070_v29  ;;  %v290_v18 = vmul.f32 %v284_v61, %v269_v11  ;;  %v291_v19 = vmul.f32 %v285_v62, %v270_v39 }
 0x146   :  { %v292_v20 = vmul.f32 %v284_v61, %v271_v14  ;;  %v293_v21 = vmul.f32 %v285_v62, %v272_v15  ;;  %v326_v25 = vcombine.high %v309_v40, %v310_v13  ;;  %v325_v27 = vcombine.low %v309_v40, %v310_v13 }
 0x147   :  { %v311_v23 = vadd.f32 %v305_v2, %v290_v18  ;;  %v312_v24 = vadd.f32 %v306_v3, %v291_v19  ;;  %v273_v54 = vmul.f32 %v251_v16, %v7100_v58  ;;  %v274_v55 = vmul.f32 %v258_v17, %v7102_v59 }
 0x148   :  { %v313_v30 = vadd.f32 %v305_v2, %v292_v20  ;;  %v314_v43 = vadd.f32 %v306_v3, %v293_v21 }
 0x149   :  { %v328_v31 = vcombine.high %v311_v23, %v312_v24  ;;  %v327_v44 = vcombine.low %v311_v23, %v312_v24  ;;  %v294_v32 = vmul.f32 %v284_v61, %v273_v54  ;;  %v295_v33 = vmul.f32 %v285_v62, %v274_v55 }
 0x14a   :  { %v330_v38 = vcombine.high %v313_v30, %v314_v43  ;;  %v329_v59 = vcombine.low %v313_v30, %v314_v43 }
 0x14b   :  { %v342_v34 = vpack.c.bf16 %v328_v31, %v326_v25  ;;  %v341_v35 = vpack.c.bf16 %v327_v44, %v325_v27  ;;  %v315_v36 = vadd.f32 %v305_v2, %v294_v32  ;;  %v316_v37 = vadd.f32 %v306_v3, %v295_v33 }
 0x14d   :  { %506 = vmatprep.mubr.bf16.mxu0 %v342_v34  ;;  %v332_v41 = vcombine.high %v315_v36, %v316_v37  ;;  %v331_v58 = vcombine.low %v315_v36, %v316_v37 }
 0x14e   :  { %507 = vmatmul.mubr.bf16.vlgmr.msra.gmra.mrb[0].mxu0 %v341_v35 }
 0x14f   :  { %v344_v46 = vpack.c.bf16 %v332_v41, %v330_v38  ;;  %v343_v47 = vpack.c.bf16 %v331_v58, %v329_v59 }
 0x151   :  { %514 = vmatprep.mubr.bf16.mxu0 %v344_v46  ;;  %v523_v46 = vld [vmem:[%s8431_s1 + $0x30] ss:$0 sm:$0xff] }
 0x156   :  { %515 = vmatmul.mubr.bf16.gmra.mrb[4].mxu0 %v343_v47  ;;  %v524_v47 = vld [vmem:[%s8431_s1 + $0x40] ss:$0 sm:$0xff] }
 0x221   :  { %v6186_v48 = vpop.f32.mrb[0].mxu0 }
 0x222   :  { %v6187_v49 = vpop.f32.mrb[1].mxu0 }
 0x223   :  { %v6188_v51 = vadd.f32 %v6187_v49, %v6186_v48  ;;  %v6189_v52 = vpop.f32.mrb[2].mxu0 }
 0x224   :  { %v6190_v53 = vpop.f32.mrb[3].mxu0 }
 0x225   :  { %v6191_v56 = vadd.f32 %v6190_v53, %v6189_v52  ;;  %v509_v57 = vadd.f32 %v6188_v51, %v377_v50  ;;  %v599_v52 = vld [vmem:[%s8431_s1 + $0x50] sm:$0xf] }
 0x227   :  { %v526_v60 = vsel %vm525_vm0, %v509_v57, 0.0  ;;  %v512_v61 = vadd.f32 %v6191_v56, %v377_v50 }
 0x228   :  { %527 = vadd.xlane.f32.xlu0 %v526_v60 }
 0x229   :  { %v6192_v62 = vpop.f32.mrb[4].mxu0  ;;  %v529_v63 = vsel %vm525_vm0, %v512_v61, 0.0 }
 0x22a   :  { %530 = vadd.xlane.f32.xlu1 %v529_v63  ;;  %v6193_v0 = vpop.f32.mrb[5].mxu0 }
 0x22b   :  { %v6194_v1 = vadd.f32 %v6193_v0, %v6192_v62  ;;  %v6195_v2 = vpop.f32.mrb[6].mxu0 }
 0x22c   :  { %v6196_v3 = vpop.f32.mrb[7].mxu0 }
 0x22d   :  { %v6197_v4 = vadd.f32 %v6196_v3, %v6195_v2  ;;  %v517_v5 = vadd.f32 %v6194_v1, %v377_v50 }
 0x22f   :  { %v532_v6 = vsel %vm525_vm0, %v517_v5, 0.0  ;;  %v520_v7 = vadd.f32 %v6197_v4, %v377_v50 }
 0x230   :  { %533 = vadd.xlane.f32.xlu0 %v532_v6 }
 0x231   :  { %v535_v8 = vsel %vm525_vm0, %v520_v7, 0.0 }
 0x232   :  { %536 = vadd.xlane.f32.xlu1 %v535_v8 }
 0x2b5   :  { %v528_v9 = vpop.xlane.xlu0 %527 }
 0x2b6   :  { %v539_v10 = vmul.f32 0.015625, %v528_v9 }
 0x2b7   :  { %v531_v11 = vpop.xlane.xlu1 %530 }
 0x2b8   :  { %v543_v39 = vsub.f32 %v509_v57, %v539_v10  ;;  %v540_v12 = vmul.f32 0.015625, %v531_v11 }
 0x2ba   :  { %v544_v40 = vsub.f32 %v512_v61, %v540_v12  ;;  %v547_v13 = vmul.f32 %v543_v39, %v543_v39 }
 0x2bc   :  { %v551_v14 = vsel %vm525_vm0, %v547_v13, 0.0  ;;  %v548_v15 = vmul.f32 %v544_v40, %v544_v40 }
 0x2bd   :  { %552 = vadd.xlane.f32.xlu0 %v551_v14  ;;  %v534_v16 = vpop.xlane.xlu0 %533 }
 0x2be   :  { %v541_v17 = vmul.f32 0.015625, %v534_v16  ;;  %v554_v18 = vsel %vm525_vm0, %v548_v15, 0.0 }
 0x2bf   :  { %555 = vadd.xlane.f32.xlu1 %v554_v18  ;;  %v537_v19 = vpop.xlane.xlu1 %536 }
 0x2c0   :  { %v545_v20 = vsub.f32 %v517_v5, %v541_v17  ;;  %v542_v21 = vmul.f32 0.015625, %v537_v19 }
 0x2c2   :  { %v546_v23 = vsub.f32 %v520_v7, %v542_v21  ;;  %v549_v24 = vmul.f32 %v545_v20, %v545_v20 }
 0x2c4   :  { %v557_v54 = vsel %vm525_vm0, %v549_v24, 0.0  ;;  %v550_v55 = vmul.f32 %v546_v23, %v546_v23 }
 0x2c5   :  { %558 = vadd.xlane.f32.xlu0 %v557_v54 }
 0x2c6   :  { %v560_v25 = vsel %vm525_vm0, %v550_v55, 0.0 }
 0x2c7   :  { %561 = vadd.xlane.f32.xlu1 %v560_v25 }
 0x34a   :  { %v553_v27 = vpop.xlane.xlu0 %552 }
 0x34b   :  { %v563_v30 = vmul.f32 0.015625, %v553_v27 }
 0x34c   :  { %v556_v43 = vpop.xlane.xlu1 %555 }
 0x34d   :  { %v567_v31 = vadd.f32 1e-05, %v563_v30  ;;  %v564_v44 = vmul.f32 0.015625, %v556_v43 }
 0x34f   :  { %6884 = vrsqrt.f32 %v567_v31  ;;  %v568_v32 = vadd.f32 1e-05, %v564_v44 }
 0x351   :  { %6886 = vrsqrt.f32 %v568_v32 }
 0x352   :  { %v559_v33 = vpop.xlane.xlu0 %558 }
 0x353   :  { %v565_v34 = vmul.f32 0.015625, %v559_v33 }
 0x354   :  { %v562_v35 = vpop.xlane.xlu1 %561 }
 0x355   :  { %v569_v36 = vadd.f32 1e-05, %v565_v34  ;;  %v566_v37 = vmul.f32 0.015625, %v562_v35 }
 0x357   :  { %6888 = vrsqrt.f32 %v569_v36  ;;  %v570_v38 = vadd.f32 1e-05, %v566_v37 }
 0x359   :  { %v6885_v41 = vpop.eup %6884  ;;  %6890 = vrsqrt.f32 %v570_v38 }
 0x35a   :  { %v575_v58 = vmul.f32 %v6885_v41, %v543_v39 }
 0x35b   :  { %v6887_v59 = vpop.eup %6886 }
 0x35c   :  { %v579_v48 = vmul.f32 %v575_v58, %v523_v46  ;;  %v576_v49 = vmul.f32 %v6887_v59, %v544_v40 }
 0x35e   :  { %v583_v50 = vadd.f32 %v579_v48, %v524_v47  ;;  %v580_v51 = vmul.f32 %v576_v49, %v523_v46 }
 0x360   :  { %v591_v53 = vcombine.high %v583_v50, %v583_v50  ;;  %v584_v56 = vadd.f32 %v580_v51, %v524_v47  ;;  %v600_v60 = vadd.f32 %v599_v52, %v583_v50 }
 0x361   :  { %v6889_v57 = vpop.eup %6888 }
 0x362   :  { %v601_v61 = vadd.f32 %v599_v52, %v591_v53  ;;  %v592_v62 = vcombine.high %v584_v56, %v584_v56  ;;  %v577_v63 = vmul.f32 %v6889_v57, %v545_v20  ;;  %v602_v1 = vadd.f32 %v599_v52, %v584_v56 }
 0x363   :  { %v6891_v0 = vpop.eup %6890 }
 0x364   :  { %v7212_v2 = vcombine.low %v600_v60, %v601_v61  ;;  %v603_v3 = vadd.f32 %v599_v52, %v592_v62  ;;  %v581_v4 = vmul.f32 %v577_v63, %v523_v46  ;;  %v578_v5 = vmul.f32 %v6891_v0, %v546_v23 }
 0x366   :  { %v667_v6 = vsel %vm525_vm0, %v7212_v2, 0.0  ;;  %v7216_v7 = vcombine.low %v602_v1, %v603_v3  ;;  %v585_v8 = vadd.f32 %v581_v4, %v524_v47  ;;  %v582_v9 = vmul.f32 %v578_v5, %v523_v46  ;;  %v6761_v5 = vld [vmem:[%s8430_s2 + $0x100] ss:$8 sps:$4 sm:$0xff]  }
 0x367   :  { %668 = vadd.xlane.f32.xlu0 %v667_v6  ;;  %6346 = vmatprep.subr.bf16.mxu0 %v6761_v5  ;;  %v6762_v6 = vld [vmem:[%s8430_s2 + $0x110] ss:$8 sps:$4 sm:$0xff]  }
 0x368   :  { %v670_v10 = vsel %vm525_vm0, %v7216_v7, 0.0  ;;  %v593_v11 = vcombine.high %v585_v8, %v585_v8  ;;  %v586_v39 = vadd.f32 %v582_v9, %v524_v47  ;;  %v604_v12 = vadd.f32 %v599_v52, %v585_v8  ;;  %6347 = vmatpush3.bf16.msra.mxu0 %v6761_v5  ;;  %v6763_v8 = vld [vmem:[%s8430_s2 + $0x120] ss:$8 sps:$4 sm:$0xff]   ;;  %v6764_v9 = vld [vmem:[%s8430_s2 + $0x130] ss:$8 sps:$4 sm:$0xff]  }
 0x369   :  { %671 = vadd.xlane.f32.xlu1 %v670_v10  ;;  %6348 = vmatprep.subr.bf16.mxu0 %v6762_v6 }
 0x36a   :  { %v605_v40 = vadd.f32 %v599_v52, %v593_v11  ;;  %v594_v13 = vcombine.high %v586_v39, %v586_v39  ;;  %v606_v15 = vadd.f32 %v599_v52, %v586_v39 }
 0x36c   :  { %v7220_v14 = vcombine.low %v604_v12, %v605_v40  ;;  %v607_v16 = vadd.f32 %v599_v52, %v594_v13  ;;  %6349 = vmatpush3.bf16.msra.mxu0 %v6762_v6 }
 0x36d   :  { %6350 = vmatprep.subr.bf16.mxu0 %v6763_v8 }
 0x36e   :  { %v673_v17 = vsel %vm525_vm0, %v7220_v14, 0.0  ;;  %v7224_v18 = vcombine.low %v606_v15, %v607_v16 }
 0x36f   :  { %674 = vadd.xlane.f32.xlu0 %v673_v17 }
 0x370   :  { %v676_v19 = vsel %vm525_vm0, %v7224_v18, 0.0  ;;  %6351 = vmatpush3.bf16.msra.mxu0 %v6763_v8 }
 0x371   :  { %677 = vadd.xlane.f32.xlu1 %v676_v19  ;;  %6352 = vmatprep.subr.bf16.mxu0 %v6764_v9 }
 0x374   :  { %6353 = vmatpush3.bf16.msra.mxu0 %v6764_v9 }
 0x3f4   :  { %v669_v20 = vpop.xlane.xlu0 %668 }
 0x3f5   :  { %v679_v21 = vmul.f32 0.015625, %v669_v20 }
 0x3f6   :  { %v672_v23 = vpop.xlane.xlu1 %671 }
 0x3f7   :  { %v693_v24 = vrot.slane %v679_v21, %v7067_v28  ;;  %v700_v54 = vrot.slane %v679_v21, %v7070_v29  ;;  %v680_v55 = vmul.f32 0.015625, %v672_v23  ;;  %v608_v21 = vld [vmem:[%s8431_s1 + $0x60] ss:$0 sm:$0xff] }
 0x3f9   :  { %v7230_v25 = vsub.f32 %v600_v60, %v693_v24  ;;  %v7232_v27 = vsub.f32 %v601_v61, %v700_v54  ;;  %v707_v30 = vrot.slane %v680_v55, %v7067_v28  ;;  %v714_v43 = vrot.slane %v680_v55, %v7070_v29 }
 0x3fb   :  { %v7236_v31 = vsub.f32 %v602_v1, %v707_v30  ;;  %v7238_v44 = vsub.f32 %v603_v3, %v714_v43  ;;  %v759_v32 = vmul.f32 %v7230_v25, %v7230_v25  ;;  %v760_v33 = vmul.f32 %v7232_v27, %v7232_v27  ;;  %v609_v43 = vld [vmem:[%s8431_s1 + $0x70] ss:$0 sm:$0xff] }
 0x3fc   :  { %v675_v34 = vpop.xlane.xlu0 %674  ;;  %v884_v30 = vcombine.high %v608_v21, %v608_v21 }
 0x3fd   :  { %v681_v35 = vmul.f32 0.015625, %v675_v34  ;;  %v775_v36 = vcombine.low %v759_v32, %v760_v33  ;;  %v761_v37 = vmul.f32 %v7236_v31, %v7236_v31  ;;  %v762_v38 = vmul.f32 %v7238_v44, %v7238_v44 }
 0x3fe   :  { %v678_v41 = vpop.xlane.xlu1 %677 }
 0x3ff   :  { %v721_v46 = vrot.slane %v681_v35, %v7067_v28  ;;  %v728_v58 = vrot.slane %v681_v35, %v7070_v29  ;;  %v682_v59 = vmul.f32 0.015625, %v678_v41  ;;  %v783_v47 = vsel %vm525_vm0, %v775_v36, 0.0 }
 0x400   :  { %784 = vadd.xlane.f32.xlu0 %v783_v47  ;;  %v776_v48 = vcombine.low %v761_v37, %v762_v38  ;;  %v895_v37 = vcombine.high %v609_v43, %v609_v43 }
 0x401   :  { %v7251_v49 = vsub.f32 %v604_v12, %v721_v46  ;;  %v7253_v50 = vsub.f32 %v605_v40, %v728_v58  ;;  %v735_v51 = vrot.slane %v682_v59, %v7067_v28  ;;  %v742_v52 = vrot.slane %v682_v59, %v7070_v29 }
 0x402   :  { %v786_v53 = vsel %vm525_vm0, %v776_v48, 0.0 }
 0x403   :  { %v7258_v56 = vsub.f32 %v606_v15, %v735_v51  ;;  %v7260_v57 = vsub.f32 %v607_v16, %v742_v52  ;;  %787 = vadd.xlane.f32.xlu1 %v786_v53  ;;  %v763_v60 = vmul.f32 %v7251_v49, %v7251_v49  ;;  %v764_v61 = vmul.f32 %v7253_v50, %v7253_v50 }
 0x405   :  { %v777_v62 = vcombine.low %v763_v60, %v764_v61  ;;  %v765_v63 = vmul.f32 %v7258_v56, %v7258_v56  ;;  %v766_v0 = vmul.f32 %v7260_v57, %v7260_v57 }
 0x407   :  { %v789_v1 = vsel %vm525_vm0, %v777_v62, 0.0  ;;  %v778_v3 = vcombine.low %v765_v63, %v766_v0 }
 0x408   :  { %790 = vadd.xlane.f32.xlu0 %v789_v1 }
 0x409   :  { %v792_v4 = vsel %vm525_vm0, %v778_v3, 0.0 }
 0x40a   :  { %793 = vadd.xlane.f32.xlu1 %v792_v4 }
 0x48d   :  { %v785_v10 = vpop.xlane.xlu0 %784 }
 0x48e   :  { %v795_v11 = vmul.f32 0.015625, %v785_v10 }
 0x490   :  { %v799_v39 = vadd.f32 1e-05, %v795_v11  ;;  %v788_v12 = vpop.xlane.xlu1 %787 }
 0x491   :  { %v796_v40 = vmul.f32 0.015625, %v788_v12 }
 0x492   :  { %6892 = vrsqrt.f32 %v799_v39 }
 0x493   :  { %v800_v13 = vadd.f32 1e-05, %v796_v40  ;;  %v7010_v40 = vmov 1983009808  }
 0x495   :  { %6894 = vrsqrt.f32 %v800_v13  ;;  %v791_v15 = vpop.xlane.xlu0 %790  ;;  %v1008_v13 = vunpack.c.l.s4 %v7010_v40 }
 0x496   :  { %v797_v16 = vmul.f32 0.015625, %v791_v15  ;;  %v7011_v15 = vmov 0.0  }
 0x497   :  { %v794_v17 = vpop.xlane.xlu1 %793  ;;  %6358 = vmatprep.subr.bf16.mxu1 %v7011_v15  ;;  %6376 = vmatprep.subr.bf16.mxu0 %v7011_v15 }
 0x498   :  { %v801_v19 = vadd.f32 1e-05, %v797_v16  ;;  %v798_v20 = vmul.f32 0.015625, %v794_v17  ;;  %6360 = vmatprep.mubr.msk.bf16.mxu1 %vm7012_vm1, %v7011_v15 }
 0x49a   :  { %6896 = vrsqrt.f32 %v801_v19  ;;  %v802_v23 = vadd.f32 1e-05, %v798_v20 }
 0x49c   :  { %v6893_v24 = vpop.eup %6892  ;;  %6898 = vrsqrt.f32 %v802_v23 }
 0x49d   :  { %v817_v54 = vrot.slane %v6893_v24, %v7067_v28  ;;  %v824_v55 = vrot.slane %v6893_v24, %v7070_v29 }
 0x49f   :  { %v6895_v32 = vpop.eup %6894  ;;  %v875_v33 = vmul.f32 %v817_v54, %v7230_v25  ;;  %v876_v34 = vmul.f32 %v824_v55, %v7232_v27 }
 0x4a0   :  { %v831_v35 = vrot.slane %v6895_v32, %v7067_v28  ;;  %v838_v36 = vrot.slane %v6895_v32, %v7070_v29 }
 0x4a1   :  { %v886_v38 = vmul.f32 %v875_v33, %v608_v21  ;;  %v887_v41 = vmul.f32 %v884_v30, %v876_v34 }
 0x4a2   :  { %v877_v46 = vmul.f32 %v831_v35, %v7236_v31  ;;  %v878_v58 = vmul.f32 %v838_v36, %v7238_v44 }
 0x4a3   :  { %v897_v51 = vadd.f32 %v886_v38, %v609_v43  ;;  %v898_v52 = vadd.f32 %v895_v37, %v887_v41 }
 0x4a4   :  { %v6897_v59 = vpop.eup %6896  ;;  %v888_v47 = vmul.f32 %v877_v46, %v608_v21  ;;  %v889_v48 = vmul.f32 %v884_v30, %v878_v58 }
 0x4a5   :  { %v845_v25 = vrot.slane %v6897_v59, %v7067_v28  ;;  %v852_v27 = vrot.slane %v6897_v59, %v7070_v29  ;;  %v913_v0 = vcombine.low %v897_v51, %v898_v52 }
 0x4a6   :  { %v6899_v53 = vpop.eup %6898  ;;  %v899_v60 = vadd.f32 %v888_v47, %v609_v43  ;;  %v900_v61 = vadd.f32 %v895_v37, %v889_v48 }
 0x4a7   :  { %v879_v62 = vmul.f32 %v845_v25, %v7251_v49  ;;  %v880_v63 = vmul.f32 %v852_v27, %v7253_v50  ;;  %v859_v31 = vrot.slane %v6899_v53, %v7067_v28  ;;  %v866_v44 = vrot.slane %v6899_v53, %v7070_v29 }
 0x4a8   :  { %v914_v1 = vcombine.low %v899_v60, %v900_v61 }
 0x4a9   :  { %v890_v3 = vmul.f32 %v879_v62, %v608_v21  ;;  %v891_v4 = vmul.f32 %v884_v30, %v880_v63  ;;  %v881_v5 = vmul.f32 %v859_v31, %v7258_v56  ;;  %v882_v6 = vmul.f32 %v866_v44, %v7260_v57 }
 0x4aa   :  { %v921_v8 = vpack.c.bf16 %v914_v1, %v913_v0  ;;  %v1009_v56 = vunpack.c.0.s8 %v1008_v13 }
 0x4ab   :  { %v892_v9 = vmul.f32 %v881_v5, %v608_v21  ;;  %v893_v10 = vmul.f32 %v884_v30, %v882_v6  ;;  %v901_v11 = vadd.f32 %v890_v3, %v609_v43  ;;  %v902_v39 = vadd.f32 %v895_v37, %v891_v4 }
 0x4ac   :  { %6354 = vmatprep.mubr.msk.bf16.mxu0 %vm525_vm0, %v921_v8  ;;  %v1012_v19 = vsub.s32 %v1009_v56, %v7064_v26 }
 0x4ad   :  { %v903_v49 = vadd.f32 %v892_v9, %v609_v43  ;;  %v904_v50 = vadd.f32 %v895_v37, %v893_v10  ;;  %v915_v28 = vcombine.low %v901_v11, %v902_v39 }
 0x4af   :  { %v916_v12 = vcombine.low %v903_v49, %v904_v50 }
 0x4b1   :  { %v922_v29 = vpack.c.bf16 %v916_v12, %v915_v28 }
 0x4b3   :  { %6355 = vmatmul.mubr.msk.bf16.vlgmr.msra.gmra.mrb[8].mxu0 %vm525_vm0, %v922_v29 }
 0x4b4   :  { %6378 = vmatprep.mubr.msk.bf16.mxu0 %vm7012_vm1, %v7011_v15 }
 0x586   :  { %v6356_v57 = vpop.f32.mrb[8].mxu0 }
 0x587   :  { %v987_v16 = vpop.f32.mrb[9].mxu0 }
 0x588   :  { %v6357_v17 = vpop.f32.mrb[10].mxu0 }
 0x589   :  { %v1003_v20 = vpack.c.bf16 %v6357_v17, %v6356_v57  ;;  %v990_v21 = vpop.f32.mrb[11].mxu0  ;;  %v6009_v55 = vpack.c.bf16 %v6357_v17, %v6357_v17 }
 0x58a   :  { %v1002_v23 = vpack.c.bf16 %v990_v21, %v987_v16  ;;  %v6008_v24 = vpack.c.bf16 %v990_v21, %v990_v21 }
 0x58b   :  { %v7315_v30 = vrot.slane %v1003_v20, %v1012_v19  ;;  %v7323_v35 = vrot.slane %v6009_v55, %v1012_v19 }
 0x58c   :  { %v1013_v54 = vrot.slane %v1002_v23, %v1012_v19  ;;  %v1020_v33 = vrot.slane %v6008_v24, %v1012_v19 }
 0x58d   :  { %v7328_v36 = vrot.slane %v7315_v30, %v1012_v19  ;;  %v7337_v41 = vrot.slane %v7323_v35, %v1012_v19  ;;  %v1038_v58 = vcombine.high %v7315_v30, %v7315_v30  ;;  %v1039_v47 = vcombine.high %v7323_v35, %v7323_v35 }
 0x58e   :  { %v7317_v43 = vrot.slane %v1013_v54, %v1012_v19  ;;  %v1021_v32 = vcombine.high %v1013_v54, %v1013_v54  ;;  %v7332_v37 = vrot.slane %v1020_v33, %v1012_v19  ;;  %v1022_v38 = vcombine.high %v1020_v33, %v1020_v33 }
 0x58f   :  { %v7347_v59 = vrot.slane %v1038_v58, %v1012_v19  ;;  %v7353_v48 = vrot.slane %v1039_v47, %v1012_v19 }
 0x590   :  { %1047 = vrot.lane.b32.xlu0 %v7317_v43, %s7013_s0  ;;  %v7321_v34 = vrot.slane %v1021_v32, %v1012_v19  ;;  %v7341_v46 = vrot.slane %v1022_v38, %v1012_v19 }
 0x592   :  { %1103 = vrot.lane.b32.xlu1 %v7321_v34, %s7013_s0 }
 0x594   :  { %1268 = vrot.lane.b32.xlu0 %v7328_v36, %s7013_s0 }
 0x596   :  { %1158 = vrot.lane.b32.xlu1 %v7332_v37, %s7013_s0 }
 0x598   :  { %1378 = vrot.lane.b32.xlu0 %v7337_v41, %s7013_s0 }
 0x59a   :  { %1213 = vrot.lane.b32.xlu1 %v7341_v46, %s7013_s0 }
 0x59e   :  { %1323 = vrot.lane.b32.xlu1 %v7347_v59, %s7013_s0 }
 0x5a2   :  { %1433 = vrot.lane.b32.xlu1 %v7353_v48, %s7013_s0 }
 0x602   :  { %v1048_v51 = vpop.permute.xlu0 %1047 }
 0x603   :  { %v1054_v52 = vsel %vm1049_vm2, %v1048_v51, 0 }
 0x604   :  { %6359 = vmatpush3.bf16.xpose.msra.mxu1 %v1054_v52  ;;  %v1104_v25 = vpop.permute.xlu1 %1103 }
 0x605   :  { %6364 = vmatprep.subr.bf16.mxu1 %v7011_v15  ;;  %v1109_v53 = vsel %vm1049_vm2, %v1104_v25, 0 }
 0x606   :  { %v1269_v44 = vpop.permute.xlu0 %1268 }
 0x607   :  { %v1274_v1 = vsel %vm1049_vm2, %v1269_v44, 0 }
 0x608   :  { %v1159_v27 = vpop.permute.xlu1 %1158 }
 0x609   :  { %v1164_v63 = vsel %vm1049_vm2, %v1159_v27, 0 }
 0x60a   :  { %v1379_v4 = vpop.permute.xlu0 %1378 }
 0x60b   :  { %6361 = vmatmul.mubr.msk.bf16.vlgmr.msra.gmra.mrb[0].mxu1 %vm1049_vm2, %v1013_v54  ;;  %v1384_v5 = vsel %vm1049_vm2, %v1379_v4, 0 }
 0x60c   :  { %6365 = vmatpush3.bf16.xpose.msra.mxu1 %v1109_v53  ;;  %v1214_v60 = vpop.permute.xlu1 %1213  ;;  %6366 = vmatprep.mubr.msk.bf16.mxu1 %vm7012_vm1, %v7011_v15 }
 0x60d   :  { %v1219_v61 = vsel %vm1049_vm2, %v1214_v60, 0  ;;  %6370 = vmatprep.subr.bf16.mxu1 %v7011_v15 }
 0x60e   :  { %6377 = vmatpush3.bf16.xpose.msra.mxu0 %v1219_v61 }
 0x60f   :  { %6388 = vmatprep.subr.bf16.mxu0 %v7011_v15 }
 0x610   :  { %v1324_v62 = vpop.permute.xlu1 %1323 }
 0x611   :  { %v1329_v31 = vsel %vm1049_vm2, %v1324_v62, 0 }
 0x613   :  { %6367 = vmatmul.mubr.msk.bf16.vlgmr.msra.gmra.mrb[4].mxu1 %vm1049_vm2, %v1021_v32 }
 0x614   :  { %6371 = vmatpush3.bf16.xpose.msra.mxu1 %v1164_v63  ;;  %6372 = vmatprep.mubr.msk.bf16.mxu1 %vm7012_vm1, %v7011_v15  ;;  %v1434_v0 = vpop.permute.xlu1 %1433 }
 0x615   :  { %6379 = vmatmul.mubr.msk.bf16.vlgmr.msra.gmra.mrb[12].mxu0 %vm1049_vm2, %v1022_v38  ;;  %6382 = vmatprep.subr.bf16.mxu1 %v7011_v15  ;;  %v1439_v3 = vsel %vm1049_vm2, %v1434_v0, 0 }
 0x616   :  { %6389 = vmatpush3.bf16.xpose.msra.mxu0 %v1329_v31  ;;  %6390 = vmatprep.mubr.msk.bf16.mxu0 %vm7012_vm1, %v7011_v15 }
 0x617   :  { %6400 = vmatprep.subr.bf16.mxu0 %v7011_v15 }
 0x61b   :  { %6373 = vmatmul.mubr.msk.bf16.vlgmr.msra.gmra.mrb[8].mxu1 %vm1049_vm2, %v1020_v33 }
 0x61c   :  { %6383 = vmatpush3.bf16.xpose.msra.mxu1 %v1274_v1  ;;  %6384 = vmatprep.mubr.msk.bf16.mxu1 %vm7012_vm1, %v7011_v15 }
 0x61d   :  { %6391 = vmatmul.mubr.msk.bf16.vlgmr.msra.gmra.mrb[16].mxu0 %vm1049_vm2, %v1038_v58  ;;  %6394 = vmatprep.subr.bf16.mxu1 %v7011_v15 }
 0x61e   :  { %6401 = vmatpush3.bf16.xpose.msra.mxu0 %v1439_v3  ;;  %6402 = vmatprep.mubr.msk.bf16.mxu0 %vm7012_vm1, %v7011_v15 }
 0x61f   :  { %6412 = vmatprep.subr.bf16.mxu0 %v7011_v15 }
 0x623   :  { %6385 = vmatmul.mubr.msk.bf16.vlgmr.msra.gmra.mrb[12].mxu1 %vm1049_vm2, %v7315_v30 }
 0x624   :  { %6395 = vmatpush3.bf16.xpose.msra.mxu1 %v1384_v5  ;;  %6396 = vmatprep.mubr.msk.bf16.mxu1 %vm7012_vm1, %v7011_v15 }
 0x625   :  { %6403 = vmatmul.mubr.msk.bf16.vlgmr.msra.gmra.mrb[20].mxu0 %vm1049_vm2, %v1039_v47  ;;  %6406 = vmatprep.subr.bf16.mxu1 %v7011_v15 }
 0x626   :  { %6414 = vmatprep.mubr.msk.bf16.mxu0 %vm7012_vm1, %v7011_v15 }
 0x62b   :  { %6397 = vmatmul.mubr.msk.bf16.vlgmr.msra.gmra.mrb[16].mxu1 %vm1049_vm2, %v7323_v35 }
 0x62c   :  { %6408 = vmatprep.mubr.msk.bf16.mxu1 %vm7012_vm1, %v7011_v15 }
 0x6de   :  { %v1090_v6 = vpop.f32.mrb[0].mxu1 }
 0x6df   :  { %v1481_v8 = vmul.f32 0.17677669, %v1090_v6  ;;  %v6362_v9 = vpop.f32.mrb[1].mxu1 }
 0x6e0   :  { %v1093_v10 = vpop.f32.mrb[2].mxu1 }
 0x6e1   :  { %v6363_v11 = vpop.f32.mrb[3].mxu1  ;;  %v1490_v39 = vsel %vm1489_vm3, %v1481_v8, -inf }
 0x6e2   :  { %1491 = vmax.xlane.f32.xlu0 %v1490_v39 }
 0x6e6   :  { %v1145_v49 = vpop.f32.mrb[4].mxu1 }
 0x6e7   :  { %v1482_v50 = vmul.f32 0.17677669, %v1145_v49  ;;  %v6368_v28 = vpop.f32.mrb[5].mxu1 }
 0x6e8   :  { %v1148_v12 = vpop.f32.mrb[6].mxu1  ;;  %v1255_v29 = vpop.f32.mrb[12].mxu0 }
 0x6e9   :  { %v1484_v40 = vmul.f32 0.17677669, %v1255_v29  ;;  %v6369_v13 = vpop.f32.mrb[7].mxu1  ;;  %v6380_v56 = vpop.f32.mrb[13].mxu0  ;;  %v1493_v57 = vsel %vm1489_vm3, %v1482_v50, -inf }
 0x6ea   :  { %1494 = vmax.xlane.f32.xlu1 %v1493_v57  ;;  %v1258_v16 = vpop.f32.mrb[14].mxu0 }
 0x6eb   :  { %v6381_v17 = vpop.f32.mrb[15].mxu0  ;;  %v1499_v19 = vsel %vm1489_vm3, %v1484_v40, -inf }
 0x6ec   :  { %1500 = vmax.xlane.f32.xlu0 %v1499_v19 }
 0x6ee   :  { %v1200_v20 = vpop.f32.mrb[8].mxu1 }
 0x6ef   :  { %v1483_v21 = vmul.f32 0.17677669, %v1200_v20  ;;  %v6374_v23 = vpop.f32.mrb[9].mxu1 }
 0x6f0   :  { %v1203_v24 = vpop.f32.mrb[10].mxu1  ;;  %v1365_v54 = vpop.f32.mrb[16].mxu0 }
 0x6f1   :  { %v1486_v55 = vmul.f32 0.17677669, %v1365_v54  ;;  %v6375_v30 = vpop.f32.mrb[11].mxu1  ;;  %v6392_v32 = vpop.f32.mrb[17].mxu0  ;;  %v1496_v33 = vsel %vm1489_vm3, %v1483_v21, -inf }
 0x6f2   :  { %1497 = vmax.xlane.f32.xlu0 %v1496_v33  ;;  %v1368_v35 = vpop.f32.mrb[18].mxu0 }
 0x6f3   :  { %v6393_v38 = vpop.f32.mrb[19].mxu0  ;;  %v1505_v58 = vsel %vm1489_vm3, %v1486_v55, -inf }
 0x6f4   :  { %1506 = vmax.xlane.f32.xlu1 %v1505_v58 }
 0x6f6   :  { %v1310_v47 = vpop.f32.mrb[12].mxu1 }
 0x6f7   :  { %v7404_v51 = vmul.f32 0.17677669, %v1310_v47  ;;  %v6386_v52 = vpop.f32.mrb[13].mxu1 }
 0x6f8   :  { %v1313_v25 = vpop.f32.mrb[14].mxu1  ;;  %v1475_v27 = vpop.f32.mrb[20].mxu0 }
 0x6f9   :  { %v7406_v53 = vmul.f32 0.17677669, %v1475_v27  ;;  %v6387_v60 = vpop.f32.mrb[15].mxu1  ;;  %v6404_v61 = vpop.f32.mrb[21].mxu0  ;;  %v1502_v62 = vsel %vm1489_vm3, %v7404_v51, -inf }
 0x6fa   :  { %1503 = vmax.xlane.f32.xlu0 %v1502_v62  ;;  %v1478_v63 = vpop.f32.mrb[22].mxu0 }
 0x6fb   :  { %v6405_v31 = vpop.f32.mrb[23].mxu0  ;;  %v1511_v44 = vsel %vm1489_vm3, %v7406_v53, -inf }
 0x6fc   :  { %1512 = vmax.xlane.f32.xlu1 %v1511_v44 }
 0x6fe   :  { %v1420_v0 = vpop.f32.mrb[16].mxu1 }
 0x6ff   :  { %v7412_v1 = vmul.f32 0.17677669, %v1420_v0  ;;  %v6398_v3 = vpop.f32.mrb[17].mxu1 }
 0x700   :  { %v1423_v4 = vpop.f32.mrb[18].mxu1 }
 0x701   :  { %v6399_v5 = vpop.f32.mrb[19].mxu1  ;;  %v1508_v6 = vsel %vm1489_vm3, %v7412_v1, -inf }
 0x702   :  { %1509 = vmax.xlane.f32.xlu0 %v1508_v6 }
 0x70d   :  { %1636 = vrot.lane.b32.xlu1 %v7321_v34, %s7014_s28 }
 0x711   :  { %1684 = vrot.lane.b32.xlu1 %v7332_v37, %s7014_s28 }
 0x715   :  { %1732 = vrot.lane.b32.xlu1 %v7341_v46, %s7014_s28 }
 0x718   :  { %1586 = vrot.lane.b32.xlu0 %v7317_v43, %s7014_s28 }
 0x76f   :  { %v1492_v9 = vpop.xlane.xlu0 %1491 }
 0x770   :  { %v1514_v10 = vsub.f32 %v1481_v8, %v1492_v9 }
 0x772   :  { %v1522_v11 = vmul.f32 1.442695, %v1514_v10 }
 0x774   :  { %6900 = vpow2.f32 %v1522_v11 }
 0x777   :  { %v1495_v39 = vpop.xlane.xlu1 %1494 }
 0x778   :  { %v1515_v49 = vsub.f32 %v1482_v50, %v1495_v39 }
 0x779   :  { %v1501_v28 = vpop.xlane.xlu0 %1500 }
 0x77a   :  { %v1517_v12 = vsub.f32 %v1484_v40, %v1501_v28  ;;  %v1524_v29 = vmul.f32 1.442695, %v1515_v49 }
 0x77c   :  { %v1528_v13 = vmul.f32 1.442695, %v1517_v12 }
 0x77e   :  { %v7424_v34 = vpop.eup %6900  ;;  %6902 = vpow2.f32 %v1528_v13 }
 0x77f   :  { %v1498_v37 = vpop.xlane.xlu0 %1497  ;;  %v1538_v46 = vsel %vm1489_vm3, %v7424_v34, 0.0  ;;  %6904 = vpow2.f32 %v1524_v29 }
 0x780   :  { %v1516_v56 = vsub.f32 %v1483_v21, %v1498_v37  ;;  %1539 = vadd.xlane.f32.xlu0 %v1538_v46 }
 0x781   :  { %v1507_v43 = vpop.xlane.xlu1 %1506 }
 0x782   :  { %v1526_v8 = vmul.f32 1.442695, %v1516_v56  ;;  %v1519_v57 = vsub.f32 %v1486_v55, %v1507_v43 }
 0x784   :  { %6906 = vpow2.f32 %v1526_v8  ;;  %v1532_v16 = vmul.f32 1.442695, %v1519_v57 }
 0x786   :  { %6908 = vpow2.f32 %v1532_v16 }
 0x787   :  { %v1504_v20 = vpop.xlane.xlu0 %1503 }
 0x788   :  { %v7428_v50 = vpop.eup %6902  ;;  %v1518_v58 = vsub.f32 %v7404_v51, %v1504_v20 }
 0x789   :  { %v1513_v40 = vpop.xlane.xlu1 %1512  ;;  %v1547_v17 = vsel %vm1489_vm3, %v7428_v50, 0.0  ;;  %v7432_v19 = vpop.eup %6904 }
 0x78a   :  { %1548 = vadd.xlane.f32.xlu1 %v1547_v17  ;;  %v1541_v21 = vsel %vm1489_vm3, %v7432_v19, 0.0  ;;  %v1521_v47 = vsub.f32 %v7406_v53, %v1513_v40  ;;  %v1530_v52 = vmul.f32 1.442695, %v1518_v58 }
 0x78c   :  { %v1536_v27 = vmul.f32 1.442695, %v1521_v47  ;;  %6910 = vpow2.f32 %v1530_v52  ;;  %v6765_v47 = vld [vmem:[%s8430_s2 + $0x140] ss:$8 sps:$4 sm:$0xff]   ;;  %v6766_v52 = vld [vmem:[%s8430_s2 + $0x150] ss:$8 sps:$4 sm:$0xff]  }
 0x78d   :  { %v1637_v23 = vpop.permute.xlu1 %1636 }
 0x78e   :  { %v6907_v24 = vpop.eup %6906  ;;  %v1642_v54 = vsel %vm1592_vm4, %v1637_v23, 0  ;;  %1542 = vadd.xlane.f32.xlu1 %v1541_v21  ;;  %6912 = vpow2.f32 %v1536_v27 }
 0x78f   :  { %v1510_v55 = vpop.xlane.xlu0 %1509  ;;  %6413 = vmatpush3.bf16.msra.mxu0 %v1642_v54  ;;  %v1544_v30 = vsel %vm1489_vm3, %v6907_v24, 0.0 }
 0x790   :  { %v7438_v32 = vpop.eup %6908  ;;  %1545 = vadd.xlane.f32.xlu0 %v1544_v30  ;;  %6424 = vmatprep.subr.bf16.mxu0 %v7011_v15  ;;  %v1520_v25 = vsub.f32 %v7412_v1, %v1510_v55 }
 0x791   :  { %v1553_v33 = vsel %vm1489_vm3, %v7438_v32, 0.0  ;;  %v1685_v63 = vpop.permute.xlu1 %1684 }
 0x792   :  { %1554 = vadd.xlane.f32.xlu1 %v1553_v33  ;;  %v1534_v60 = vmul.f32 1.442695, %v1520_v25  ;;  %v1690_v6 = vsel %vm1592_vm4, %v1685_v63, 0 }
 0x793   :  { %v1587_v35 = vpop.permute.xlu0 %1586 }
 0x794   :  { %v1594_v38 = vsel %vm1592_vm4, %v1587_v35, 0  ;;  %6914 = vpow2.f32 %v1534_v60 }
 0x795   :  { %6407 = vmatpush3.bf16.msra.mxu1 %v1594_v38  ;;  %v1733_v44 = vpop.permute.xlu1 %1732 }
 0x796   :  { %6418 = vmatprep.subr.bf16.mxu1 %v7011_v15  ;;  %v7452_v61 = vpop.eup %6910  ;;  %v1738_v29 = vsel %vm1592_vm4, %v1733_v44, 0 }
 0x798   :  { %v7454_v62 = vpop.eup %6912 }
 0x799   :  { %v1559_v51 = vsel %vm1489_vm3, %v7454_v62, 0.0 }
 0x7a3   :  { %1828 = vrot.lane.b32.xlu1 %v7347_v59, %s7014_s28  ;;  %v1550_v59 = vsel %vm1489_vm3, %v7452_v61, 0.0 }
 0x7a6   :  { %1780 = vrot.lane.b32.xlu0 %v7328_v36, %s7014_s28  ;;  %v7458_v36 = vpop.eup %6914 }
 0x7a7   :  { %v1556_v53 = vsel %vm1489_vm3, %v7458_v36, 0.0  ;;  %vm2544_vm3 = vmor %vm2542_vm14, %vm2543_vm15 }
 0x7c5   :  { %1551 = vadd.xlane.f32.xlu0 %v1550_v59 }
 0x7c7   :  { %1560 = vadd.xlane.f32.xlu1 %v1559_v51 }
 0x7c9   :  { %1557 = vadd.xlane.f32.xlu0 %v1556_v53 }
 0x7d8   :  { %1924 = vrot.lane.b32.xlu1 %v7353_v48, %s7014_s28 }
 0x7df   :  { %1876 = vrot.lane.b32.xlu0 %v7337_v41, %s7014_s28 }
 0x80d   :  { %v1540_v31 = vpop.xlane.xlu0 %1539 }
 0x80e   :  { %6916 = vrcp.f32 %v1540_v31 }
 0x817   :  { %v1549_v0 = vpop.xlane.xlu1 %1548 }
 0x818   :  { %v6917_v1 = vpop.eup %6916 }
 0x819   :  { %v1570_v3 = vmul.f32 %v6917_v1, %v7424_v34 }
 0x81b   :  { %v1543_v4 = vpop.xlane.xlu1 %1542  ;;  %v1578_v5 = vpack.c.bf16 %v1570_v3, %v1570_v3 }
 0x81c   :  { %6918 = vrcp.f32 %v1543_v4 }
 0x81d   :  { %6409 = vmatmul.mubr.msk.bf16.vlgmr.msra.gmra.mrb[20].mxu1 %vm1588_vm5, %v1578_v5  ;;  %v1546_v48 = vpop.xlane.xlu0 %1545 }
 0x81e   :  { %6920 = vrcp.f32 %v1546_v48  ;;  %6419 = vmatpush3.bf16.msra.mxu1 %v1690_v6  ;;  %6420 = vmatprep.mubr.msk.bf16.mxu1 %vm7012_vm1, %v7011_v15 }
 0x81f   :  { %6430 = vmatprep.subr.bf16.mxu1 %v7011_v15  ;;  %6922 = vrcp.f32 %v1549_v0  ;;  %v1555_v41 = vpop.xlane.xlu1 %1554 }
 0x820   :  { %6924 = vrcp.f32 %v1555_v41 }
 0x821   :  { %v1781_v12 = vpop.permute.xlu0 %1780 }
 0x822   :  { %v1786_v37 = vsel %vm1592_vm4, %v1781_v12, 0 }
 0x823   :  { %v1829_v46 = vpop.permute.xlu1 %1828 }
 0x824   :  { %v1834_v8 = vsel %vm1592_vm4, %v1829_v46, 0 }
 0x826   :  { %v6919_v9 = vpop.eup %6918 }
 0x827   :  { %v1571_v10 = vmul.f32 %v6919_v9, %v7432_v19 }
 0x828   :  { %v6921_v11 = vpop.eup %6920 }
 0x829   :  { %v1572_v39 = vmul.f32 %v6921_v11, %v6907_v24  ;;  %v1579_v49 = vpack.c.bf16 %v1571_v10, %v1571_v10  ;;  %v6923_v28 = vpop.eup %6922 }
 0x82a   :  { %v1573_v34 = vmul.f32 %v6923_v28, %v7428_v50  ;;  %v6925_v43 = vpop.eup %6924 }
 0x82b   :  { %6415 = vmatmul.mubr.msk.bf16.vlgmr.msra.gmra.mrb[24].mxu0 %vm1588_vm5, %v1579_v49  ;;  %v1580_v13 = vpack.c.bf16 %v1572_v39, %v1572_v39  ;;  %v1575_v57 = vmul.f32 %v6925_v43, %v7438_v32 }
 0x82c   :  { %6425 = vmatpush3.bf16.msra.mxu0 %v1738_v29  ;;  %6426 = vmatprep.mubr.msk.bf16.mxu0 %vm7012_vm1, %v7011_v15  ;;  %v1581_v56 = vpack.c.bf16 %v1573_v34, %v1573_v34 }
 0x82d   :  { %6421 = vmatmul.mubr.msk.bf16.vlgmr.msra.gmra.mrb[24].mxu1 %vm1588_vm5, %v1580_v13  ;;  %6436 = vmatprep.subr.bf16.mxu0 %v7011_v15  ;;  %v1583_v16 = vpack.c.bf16 %v1575_v57, %v1575_v57 }
 0x82e   :  { %6431 = vmatpush3.bf16.msra.mxu1 %v1786_v37  ;;  %6432 = vmatprep.mubr.msk.bf16.mxu1 %vm7012_vm1, %v7011_v15 }
 0x82f   :  { %6442 = vmatprep.subr.bf16.mxu1 %v7011_v15 }
 0x833   :  { %6427 = vmatmul.mubr.msk.bf16.vlgmr.msra.gmra.mrb[28].mxu0 %vm1588_vm5, %v1581_v56 }
 0x834   :  { %6437 = vmatpush3.bf16.msra.mxu0 %v1834_v8  ;;  %6438 = vmatprep.mubr.msk.bf16.mxu0 %vm7012_vm1, %v7011_v15 }
 0x835   :  { %6448 = vmatprep.subr.bf16.mxu0 %v7011_v15 }
 0x83b   :  { %6439 = vmatmul.mubr.msk.bf16.vlgmr.msra.gmra.mrb[32].mxu0 %vm1588_vm5, %v1583_v16 }
 0x83c   :  { %6450 = vmatprep.mubr.msk.bf16.mxu0 %vm7012_vm1, %v7011_v15 }
 0x852   :  { %v1552_v50 = vpop.xlane.xlu0 %1551 }
 0x853   :  { %6926 = vrcp.f32 %v1552_v50 }
 0x854   :  { %v1561_v40 = vpop.xlane.xlu1 %1560 }
 0x855   :  { %6928 = vrcp.f32 %v1561_v40  ;;  %v622_v40 = vld [vmem:[%s8431_s1 + $0x80] ss:$0 sm:$0xff] }
 0x856   :  { %v1558_v17 = vpop.xlane.xlu0 %1557 }
 0x857   :  { %6930 = vrcp.f32 %v1558_v17 }
 0x858   :  { %v1925_v19 = vpop.permute.xlu1 %1924 }
 0x859   :  { %v1930_v20 = vsel %vm1592_vm4, %v1925_v19, 0 }
 0x85a   :  { %6449 = vmatpush3.bf16.msra.mxu0 %v1930_v20  ;;  %v1877_v54 = vpop.permute.xlu0 %1876 }
 0x85b   :  { %v1882_v33 = vsel %vm1592_vm4, %v1877_v54, 0 }
 0x85d   :  { %v6927_v23 = vpop.eup %6926 }
 0x85e   :  { %v1574_v21 = vmul.f32 %v6927_v23, %v7452_v61 }
 0x85f   :  { %v6929_v24 = vpop.eup %6928 }
 0x860   :  { %v1577_v55 = vmul.f32 %v6929_v24, %v7454_v62  ;;  %v1582_v30 = vpack.c.bf16 %v1574_v21, %v1574_v21 }
 0x861   :  { %v6931_v32 = vpop.eup %6930 }
 0x862   :  { %6433 = vmatmul.mubr.msk.bf16.vlgmr.msra.gmra.mrb[28].mxu1 %vm1588_vm5, %v1582_v30  ;;  %v1585_v35 = vpack.c.bf16 %v1577_v55, %v1577_v55  ;;  %v1576_v38 = vmul.f32 %v6931_v32, %v7458_v36 }
 0x863   :  { %6443 = vmatpush3.bf16.msra.mxu1 %v1882_v33  ;;  %6444 = vmatprep.mubr.msk.bf16.mxu1 %vm7012_vm1, %v7011_v15 }
 0x864   :  { %6451 = vmatmul.mubr.msk.bf16.vlgmr.msra.gmra.mrb[36].mxu0 %vm1588_vm5, %v1585_v35  ;;  %v1584_v58 = vpack.c.bf16 %v1576_v38, %v1576_v38  ;;  %6454 = vmatprep.subr.bf16.mxu1 %v6765_v47 }
 0x86a   :  { %6445 = vmatmul.mubr.msk.bf16.vlgmr.msra.gmra.mrb[32].mxu1 %vm1588_vm5, %v1584_v58  ;;  %vm2558_vm5 = vcmask 1040384  }
 0x86b   :  { %6455 = vmatpush3.bf16.msra.mxu1 %v6765_v47 }
 0x86c   :  { %6456 = vmatprep.subr.bf16.mxu1 %v6766_v52 }
 0x86f   :  { %6457 = vmatpush3.bf16.msra.mxu1 %v6766_v52 }
 0x8f0   :  { %v1630_v25 = vpop.f32.mrb[20].mxu1 }
 0x8f1   :  { %v6410_v27 = vpop.f32.mrb[21].mxu1 }
 0x8f2   :  { %v1633_v60 = vpop.f32.mrb[22].mxu1 }
 0x8f3   :  { %v6411_v61 = vpop.f32.mrb[23].mxu1 }
 0x8fe   :  { %v1678_v62 = vpop.f32.mrb[24].mxu0 }
 0x8ff   :  { %v1980_v59 = vcombine.low %v1630_v25, %v1678_v62  ;;  %v6416_v36 = vpop.f32.mrb[25].mxu0 }
 0x900   :  { %v1681_v51 = vpop.f32.mrb[26].mxu0  ;;  %v1726_v53 = vpop.f32.mrb[24].mxu1 }
 0x901   :  { %v6417_v63 = vpop.f32.mrb[27].mxu0  ;;  %v6422_v31 = vpop.f32.mrb[25].mxu1 }
 0x902   :  { %v1729_v44 = vpop.f32.mrb[26].mxu1 }
 0x903   :  { %v6423_v0 = vpop.f32.mrb[27].mxu1 }
 0x906   :  { %v1774_v1 = vpop.f32.mrb[28].mxu0 }
 0x907   :  { %v1981_v3 = vcombine.low %v1726_v53, %v1774_v1  ;;  %v6428_v4 = vpop.f32.mrb[29].mxu0 }
 0x908   :  { %v1777_v5 = vpop.f32.mrb[30].mxu0 }
 0x909   :  { %v1988_v6 = vpack.c.bf16 %v1981_v3, %v1980_v59  ;;  %v6429_v48 = vpop.f32.mrb[31].mxu0  ;;  %v6767_v5 = vld [vmem:[%s8430_s2 + $0x160] ss:$8 sps:$4 sm:$0xff]  }
 0x90a   :  { %6462 = vmatprep.subr.bf16.mxu0 %v6767_v5  ;;  %v6769_v48 = vld [vmem:[%s8430_s2 + $0x180] ss:$8 sps:$4 sm:$0xff]  }
 0x90b   :  { %6458 = vmatprep.mubr.msk.bf16.mxu1 %vm1049_vm2, %v1988_v6  ;;  %6463 = vmatpush3.bf16.msra.mxu0 %v6767_v5  ;;  %v6768_v6 = vld [vmem:[%s8430_s2 + $0x170] ss:$8 sps:$4 sm:$0xff]  }
 0x90c   :  { %6464 = vmatprep.subr.bf16.mxu0 %v6768_v6 }
 0x90e   :  { %v1870_v41 = vpop.f32.mrb[32].mxu0 }
 0x90f   :  { %v6440_v9 = vpop.f32.mrb[33].mxu0  ;;  %6465 = vmatpush3.bf16.msra.mxu0 %v6768_v6 }
 0x910   :  { %v1873_v10 = vpop.f32.mrb[34].mxu0  ;;  %6466 = vmatprep.subr.bf16.mxu0 %v6769_v48 }
 0x911   :  { %v6441_v11 = vpop.f32.mrb[35].mxu0 }
 0x913   :  { %6467 = vmatpush3.bf16.msra.mxu0 %v6769_v48 }
 0x935   :  { %v1822_v39 = vpop.f32.mrb[28].mxu1 }
 0x936   :  { %v1982_v49 = vcombine.low %v1822_v39, %v1870_v41  ;;  %v6434_v28 = vpop.f32.mrb[29].mxu1  ;;  %v6770_v41 = vld [vmem:[%s8430_s2 + $0x190] ss:$8 sps:$4 sm:$0xff]  }
 0x937   :  { %v1825_v12 = vpop.f32.mrb[30].mxu1  ;;  %v1966_v29 = vpop.f32.mrb[36].mxu0  ;;  %6468 = vmatprep.subr.bf16.mxu0 %v6770_v41 }
 0x938   :  { %v6435_v13 = vpop.f32.mrb[31].mxu1  ;;  %v6452_v34 = vpop.f32.mrb[37].mxu0  ;;  %6469 = vmatpush3.bf16.msra.mxu0 %v6770_v41 }
 0x939   :  { %v1969_v37 = vpop.f32.mrb[38].mxu0  ;;  %6494 = vmatprep.subr.bf16.mxu0 %v7011_v15 }
 0x93a   :  { %v6453_v46 = vpop.f32.mrb[39].mxu0 }
 0x93d   :  { %v1918_v56 = vpop.f32.mrb[32].mxu1 }
 0x93e   :  { %v1983_v43 = vcombine.low %v1918_v56, %v1966_v29  ;;  %v6446_v8 = vpop.f32.mrb[33].mxu1 }
 0x93f   :  { %v1921_v57 = vpop.f32.mrb[34].mxu1 }
 0x940   :  { %v1989_v16 = vpack.c.bf16 %v1983_v43, %v1982_v49  ;;  %v6447_v50 = vpop.f32.mrb[35].mxu1  ;;  %v623_v43 = vld [vmem:[%s8431_s1 + $0x90] ss:$0 sm:$0xff] }
 0x942   :  { %6459 = vmatmul.mubr.msk.bf16.vlgmr.msra.gmra.mrb[36].mxu1 %vm1049_vm2, %v1989_v16 }
 0xa15   :  { %v6460_v17 = vpop.f32.mrb[36].mxu1 }
 0xa16   :  { %v2042_v19 = vpop.f32.mrb[37].mxu1  ;;  %v2051_v20 = vadd.f32 %v6460_v17, %v622_v40  ;;  %v624_v17 = vld [vmem:[%s8431_s1 + $0xa0] ss:$0 sm:$0xff] }
 0xa17   :  { %v2043_v23 = vadd.f32 %v2042_v19, %v622_v40  ;;  %v6461_v21 = vpop.f32.mrb[38].mxu1 }
 0xa18   :  { %v2045_v24 = vpop.f32.mrb[39].mxu1  ;;  %v7520_v30 = vadd.f32 %v2051_v20, %v7220_v14  ;;  %v2054_v32 = vadd.f32 %v6461_v21, %v622_v40 }
 0xa19   :  { %v7517_v54 = vadd.f32 %v2043_v23, %v7212_v2  ;;  %v2046_v55 = vadd.f32 %v2045_v24, %v622_v40 }
 0xa1a   :  { %v7530_v58 = vadd.f32 %v2054_v32, %v7224_v18  ;;  %v2067_v2 = vsel %vm525_vm0, %v7520_v30, 0.0 }
 0xa1b   :  { %v7523_v33 = vadd.f32 %v2046_v55, %v7216_v7  ;;  %v2061_v35 = vsel %vm525_vm0, %v7517_v54, 0.0 }
 0xa1c   :  { %2062 = vadd.xlane.f32.xlu0 %v2061_v35  ;;  %v2070_v14 = vsel %vm525_vm0, %v7530_v58, 0.0 }
 0xa1d   :  { %v2064_v38 = vsel %vm525_vm0, %v7523_v33, 0.0 }
 0xa1e   :  { %2065 = vadd.xlane.f32.xlu1 %v2064_v38 }
 0xa20   :  { %2068 = vadd.xlane.f32.xlu0 %v2067_v2 }
 0xa24   :  { %2071 = vadd.xlane.f32.xlu0 %v2070_v14 }
 0xaa9   :  { %v2063_v7 = vpop.xlane.xlu0 %2062 }
 0xaaa   :  { %v2073_v47 = vmul.f32 0.015625, %v2063_v7 }
 0xaab   :  { %v2066_v52 = vpop.xlane.xlu1 %2065 }
 0xaac   :  { %v2077_v25 = vsub.f32 %v7517_v54, %v2073_v47  ;;  %v2074_v27 = vmul.f32 0.015625, %v2066_v52  ;;  %v6771_v47 = vld [vmem:[%s8430_s2 + $0x1a0] ss:$8 sps:$4 sm:$0xff]   ;;  %v6772_v52 = vld [vmem:[%s8430_s2 + $0x1b0] ss:$8 sps:$4 sm:$0xff]  }
 0xaad   :  { %v2069_v60 = vpop.xlane.xlu0 %2068  ;;  %6474 = vmatprep.subr.bf16.mxu1 %v6771_v47 }
 0xaae   :  { %v2078_v61 = vsub.f32 %v7523_v33, %v2074_v27  ;;  %v2075_v62 = vmul.f32 0.015625, %v2069_v60  ;;  %v2081_v18 = vmul.f32 %v2077_v25, %v2077_v25  ;;  %6475 = vmatpush3.bf16.msra.mxu1 %v6771_v47  ;;  %v6774_v27 = vld [vmem:[%s8430_s2 + $0x1d0] ss:$8 sps:$4 sm:$0xff]   ;;  %v6775_v60 = vld [vmem:[%s8430_s2 + $0x1e0] ss:$8 sps:$4 sm:$0xff]  }
 0xaaf   :  { %6476 = vmatprep.subr.bf16.mxu1 %v6772_v52  ;;  %v6779_v47 = vld [vmem:[%s8430_s2 + $0x220] ss:$8 sps:$4 sm:$0xff]  }
 0xab0   :  { %v2079_v59 = vsub.f32 %v7520_v30, %v2075_v62  ;;  %v2085_v36 = vsel %vm525_vm0, %v2081_v18, 0.0  ;;  %v2082_v51 = vmul.f32 %v2078_v61, %v2078_v61  ;;  %v6777_v62 = vld [vmem:[%s8430_s2 + $0x200] ss:$8 sps:$4 sm:$0xff]   ;;  %v6778_v18 = vld [vmem:[%s8430_s2 + $0x210] ss:$8 sps:$4 sm:$0xff]  }
 0xab1   :  { %2086 = vadd.xlane.f32.xlu0 %v2085_v36  ;;  %v2072_v53 = vpop.xlane.xlu0 %2071 }
 0xab2   :  { %v2076_v63 = vmul.f32 0.015625, %v2072_v53  ;;  %v2088_v31 = vsel %vm525_vm0, %v2082_v51, 0.0  ;;  %v2083_v44 = vmul.f32 %v2079_v59, %v2079_v59  ;;  %6477 = vmatpush3.bf16.msra.mxu1 %v6772_v52  ;;  %v6780_v52 = vld [vmem:[%s8430_s2 + $0x230] ss:$8 sps:$4 sm:$0xff]  }
 0xab3   :  { %2089 = vadd.xlane.f32.xlu1 %v2088_v31 }
 0xab4   :  { %v2080_v0 = vsub.f32 %v7530_v58, %v2076_v63  ;;  %v2091_v1 = vsel %vm525_vm0, %v2083_v44, 0.0 }
 0xab5   :  { %2092 = vadd.xlane.f32.xlu0 %v2091_v1 }
 0xab6   :  { %v2084_v3 = vmul.f32 %v2080_v0, %v2080_v0 }
 0xab8   :  { %v2094_v4 = vsel %vm525_vm0, %v2084_v3, 0.0 }
 0xab9   :  { %2095 = vadd.xlane.f32.xlu1 %v2094_v4 }
 0xb3e   :  { %v2087_v9 = vpop.xlane.xlu0 %2086 }
 0xb3f   :  { %v2097_v10 = vmul.f32 0.015625, %v2087_v9 }
 0xb40   :  { %v2090_v11 = vpop.xlane.xlu1 %2089 }
 0xb41   :  { %v2101_v39 = vadd.f32 1e-05, %v2097_v10  ;;  %v2098_v49 = vmul.f32 0.015625, %v2090_v11 }
 0xb42   :  { %v2093_v28 = vpop.xlane.xlu0 %2092 }
 0xb43   :  { %6932 = vrsqrt.f32 %v2101_v39  ;;  %v2102_v12 = vadd.f32 1e-05, %v2098_v49  ;;  %v2099_v29 = vmul.f32 0.015625, %v2093_v28 }
 0xb45   :  { %6934 = vrsqrt.f32 %v2102_v12  ;;  %v2103_v13 = vadd.f32 1e-05, %v2099_v29 }
 0xb46   :  { %v2096_v34 = vpop.xlane.xlu1 %2095 }
 0xb47   :  { %6936 = vrsqrt.f32 %v2103_v13  ;;  %v2100_v37 = vmul.f32 0.015625, %v2096_v34 }
 0xb49   :  { %v2104_v46 = vadd.f32 1e-05, %v2100_v37 }
 0xb4b   :  { %6938 = vrsqrt.f32 %v2104_v46 }
 0xb4d   :  { %v6933_v56 = vpop.eup %6932 }
 0xb4e   :  { %v2109_v8 = vmul.f32 %v6933_v56, %v2077_v25  ;;  %v6773_v25 = vld [vmem:[%s8430_s2 + $0x1c0] ss:$8 sps:$4 sm:$0xff]  }
 0xb4f   :  { %v6935_v57 = vpop.eup %6934  ;;  %6478 = vmatprep.subr.bf16.mxu1 %v6773_v25 }
 0xb50   :  { %v2110_v16 = vmul.f32 %v6935_v57, %v2078_v61  ;;  %v2113_v50 = vmul.f32 %v2109_v8, %v623_v43  ;;  %6479 = vmatpush3.bf16.msra.mxu1 %v6773_v25  ;;  %v6776_v61 = vld [vmem:[%s8430_s2 + $0x1f0] ss:$8 sps:$4 sm:$0xff]   ;;  %v6781_v25 = vld [vmem:[%s8430_s2 + $0x240] ss:$8 sps:$4 sm:$0xff]  }
 0xb51   :  { %v6937_v40 = vpop.eup %6936  ;;  %6480 = vmatprep.subr.bf16.mxu1 %v6774_v27 }
 0xb52   :  { %v2111_v19 = vmul.f32 %v6937_v40, %v2079_v59  ;;  %v2114_v20 = vmul.f32 %v2110_v16, %v623_v43  ;;  %v2117_v23 = vadd.f32 %v2113_v50, %v624_v17  ;;  %v633_v59 = vld [vmem:[%s8431_s1 + $0xb0] ss:$0 sm:$0xff] }
 0xb54   :  { %v2118_v21 = vadd.f32 %v2114_v20, %v624_v17  ;;  %v2115_v55 = vmul.f32 %v2111_v19, %v623_v43  ;;  %6481 = vmatpush3.bf16.msra.mxu1 %v6774_v27  ;;  %v6782_v27 = vld [vmem:[%s8430_s2 + $0x250] ss:$8 sps:$4 sm:$0xff]  }
 0xb55   :  { %v6939_v24 = vpop.eup %6938  ;;  %6482 = vmatprep.subr.bf16.mxu1 %v6775_v60 }
 0xb56   :  { %v2112_v32 = vmul.f32 %v6939_v24, %v2080_v0  ;;  %v2121_v35 = vpack.c.bf16 %v2118_v21, %v2117_v23  ;;  %v2119_v2 = vadd.f32 %v2115_v55, %v624_v17 }
 0xb58   :  { %v2116_v38 = vmul.f32 %v2112_v32, %v623_v43  ;;  %6470 = vmatprep.mubr.msk.bf16.mxu0 %vm525_vm0, %v2121_v35  ;;  %6483 = vmatpush3.bf16.msra.mxu1 %v6775_v60  ;;  %v650_v60 = vld [vmem:[%s8431_s1 + $0xc0] ss:$0 sm:$0xff] }
 0xb59   :  { %6484 = vmatprep.subr.bf16.mxu1 %v6776_v61 }
 0xb5a   :  { %v2120_v14 = vadd.f32 %v2116_v38, %v624_v17 }
 0xb5c   :  { %v2122_v7 = vpack.c.bf16 %v2120_v14, %v2119_v2  ;;  %6485 = vmatpush3.bf16.msra.mxu1 %v6776_v61 }
 0xb5d   :  { %6486 = vmatprep.subr.bf16.mxu1 %v6777_v62 }
 0xb5e   :  { %6471 = vmatmul.mubr.msk.bf16.vlgmr.msra.gmra.mrb[40].mxu0 %vm525_vm0, %v2122_v7 }
 0xb5f   :  { %6502 = vmatprep.mubr.msk.bf16.mxu0 %vm7012_vm1, %v7011_v15  ;;  %6495 = vmatpush3.bf16.msra.mxu0 %v6779_v47 }
 0xb60   :  { %6487 = vmatpush3.bf16.msra.mxu1 %v6777_v62  ;;  %6496 = vmatprep.subr.bf16.mxu0 %v7011_v15 }
 0xb61   :  { %6488 = vmatprep.subr.bf16.mxu1 %v6778_v18 }
 0xb63   :  { %6497 = vmatpush3.bf16.msra.mxu0 %v6780_v52 }
 0xb64   :  { %6489 = vmatpush3.bf16.msra.mxu1 %v6778_v18  ;;  %6498 = vmatprep.subr.bf16.mxu0 %v7011_v15 }
 0xb65   :  { %6506 = vmatprep.subr.bf16.mxu1 %v7011_v15 }
 0xb67   :  { %6499 = vmatpush3.bf16.msra.mxu0 %v6781_v25 }
 0xb68   :  { %6500 = vmatprep.subr.bf16.mxu0 %v7011_v15 }
 0xb6b   :  { %6501 = vmatpush3.bf16.msra.mxu0 %v6782_v27 }
 0xc31   :  { %v6472_v36 = vpop.f32.mrb[40].mxu0 }
 0xc32   :  { %v2196_v51 = vadd.f32 %v6472_v36, %v633_v59  ;;  %v2187_v53 = vpop.f32.mrb[41].mxu0 }
 0xc33   :  { %v2188_v63 = vadd.f32 %v2187_v53, %v633_v59  ;;  %v6473_v31 = vpop.f32.mrb[42].mxu0 }
 0xc34   :  { %v2208_v44 = vmul.f32 0.044715, %v2196_v51  ;;  %v2199_v0 = vadd.f32 %v6473_v31, %v633_v59  ;;  %v2190_v1 = vpop.f32.mrb[43].mxu0  ;;  %v2204_v19 = vmul.f32 0.5, %v2196_v51 }
 0xc35   :  { %v2206_v3 = vmul.f32 0.044715, %v2188_v63  ;;  %v2191_v4 = vadd.f32 %v2190_v1, %v633_v59  ;;  %v2202_v21 = vmul.f32 0.5, %v2188_v63 }
 0xc36   :  { %v2212_v5 = vmul.f32 %v2208_v44, %v2196_v51  ;;  %v2209_v6 = vmul.f32 0.044715, %v2199_v0  ;;  %v2205_v20 = vmul.f32 0.5, %v2199_v0 }
 0xc37   :  { %v2210_v48 = vmul.f32 %v2206_v3, %v2188_v63  ;;  %v2207_v41 = vmul.f32 0.044715, %v2191_v4  ;;  %v2203_v24 = vmul.f32 0.5, %v2191_v4 }
 0xc38   :  { %v2216_v9 = vmul.f32 %v2212_v5, %v2196_v51  ;;  %v2213_v10 = vmul.f32 %v2209_v6, %v2199_v0 }
 0xc39   :  { %v2214_v11 = vmul.f32 %v2210_v48, %v2188_v63  ;;  %v2211_v39 = vmul.f32 %v2207_v41, %v2191_v4 }
 0xc3a   :  { %v2220_v49 = vadd.f32 %v2216_v9, %v2196_v51  ;;  %v2217_v28 = vmul.f32 %v2213_v10, %v2199_v0 }
 0xc3b   :  { %v2215_v12 = vmul.f32 %v2211_v39, %v2191_v4  ;;  %v2218_v29 = vadd.f32 %v2214_v11, %v2188_v63 }
 0xc3c   :  { %v2224_v13 = vmul.f32 0.7978846, %v2220_v49  ;;  %v2221_v34 = vadd.f32 %v2217_v28, %v2199_v0 }
 0xc3d   :  { %v2219_v37 = vadd.f32 %v2215_v12, %v2191_v4  ;;  %v2222_v46 = vmul.f32 0.7978846, %v2218_v29 }
 0xc3e   :  { %6940 = vtanh.f32 %v2224_v13  ;;  %v2225_v56 = vmul.f32 0.7978846, %v2221_v34 }
 0xc3f   :  { %v2223_v43 = vmul.f32 0.7978846, %v2219_v37  ;;  %6942 = vtanh.f32 %v2222_v46 }
 0xc40   :  { %6944 = vtanh.f32 %v2225_v56 }
 0xc41   :  { %6946 = vtanh.f32 %v2223_v43 }
 0xc48   :  { %v6941_v8 = vpop.eup %6940 }
 0xc49   :  { %v6943_v57 = vpop.eup %6942  ;;  %v2232_v16 = vadd.f32 1.0, %v6941_v8 }
 0xc4a   :  { %v6945_v50 = vpop.eup %6944  ;;  %v2230_v40 = vadd.f32 1.0, %v6943_v57 }
 0xc4b   :  { %v6947_v17 = vpop.eup %6946  ;;  %v2233_v23 = vadd.f32 1.0, %v6945_v50  ;;  %v2236_v32 = vmul.f32 %v2232_v16, %v2204_v19 }
 0xc4c   :  { %v2231_v55 = vadd.f32 1.0, %v6947_v17  ;;  %v2234_v38 = vmul.f32 %v2230_v40, %v2202_v21 }
 0xc4d   :  { %v2237_v35 = vmul.f32 %v2233_v23, %v2205_v20 }
 0xc4e   :  { %v2235_v2 = vmul.f32 %v2231_v55, %v2203_v24 }
 0xc4f   :  { %v2239_v14 = vpack.c.bf16 %v2237_v35, %v2236_v32 }
 0xc50   :  { %v2238_v7 = vpack.c.bf16 %v2235_v2, %v2234_v38 }
 0xc52   :  { %6490 = vmatprep.mubr.bf16.mxu1 %v2238_v7 }
 0xc53   :  { %6491 = vmatmul.mubr.bf16.vlgmr.msra.gmra.mrb[40].mxu1 %v2239_v14 }
 0xc54   :  { %6508 = vmatprep.mubr.msk.bf16.mxu1 %vm7012_vm1, %v7011_v15 }
 0xd26   :  { %v6492_v61 = vpop.f32.mrb[40].mxu1 }
 0xd27   :  { %v2331_v62 = vadd.f32 %v6492_v61, %v650_v60  ;;  %v2322_v18 = vpop.f32.mrb[41].mxu1 }
 0xd28   :  { %v2323_v59 = vadd.f32 %v2322_v18, %v650_v60  ;;  %v6493_v36 = vpop.f32.mrb[42].mxu1 }
 0xd29   :  { %v2339_v51 = vadd.f32 %v2331_v62, %v7520_v30  ;;  %v2334_v53 = vadd.f32 %v6493_v36, %v650_v60  ;;  %v2325_v63 = vpop.f32.mrb[43].mxu1 }
 0xd2a   :  { %v2337_v31 = vadd.f32 %v2323_v59, %v7517_v54  ;;  %v2326_v44 = vadd.f32 %v2325_v63, %v650_v60 }
 0xd2b   :  { %v2347_v0 = vcombine.high %v2339_v51, %v2339_v51  ;;  %v2382_v1 = vsel %vm2353_vm6, %v2339_v51, 0.0  ;;  %v2340_v3 = vadd.f32 %v2334_v53, %v7530_v58 }
 0xd2c   :  { %v2383_v4 = vrot.slane %v2382_v1, 4  ;;  %v2345_v5 = vcombine.high %v2337_v31, %v2337_v31  ;;  %v2354_v6 = vsel %vm2353_vm6, %v2337_v31, 0.0  ;;  %v2338_v48 = vadd.f32 %v2326_v44, %v7523_v33 }
 0xd2d   :  { %v2389_v41 = vsel %vm2353_vm6, %v2347_v0, 0.0  ;;  %v2355_v9 = vrot.slane %v2354_v6, 4  ;;  %v2348_v30 = vcombine.high %v2340_v3, %v2340_v3  ;;  %v2396_v10 = vsel %vm2353_vm6, %v2340_v3, 0.0 }
 0xd2e   :  { %v2384_v11 = vadd.f32 %v2383_v4, %v2382_v1  ;;  %v2390_v54 = vrot.slane %v2389_v41, 4  ;;  %v2361_v39 = vsel %vm2353_vm6, %v2345_v5, 0.0  ;;  %v2397_v49 = vrot.slane %v2396_v10, 4 }
 0xd2f   :  { %v2356_v28 = vadd.f32 %v2355_v9, %v2354_v6  ;;  %v2362_v12 = vrot.slane %v2361_v39, 4  ;;  %v2403_v58 = vsel %vm2353_vm6, %v2348_v30, 0.0  ;;  %v2346_v29 = vcombine.high %v2338_v48, %v2338_v48 }
 0xd30   :  { %v2385_v13 = vrot.slane %v2384_v11, 2  ;;  %v2391_v34 = vadd.f32 %v2390_v54, %v2389_v41  ;;  %v2398_v37 = vadd.f32 %v2397_v49, %v2396_v10  ;;  %v2404_v33 = vrot.slane %v2403_v58, 4 }
 0xd31   :  { %v2357_v46 = vrot.slane %v2356_v28, 2  ;;  %v2363_v56 = vadd.f32 %v2362_v12, %v2361_v39  ;;  %v2368_v43 = vsel %vm2353_vm6, %v2338_v48, 0.0  ;;  %v2375_v8 = vsel %vm2353_vm6, %v2346_v29, 0.0 }
 0xd32   :  { %v2386_v57 = vadd.f32 %v2385_v13, %v2384_v11  ;;  %v2392_v16 = vrot.slane %v2391_v34, 2  ;;  %v2399_v50 = vrot.slane %v2398_v37, 2  ;;  %v2405_v40 = vadd.f32 %v2404_v33, %v2403_v58 }
 0xd33   :  { %v2358_v17 = vadd.f32 %v2357_v46, %v2356_v28  ;;  %v2364_v19 = vrot.slane %v2363_v56, 2  ;;  %v2369_v20 = vrot.slane %v2368_v43, 4  ;;  %v2376_v23 = vrot.slane %v2375_v8, 4 }
 0xd34   :  { %v2387_v21 = vrot.slane %v2386_v57, 1  ;;  %v2393_v24 = vadd.f32 %v2392_v16, %v2391_v34  ;;  %v2400_v55 = vadd.f32 %v2399_v50, %v2398_v37  ;;  %v2406_v32 = vrot.slane %v2405_v40, 2 }
 0xd35   :  { %v2359_v35 = vrot.slane %v2358_v17, 1  ;;  %v2365_v38 = vadd.f32 %v2364_v19, %v2363_v56  ;;  %v2370_v2 = vadd.f32 %v2369_v20, %v2368_v43  ;;  %v2377_v14 = vadd.f32 %v2376_v23, %v2375_v8 }
 0xd36   :  { %v2394_v7 = vrot.slane %v2393_v24, 1  ;;  %v2401_v47 = vrot.slane %v2400_v55, 1  ;;  %v2407_v52 = vadd.f32 %v2406_v32, %v2405_v40  ;;  %v2388_v62 = vadd.f32 %v2387_v21, %v2386_v57  ;;  %v2534_v21 = vld [vmem:[%s8431_s1 + $0xf0] sm:$0x1f] }
 0xd37   :  { %v2360_v25 = vadd.f32 %v2359_v35, %v2358_v17  ;;  %v2366_v27 = vrot.slane %v2365_v38, 1  ;;  %v2371_v60 = vrot.slane %v2370_v2, 2  ;;  %v2378_v61 = vrot.slane %v2377_v14, 2 }
 0xd38   :  { %v2408_v18 = vrot.slane %v2407_v52, 1  ;;  %v2395_v63 = vadd.f32 %v2394_v7, %v2393_v24  ;;  %v2402_v44 = vadd.f32 %v2401_v47, %v2400_v55  ;;  %v2415_v5 = vmul.f32 0.25, %v2388_v62  ;;  %v2535_v47 = vld [vmem:[%s8431_s1 + $0xe0] ss:$0 sm:$0xff] }
 0xd39   :  { %v2367_v59 = vadd.f32 %v2366_v27, %v2365_v38  ;;  %v2411_v36 = vmul.f32 0.25, %v2360_v25  ;;  %v2372_v51 = vadd.f32 %v2371_v60, %v2370_v2  ;;  %v2379_v53 = vadd.f32 %v2378_v61, %v2377_v14  ;;  %v2435_v2 = vld [vmem:[%s8431_s1 + $0xd0] ss:$0 sm:$0xff] }
 0xd3a   :  { %v2409_v4 = vadd.f32 %v2408_v18, %v2407_v52  ;;  %v2416_v9 = vmul.f32 0.25, %v2395_v63  ;;  %v2417_v10 = vmul.f32 0.25, %v2402_v44  ;;  %v2423_v28 = vpack.c.bf16 %v2415_v5, %v2415_v5 }
 0xd3b   :  { %v2412_v31 = vmul.f32 0.25, %v2367_v59  ;;  %v2373_v0 = vrot.slane %v2372_v51, 1  ;;  %v2380_v1 = vrot.slane %v2379_v53, 1  ;;  %v2419_v3 = vpack.c.bf16 %v2411_v36, %v2411_v36 }
 0xd3c   :  { %v2418_v49 = vmul.f32 0.25, %v2409_v4  ;;  %v2424_v29 = vpack.c.bf16 %v2416_v9, %v2416_v9  ;;  %v2425_v34 = vpack.c.bf16 %v2417_v10, %v2417_v10  ;;  %v2448_v56 = vunpack.c.l.b16 %v2423_v28 }
 0xd3d   :  { %v2420_v6 = vpack.c.bf16 %v2412_v31, %v2412_v31  ;;  %v2374_v48 = vadd.f32 %v2373_v0, %v2372_v51  ;;  %v2381_v41 = vadd.f32 %v2380_v1, %v2379_v53  ;;  %v2444_v39 = vunpack.c.l.b16 %v2419_v3 }
 0xd3e   :  { %v2426_v46 = vpack.c.bf16 %v2418_v49, %v2418_v49  ;;  %v2449_v8 = vunpack.c.l.b16 %v2424_v29  ;;  %v2450_v16 = vunpack.c.l.b16 %v2425_v34  ;;  %v2541_v24 = vcombine.high %v2534_v21, %v2534_v21 }
 0xd3f   :  { %v2445_v30 = vunpack.c.l.b16 %v2420_v6  ;;  %v2413_v11 = vmul.f32 0.25, %v2374_v48  ;;  %v2414_v54 = vmul.f32 0.25, %v2381_v41  ;;  %v7015_v55 = vmov 1966171168  }
 0xd40   :  { %v2451_v40 = vunpack.c.l.b16 %v2426_v46  ;;  %v2565_v32 = vunpack.c.l.s4 %v7015_v55  ;;  %v6049_v35 = vrot.slane %v2534_v21, 9  ;;  %v2547_v38 = vrot.slane %v2541_v24, 5 }
 0xd41   :  { %v2421_v12 = vpack.c.bf16 %v2413_v11, %v2413_v11  ;;  %v2422_v58 = vpack.c.bf16 %v2414_v54, %v2414_v54  ;;  %v2453_v13 = vsel %vm2452_vm7, %v2445_v30, %v2444_v39  ;;  %v2536_v61 = vadd.f32 %v2535_v47, %v2534_v21 }
 0xd42   :  { %v2566_v14 = vunpack.c.0.s8 %v2565_v32  ;;  %v2548_v52 = vsel %vm2544_vm3, %v6049_v35, %v2547_v38  ;;  %vm2767_vm6 = vcmask 517120   ;;  %v2785_v24 = vsub.s32 2, %v7064_v26 }
 0xd43   :  { %v2446_v37 = vunpack.c.l.b16 %v2421_v12  ;;  %v2447_v33 = vunpack.c.l.b16 %v2422_v58  ;;  %v2789_v32 = vsub.s32 3, %v7064_v26  ;;  %v2793_v35 = vsub.s32 4, %v7064_v26 }
 0xd44   :  { %v7640_v36 = vsub.s32 %v2566_v14, %v7064_v26  ;;  %v2797_v38 = vsub.s32 5, %v7064_v26 }
 0xd45   :  { %v2455_v43 = vsel %vm2454_vm8, %v2446_v37, %v2453_v13  ;;  %vm3531_vm8 = vcmask 39936  }
 0xd46   :  { %v2457_v57 = vsel %vm2456_vm9, %v2447_v33, %v2455_v43 }
 0xd47   :  { %v2459_v50 = vsel %vm2458_vm10, %v2448_v56, %v2457_v57 }
 0xd48   :  { %v2461_v17 = vsel %vm2460_vm11, %v2449_v8, %v2459_v50 }
 0xd49   :  { %v2463_v19 = vsel %vm2462_vm12, %v2450_v16, %v2461_v17 }
 0xd4a   :  { %v2465_v20 = vsel %vm2464_vm13, %v2451_v40, %v2463_v19 }
 0xd4b   :  { %v2466_v23 = vpack.c.b16 %v2465_v20, %v2465_v20 }
 0xd4d   :  { %6503 = vmatmul.mubr.msk.bf16.vlgmr.msra.gmra.mrb[44].mxu0 %vm525_vm0, %v2466_v23 }
 0xe20   :  { %v2528_v7 = vpop.f32.mrb[44].mxu0 }
 0xe21   :  { %v2529_v25 = vadd.f32 %v2528_v7, %v2435_v2  ;;  %v6504_v27 = vpop.f32.mrb[45].mxu0  ;;  %v2801_v2 = vsub.s32 6, %v7064_v26 }
 0xe22   :  { %v2531_v60 = vpop.f32.mrb[46].mxu0 }
 0xe23   :  { %v2538_v62 = vcombine.high %v2529_v25, %v2529_v25  ;;  %v2550_v18 = vadd.f32 %v2548_v52, %v2529_v25  ;;  %v6505_v59 = vpop.f32.mrb[47].mxu0 }
 0xe25   :  { %v2551_v51 = vadd.f32 %v2548_v52, %v2538_v62  ;;  %v2554_v53 = vrot.slane %v2550_v18, 7  ;;  %v2805_v52 = vsub.s32 7, %v7064_v26 }
 0xe27   :  { %v2555_v63 = vrot.slane %v2551_v51, 7  ;;  %v2559_v31 = vsel %vm2558_vm5, %v2536_v61, %v2554_v53 }
 0xe28   :  { %v2563_v44 = vcombine.high %v2559_v31, %v2559_v31  ;;  %v2570_v0 = vrot.slane %v2559_v31, %v7640_v36 }
 0xe29   :  { %v2560_v1 = vsel %vm2558_vm5, %v2536_v61, %v2555_v63 }
 0xe2a   :  { %v2577_v3 = vrot.slane %v2563_v44, %v7640_v36  ;;  %v2578_v4 = vcombine.high %v2570_v0, %v2570_v0  ;;  %v2602_v5 = vcombine.high %v2560_v1, %v2560_v1  ;;  %v2609_v6 = vrot.slane %v2560_v1, %v7640_v36 }
 0xe2b   :  { %v2585_v48 = vrot.slane %v2570_v0, %v7640_v36 }
 0xe2c   :  { %v2599_v41 = vrot.slane %v2578_v4, %v7640_v36  ;;  %v2592_v9 = vrot.slane %v2577_v3, %v7640_v36  ;;  %v2617_v30 = vcombine.high %v2609_v6, %v2609_v6  ;;  %v2624_v10 = vrot.slane %v2609_v6, %v7640_v36 }
 0xe2d   :  { %v2616_v11 = vrot.slane %v2602_v5, %v7640_v36  ;;  %v2600_v25 = vcombine.high %v2585_v48, %v2585_v48 }
 0xe2e   :  { %v2698_v54 = vcombine.low %v2585_v48, %v2599_v41  ;;  %v6050_v39 = vcombine.high %v2585_v48, %v2599_v41  ;;  %v2638_v49 = vrot.slane %v2617_v30, %v7640_v36  ;;  %v2639_v28 = vcombine.high %v2624_v10, %v2624_v10 }
 0xe2f   :  { %v2700_v12 = vcombine.low %v2592_v9, %v2624_v10  ;;  %v2631_v13 = vrot.slane %v2616_v11, %v7640_v36  ;;  %v2601_v27 = vcombine.high %v2599_v41, %v2599_v41 }
 0xe30   :  { %v2708_v58 = vrot.slane %v2698_v54, %v7640_v36  ;;  %v2715_v29 = vrot.slane %v6050_v39, %v7640_v36  ;;  %v2640_v34 = vcombine.high %v2638_v49, %v2638_v49  ;;  %v2701_v37 = vcombine.low %v2638_v49, %v2639_v28 }
 0xe31   :  { %v2722_v46 = vrot.slane %v2700_v12, %v7640_v36 }
 0xe32   :  { %v2747_v33 = vcombine.low %v2640_v34, %v2631_v13  ;;  %v2729_v56 = vrot.slane %v2701_v37, %v7640_v36  ;;  %v2730_v43 = vcombine.low %v2708_v58, %v2715_v29 }
 0xe34   :  { %v2754_v8 = vrot.slane %v2747_v33, %v7640_v36  ;;  %v2731_v57 = vcombine.low %v2722_v46, %v2729_v56  ;;  %v2738_v50 = vrot.slane %v2730_v43, %v7640_v36 }
 0xe36   :  { %v7658_v16 = vrot.slane %v2754_v8, %v7640_v36  ;;  %v2745_v40 = vrot.slane %v2731_v57, %v7640_v36 }
 0xe38   :  { %v2768_v17 = vsel %vm2767_vm6, %v7658_v16, 0.0  ;;  %v7664_v19 = vcombine.low %v2738_v50, %v2745_v40 }
 0xe39   :  { %2769 = vadd.xlane.f32.xlu1 %v2768_v17 }
 0xe3a   :  { %v2764_v20 = vsel %vm525_vm0, %v7664_v19, 0.0 }
 0xe3b   :  { %2765 = vadd.xlane.f32.xlu0 %v2764_v20 }
 0xec6   :  { %v2770_v23 = vpop.xlane.xlu1 %2769 }
 0xec7   :  { %v2772_v21 = vmul.f32 0.015625, %v2770_v23 }
 0xec8   :  { %v2766_v55 = vpop.xlane.xlu0 %2765 }
 0xec9   :  { %v2810_v14 = vrot.slane %v2772_v21, %v7161_v42  ;;  %v2814_v7 = vrot.slane %v2772_v21, %v7164_v45  ;;  %v2771_v47 = vmul.f32 0.015625, %v2766_v55 }
 0xecb   :  { %v7676_v60 = vsub.f32 %v2640_v34, %v2810_v14  ;;  %v7678_v61 = vsub.f32 %v2631_v13, %v2814_v7  ;;  %v2778_v62 = vrot.slane %v2771_v47, %v7161_v42  ;;  %v2782_v18 = vrot.slane %v2771_v47, %v7164_v45  ;;  %v6784_v7 = vld [vmem:[%s8430_s2 + $0x260] ss:$8 sps:$4 sm:$0xff]  }
 0xecc   :  { %v2786_v59 = vrot.slane %v2771_v47, %v2785_v24  ;;  %v2790_v51 = vrot.slane %v2771_v47, %v2789_v32  ;;  %v2794_v53 = vrot.slane %v2771_v47, %v2793_v35  ;;  %v2798_v63 = vrot.slane %v2771_v47, %v2797_v38 }
 0xecd   :  { %v2843_v31 = vmul.f32 %v7676_v60, %v7676_v60  ;;  %v2844_v44 = vmul.f32 %v7678_v61, %v7678_v61  ;;  %v2802_v0 = vrot.slane %v2771_v47, %v2801_v2  ;;  %v2806_v1 = vrot.slane %v2771_v47, %v2805_v52  ;;  %v6786_v47 = vld [vmem:[%s8430_s2 + $0x264] ss:$8 sps:$4 sm:$0xff]  }
 0xece   :  { %v7698_v3 = vsub.f32 %v2585_v48, %v2778_v62  ;;  %v7700_v4 = vsub.f32 %v2599_v41, %v2782_v18  ;;  %v7702_v5 = vsub.f32 %v2600_v25, %v2786_v59  ;;  %v7704_v6 = vsub.f32 %v2601_v27, %v2790_v51  ;;  %v6789_v25 = vld [vmem:[%s8430_s2 + $0x274] ss:$8 sps:$4 sm:$0xff]   ;;  %3251 = vmatprep.subr.bf16.mxu0 %v6786_v47  ;;  %v6787_v27 = vld [vmem:[%s8430_s2 + $0x270] ss:$8 sps:$4 sm:$0xff]   ;;  %v6792_v18 = vld [vmem:[%s8430_s2 + $0x284] ss:$8 sps:$4 sm:$0xff]  }
 0xecf   :  { %v2904_v30 = vcombine.low %v2843_v31, %v2844_v44  ;;  %v7706_v11 = vsub.f32 %v2592_v9, %v2794_v53  ;;  %v7708_v54 = vsub.f32 %v2624_v10, %v2798_v63  ;;  %v7710_v39 = vsub.f32 %v2638_v49, %v2802_v0  ;;  %3252 = vmatpush1.bf16.msra.mxu0 %v6784_v7  ;;  %v6790_v59 = vld [vmem:[%s8430_s2 + $0x280] ss:$8 sps:$4 sm:$0xff]   ;;  %v6795_v51 = vld [vmem:[%s8430_s2 + $0x294] ss:$8 sps:$4 sm:$0xff]   ;;  %v6793_v53 = vld [vmem:[%s8430_s2 + $0x290] ss:$8 sps:$4 sm:$0xff]  }
 0xed0   :  { %v7712_v12 = vsub.f32 %v2639_v28, %v2806_v1  ;;  %v2835_v58 = vmul.f32 %v7698_v3, %v7698_v3  ;;  %v2836_v48 = vmul.f32 %v7700_v4, %v7700_v4  ;;  %v2837_v41 = vmul.f32 %v7702_v5, %v7702_v5  ;;  %3253 = vmatprep.subr.bf16.mxu0 %v6789_v25  ;;  %v2651_v0 = vld [vmem:[%s8431_s1 + $0x100] ss:$0 sm:$0xff]  ;;  %v2652_v1 = vld [vmem:[%s8431_s1 + $0x110] ss:$0 sm:$0xff] }
 0xed1   :  { %v2911_v29 = vrot.slane %v2904_v30, %v7640_v36  ;;  %v2838_v9 = vmul.f32 %v7704_v6, %v7704_v6  ;;  %v2839_v10 = vmul.f32 %v7706_v11, %v7706_v11  ;;  %v2840_v49 = vmul.f32 %v7708_v54, %v7708_v54 }
 0xed2   :  { %v2841_v28 = vmul.f32 %v7710_v39, %v7710_v39  ;;  %v2842_v13 = vmul.f32 %v7712_v12, %v7712_v12  ;;  %v2855_v34 = vcombine.low %v2835_v58, %v2836_v48  ;;  %v7016_v62 = vmov 0  }
 0xed3   :  { %v2918_v37 = vrot.slane %v2911_v29, %v7640_v36  ;;  %v2856_v33 = vcombine.low %v2837_v41, %v2838_v9  ;;  %v2857_v46 = vcombine.low %v2839_v10, %v2840_v49  ;;  %3283 = vmatprep.mubr.bf16.mxu0 %v7016_v62  ;;  %3254 = vmatpush1.bf16.msra.mxu0 %v6787_v27 }
 0xed4   :  { %v2858_v56 = vcombine.low %v2841_v28, %v2842_v13  ;;  %v2865_v43 = vrot.slane %v2855_v34, %v7640_v36  ;;  %3255 = vmatprep.subr.bf16.mxu0 %v6792_v18  ;;  %v2996_v30 = vcombine.high %v2651_v0, %v2651_v0  ;;  %v3003_v58 = vrot.slane %v2651_v0, %v7640_v36 }
 0xed5   :  { %v2924_v8 = vsel %vm2767_vm6, %v2918_v37, 0.0  ;;  %v2872_v57 = vrot.slane %v2856_v33, %v7640_v36  ;;  %v2879_v50 = vrot.slane %v2857_v46, %v7640_v36  ;;  %v3064_v48 = vcombine.high %v2652_v1, %v2652_v1 }
 0xed6   :  { %2925 = vadd.xlane.f32.xlu1 %v2924_v8  ;;  %v2886_v40 = vrot.slane %v2858_v56, %v7640_v36  ;;  %v3010_v9 = vrot.slane %v2996_v30, %v7640_v36  ;;  %v3071_v10 = vrot.slane %v2652_v1, %v7640_v36  ;;  %v3011_v49 = vcombine.high %v3003_v58, %v3003_v58 }
 0xed7   :  { %v2887_v17 = vcombine.low %v2865_v43, %v2872_v57  ;;  %3256 = vmatpush1.bf16.msra.mxu0 %v6790_v59  ;;  %v3078_v13 = vrot.slane %v3064_v48, %v7640_v36  ;;  %v3019_v33 = vrot.slane %v3003_v58, %v7640_v36 }
 0xed8   :  { %v2888_v20 = vcombine.low %v2879_v50, %v2886_v40  ;;  %3257 = vmatprep.subr.bf16.mxu0 %v6795_v51  ;;  %v3012_v37 = vcombine.high %v3010_v9, %v3010_v9  ;;  %v3079_v46 = vcombine.high %v3071_v10, %v3071_v10  ;;  %v3033_v56 = vrot.slane %v3011_v49, %v7640_v36 }
 0xed9   :  { %v2895_v23 = vrot.slane %v2887_v17, %v7640_v36  ;;  %v3080_v57 = vcombine.high %v3078_v13, %v3078_v13  ;;  %v3087_v17 = vrot.slane %v3071_v10, %v7640_v36  ;;  %v3041_v25 = vcombine.high %v3019_v33, %v3019_v33 }
 0xeda   :  { %v2902_v21 = vrot.slane %v2888_v20, %v7640_v36  ;;  %v3026_v20 = vrot.slane %v3010_v9, %v7640_v36  ;;  %v3043_v27 = vcombine.high %v3033_v56, %v3033_v56 }
 0xedb   :  { %3258 = vmatpush1.bf16.msra.mxu0 %v6793_v53  ;;  %v3108_v47 = vrot.slane %v3080_v57, %v7640_v36  ;;  %v3109_v59 = vcombine.high %v3087_v17, %v3087_v17 }
 0xedc   :  { %v2903_v55 = vcombine.low %v2895_v23, %v2902_v21  ;;  %6518 = vmatprep.subr.bf16.mxu0 %v7011_v15  ;;  %v3040_v23 = vrot.slane %v3012_v37, %v7640_v36  ;;  %v3094_v21 = vrot.slane %v3078_v13, %v7640_v36  ;;  %v3042_v18 = vcombine.high %v3026_v20, %v3026_v20 }
 0xede   :  { %v2921_v14 = vsel %vm525_vm0, %v2903_v55, 0.0  ;;  %v3101_v55 = vrot.slane %v3079_v46, %v7640_v36 }
 0xedf   :  { %2922 = vadd.xlane.f32.xlu0 %v2921_v14 }
 0xf63   :  { %v2926_v63 = vpop.xlane.xlu1 %2925 }
 0xf64   :  { %v2928_v31 = vmul.f32 0.015625, %v2926_v63 }
 0xf66   :  { %v2930_v44 = vadd.f32 1e-05, %v2928_v31  ;;  %v3111_v31 = vcombine.high %v3101_v55, %v3101_v55 }
 0xf68   :  { %6948 = vrsqrt.f32 %v2930_v44  ;;  %v3112_v44 = vcombine.high %v3108_v47, %v3108_v47 }
 0xf6c   :  { %v2923_v41 = vpop.xlane.xlu0 %2922 }
 0xf6d   :  { %v2927_v29 = vmul.f32 0.015625, %v2923_v41 }
 0xf6f   :  { %v2929_v28 = vadd.f32 1e-05, %v2927_v29 }
 0xf71   :  { %6950 = vrsqrt.f32 %v2929_v28 }
 0xf72   :  { %v6949_v34 = vpop.eup %6948 }
 0xf73   :  { %v2970_v43 = vrot.slane %v6949_v34, %v7161_v42  ;;  %v2974_v8 = vrot.slane %v6949_v34, %v7164_v45 }
 0xf75   :  { %v2993_v50 = vmul.f32 %v2970_v43, %v7676_v60  ;;  %v2994_v40 = vmul.f32 %v2974_v8, %v7678_v61  ;;  %v3044_v60 = vcombine.high %v3040_v23, %v3040_v23  ;;  %v3110_v61 = vcombine.high %v3094_v21, %v3094_v21 }
 0xf77   :  { %v3061_v14 = vmul.f32 %v3019_v33, %v2993_v50  ;;  %v3062_v7 = vmul.f32 %v3033_v56, %v2994_v40 }
 0xf79   :  { %v3129_v53 = vadd.f32 %v3087_v17, %v3061_v14  ;;  %v3130_v63 = vadd.f32 %v3101_v55, %v3062_v7 }
 0xf7b   :  { %v6951_v51 = vpop.eup %6950 }
 0xf7c   :  { %v2938_v0 = vrot.slane %v6951_v51, %v7161_v42  ;;  %v2942_v1 = vrot.slane %v6951_v51, %v7164_v45  ;;  %v2946_v30 = vrot.slane %v6951_v51, %v2785_v24  ;;  %v2950_v58 = vrot.slane %v6951_v51, %v2789_v32 }
 0xf7d   :  { %v2954_v48 = vrot.slane %v6951_v51, %v2793_v35  ;;  %v2958_v41 = vrot.slane %v6951_v51, %v2797_v38  ;;  %v2962_v29 = vrot.slane %v6951_v51, %v2801_v2  ;;  %v2966_v9 = vrot.slane %v6951_v51, %v2805_v52 }
 0xf7e   :  { %v2985_v10 = vmul.f32 %v2938_v0, %v7698_v3  ;;  %v2986_v49 = vmul.f32 %v2942_v1, %v7700_v4  ;;  %v2987_v24 = vmul.f32 %v2946_v30, %v7702_v5  ;;  %v2988_v32 = vmul.f32 %v2950_v58, %v7704_v6 }
 0xf7f   :  { %v2989_v28 = vmul.f32 %v2954_v48, %v7706_v11  ;;  %v2990_v35 = vmul.f32 %v2958_v41, %v7708_v54  ;;  %v2991_v38 = vmul.f32 %v2962_v29, %v7710_v39  ;;  %v2992_v13 = vmul.f32 %v2966_v9, %v7712_v12 }
 0xf80   :  { %v3053_v2 = vmul.f32 %v3019_v33, %v2985_v10  ;;  %v3054_v34 = vmul.f32 %v3033_v56, %v2986_v49  ;;  %v3055_v26 = vmul.f32 %v3041_v25, %v2987_v24  ;;  %v3056_v52 = vmul.f32 %v3043_v27, %v2988_v32 }
 0xf81   :  { %v3057_v37 = vmul.f32 %v3026_v20, %v2989_v28  ;;  %v3058_v3 = vmul.f32 %v3040_v23, %v2990_v35  ;;  %v3059_v46 = vmul.f32 %v3042_v18, %v2991_v38  ;;  %v3060_v4 = vmul.f32 %v3044_v60, %v2992_v13 }
 0xf82   :  { %v3121_v43 = vadd.f32 %v3087_v17, %v3053_v2  ;;  %v3122_v5 = vadd.f32 %v3101_v55, %v3054_v34  ;;  %v3123_v8 = vadd.f32 %v3109_v59, %v3055_v26  ;;  %v3124_v6 = vadd.f32 %v3111_v31, %v3056_v52 }
 0xf83   :  { %v3125_v57 = vadd.f32 %v3094_v21, %v3057_v37  ;;  %v3126_v11 = vadd.f32 %v3108_v47, %v3058_v3  ;;  %v3127_v50 = vadd.f32 %v3110_v61, %v3059_v46  ;;  %v3128_v54 = vadd.f32 %v3112_v44, %v3060_v4 }
 0xf84   :  { %v3141_v40 = vcombine.low %v3121_v43, %v3122_v5  ;;  %v3142_v39 = vcombine.low %v3123_v8, %v3124_v6  ;;  %v3190_v33 = vcombine.low %v3129_v53, %v3130_v63  ;;  %v7017_v24 = vmov 65535  }
 0xf85   :  { %v3143_v14 = vcombine.low %v3125_v57, %v3126_v11  ;;  %v3144_v12 = vcombine.low %v3127_v50, %v3128_v54  ;;  %v3535_v32 = vsel %vm1592_vm4, 4294967295, %v7017_v24  ;;  %vm3498_vm4 = vcmask 36864  }
 0xf86   :  { %v3151_v56 = vrot.slane %v3141_v40, %v7640_v36  ;;  %v3158_v20 = vrot.slane %v3142_v39, %v7640_v36  ;;  %v3197_v21 = vrot.slane %v3190_v33, %v7640_v36  ;;  %v7830_v37 = vsel %vm2542_vm14, %v3535_v32, 0 }
 0xf87   :  { %v3165_v23 = vrot.slane %v3143_v14, %v7640_v36  ;;  %v3172_v17 = vrot.slane %v3144_v12, %v7640_v36 }
 0xf88   :  { %v3173_v55 = vcombine.low %v3151_v56, %v3158_v20  ;;  %v3204_v18 = vrot.slane %v3197_v21, %v7640_v36 }
 0xf89   :  { %v3174_v7 = vcombine.low %v3165_v23, %v3172_v17 }
 0xf8a   :  { %v3181_v47 = vrot.slane %v3173_v55, %v7640_v36 }
 0xf8b   :  { %v3188_v25 = vrot.slane %v3174_v7, %v7640_v36 }
 0xf8d   :  { %v3189_v27 = vcombine.low %v3181_v47, %v3188_v25 }
 0xf8f   :  { %v3207_v60 = vpack.c.bf16 %v3204_v18, %v3189_v27 }
 0xf91   :  { %6059 = vmatmul.mubr.msk.bf16.vlgmr.msra.gmra.mrb[48].mxu0 %vm525_vm0, %v3207_v60 }
 0xf92   :  { %6520 = vmatprep.mubr.msk.bf16.mxu0 %vm7012_vm1, %v7011_v15 }
0x1064   :  { %v3285_v59 = vpop.f32.mrb[48].mxu0 }
0x1065   :  { %v3287_v61 = vpop.f32.mrb[49].mxu0 }
0x1066   :  { %v6060_v51 = vpack.c.bf16 %v3287_v61, %v3285_v59  ;;  %v3289_v53 = vpop.f32.mrb[50].mxu0 }
0x1067   :  { %v3291_v63 = vpop.f32.mrb[51].mxu0 }
0x1068   :  { %v3306_v31 = vrot.slane %v6060_v51, %v7640_v36  ;;  %v6061_v44 = vpack.c.bf16 %v3291_v63, %v3289_v53 }
0x106a   :  { %v3314_v0 = vcombine.high %v3306_v31, %v3306_v31  ;;  %v3321_v1 = vrot.slane %v3306_v31, %v7640_v36  ;;  %v3313_v30 = vrot.slane %v6061_v44, %v7640_v36 }
0x106c   :  { %v3335_v58 = vrot.slane %v3314_v0, %v7640_v36  ;;  %v3336_v48 = vcombine.high %v3321_v1, %v3321_v1  ;;  %v3328_v41 = vrot.slane %v3313_v30, %v7640_v36 }
0x106e   :  { %v3337_v29 = vcombine.high %v3335_v58, %v3335_v58  ;;  %v3342_v9 = vunpack.i.l.s16 %v3336_v48  ;;  %v3343_v10 = vunpack.i.h.s16 %v3336_v48  ;;  %v3351_v49 = vcombine.low %v3321_v1, %v3335_v58 }
0x106f   :  { %v3347_v13 = vunpack.i.h.s16 %v3328_v41 }
0x1070   :  { %v3358_v28 = vrot.slane %v3351_v49, %v7640_v36  ;;  %v3365_v35 = vrot.slane %v3342_v9, %v7640_v36  ;;  %v3345_v38 = vunpack.i.h.s16 %v3337_v29  ;;  %v6063_v34 = vpack.i.b16 %v3337_v29, %v3343_v10 }
0x1071   :  { %v3439_v5 = vrot.slane %v3347_v13, %v7640_v36 }
0x1072   :  { %v3523_v2 = vcombine.high %v3358_v28, %v3365_v35  ;;  %v6064_v26 = vpack.i.b16 %v3328_v41, %v3345_v38  ;;  %v3366_v52 = vcombine.low %v3358_v28, %v3365_v35 }
0x1074   :  { %v3425_v3 = vcombine.low %v6063_v34, %v6064_v26  ;;  %v3373_v46 = vrot.slane %v3366_v52, %v7640_v36  ;;  %v7834_v4 = vrot.slane %v3523_v2, %v7640_v36 }
0x1076   :  { %v3432_v43 = vrot.slane %v3425_v3, %v7640_v36  ;;  %3374 = vrot.lane.b32.xlu0 %v3373_v46, %s7014_s28  ;;  %v3538_v8 = vand.u32 %v7830_v37, %v7834_v4 }
0x1078   :  { %v3580_v6 = vcombine.high %v3432_v43, %v3439_v5  ;;  %6519 = vmatpush3.bf16.msra.mxu0 %v3538_v8  ;;  %v3440_v57 = vcombine.low %v3432_v43, %v3439_v5 }
0x1079   :  { %6530 = vmatprep.subr.bf16.mxu0 %v7011_v15 }
0x107a   :  { %v3447_v11 = vrot.slane %v3440_v57, %v7640_v36  ;;  %v7852_v14 = vrot.slane %v3580_v6, %v7640_v36 }
0x107c   :  { %3448 = vrot.lane.b32.xlu1 %v3447_v11, %s7014_s28  ;;  %v3592_v12 = vand.u32 %v7852_v14, %v7830_v37 }
0x10e8   :  { %v3375_v50 = vpop.permute.xlu0 %3374 }
0x10e9   :  { %v3380_v54 = vsel %vm1049_vm2, %v3375_v50, 0 }
0x10ea   :  { %6507 = vmatpush3.bf16.xpose.msra.mxu1 %v3380_v54 }
0x10eb   :  { %6512 = vmatprep.subr.bf16.mxu1 %v7011_v15 }
0x10ee   :  { %v3449_v40 = vpop.permute.xlu1 %3448 }
0x10ef   :  { %v3454_v39 = vsel %vm1049_vm2, %v3449_v40, 0 }
0x10f1   :  { %6509 = vmatmul.mubr.msk.bf16.vlgmr.msra.gmra.mrb[44].mxu1 %vm1049_vm2, %v3373_v46 }
0x10f2   :  { %6513 = vmatpush3.bf16.xpose.msra.mxu1 %v3454_v39  ;;  %6514 = vmatprep.mubr.msk.bf16.mxu1 %vm7012_vm1, %v7011_v15 }
0x10f3   :  { %6524 = vmatprep.subr.bf16.mxu1 %v7011_v15 }
0x10f9   :  { %6515 = vmatmul.mubr.msk.bf16.vlgmr.msra.gmra.mrb[48].mxu1 %vm1049_vm2, %v3447_v11 }
0x10fa   :  { %6525 = vmatpush3.bf16.msra.mxu1 %v3592_v12  ;;  %6526 = vmatprep.mubr.msk.bf16.mxu1 %vm7012_vm1, %v7011_v15 }
0x10fb   :  { %6536 = vmatprep.subr.bf16.mxu1 %v7011_v15 }
0x11c4   :  { %v3416_v33 = vpop.f32.mrb[44].mxu1 }
0x11c5   :  { %v3496_v56 = vmul.f32 0.17677669, %v3416_v33  ;;  %v6510_v20 = vpop.f32.mrb[45].mxu1 }
0x11c6   :  { %v3419_v23 = vpop.f32.mrb[46].mxu1 }
0x11c7   :  { %v6511_v17 = vpop.f32.mrb[47].mxu1  ;;  %v3499_v55 = vsel %vm3498_vm4, %v3496_v56, -inf }
0x11c8   :  { %3500 = vmax.xlane.f32.xlu1 %v3499_v55 }
0x11cc   :  { %v3490_v7 = vpop.f32.mrb[48].mxu1 }
0x11cd   :  { %v3497_v21 = vmul.f32 0.17677669, %v3490_v7  ;;  %v6516_v47 = vpop.f32.mrb[49].mxu1 }
0x11ce   :  { %v3493_v25 = vpop.f32.mrb[50].mxu1 }
0x11cf   :  { %v6517_v27 = vpop.f32.mrb[51].mxu1  ;;  %v3502_v18 = vsel %vm3498_vm4, %v3497_v21, -inf }
0x11d0   :  { %3503 = vmax.xlane.f32.xlu0 %v3502_v18 }
0x11d9   :  { %3686 = vrot.lane.b32.xlu1 %v3447_v11, %s7018_s22 }
0x1255   :  { %v3501_v60 = vpop.xlane.xlu1 %3500 }
0x1256   :  { %v3505_v59 = vsub.f32 %v3496_v56, %v3501_v60 }
0x1258   :  { %v3507_v61 = vmul.f32 1.442695, %v3505_v59 }
0x1259   :  { %v3687_v58 = vpop.permute.xlu1 %3686 }
0x125a   :  { %6952 = vpow2.f32 %v3507_v61  ;;  %v3692_v38 = vsel %vm1049_vm2, %v3687_v58, 0  ;;  %v6796_v58 = vld [vmem:[%s8430_s2 + $0x2a0] ss:$8 sps:$4 sm:$0xff]  }
0x125d   :  { %v3504_v51 = vpop.xlane.xlu0 %3503 }
0x125e   :  { %v3506_v53 = vsub.f32 %v3497_v21, %v3504_v51 }
0x1260   :  { %v3509_v63 = vmul.f32 1.442695, %v3506_v53 }
0x1262   :  { %6954 = vpow2.f32 %v3509_v63 }
0x1264   :  { %v6953_v31 = vpop.eup %6952 }
0x1265   :  { %v3511_v44 = vsel %vm3498_vm4, %v6953_v31, 0.0 }
0x1266   :  { %3512 = vadd.xlane.f32.xlu0 %v3511_v44 }
0x126c   :  { %v6955_v0 = vpop.eup %6954 }
0x126d   :  { %v3514_v1 = vsel %vm3498_vm4, %v6955_v0, 0.0 }
0x126e   :  { %3515 = vadd.xlane.f32.xlu1 %v3514_v1 }
0x127c   :  { %3636 = vrot.lane.b32.xlu0 %v3373_v46, %s7018_s22 }
0x127f   :  { %3634 = vrot.lane.b32.xlu1 %v3373_v46, %s7013_s0 }
0x1283   :  { %3684 = vrot.lane.b32.xlu1 %v3447_v11, %s7013_s0 }
0x12f3   :  { %v3513_v30 = vpop.xlane.xlu0 %3512 }
0x12f4   :  { %6956 = vrcp.f32 %v3513_v30 }
0x12f7   :  { %v3637_v9 = vpop.permute.xlu0 %3636 }
0x12f8   :  { %v3642_v49 = vsel %vm1049_vm2, %v3637_v9, 0 }
0x12fb   :  { %v3516_v48 = vpop.xlane.xlu1 %3515 }
0x12fc   :  { %6958 = vrcp.f32 %v3516_v48 }
0x12fe   :  { %v6957_v41 = vpop.eup %6956 }
0x12ff   :  { %v3519_v29 = vmul.f32 %v6957_v41, %v6953_v31  ;;  %v3635_v35 = vpop.permute.xlu1 %3634 }
0x1301   :  { %v3521_v10 = vpack.c.bf16 %v3519_v29, %v3519_v29 }
0x1303   :  { %6521 = vmatmul.mubr.msk.bf16.vlgmr.msra.gmra.mrb[52].mxu0 %vm3531_vm8, %v3521_v10  ;;  %v3685_v13 = vpop.permute.xlu1 %3684  ;;  %v6797_v10 = vld [vmem:[%s8430_s2 + $0x2b0] ss:$8 sps:$4 sm:$0xff]  }
0x1304   :  { %6531 = vmatpush3.bf16.xpose.msra.mxu0 %v3642_v49  ;;  %6532 = vmatprep.mubr.msk.bf16.mxu0 %vm7012_vm1, %v7011_v15 }
0x1305   :  { %6542 = vmatprep.subr.bf16.mxu0 %v7011_v15 }
0x1306   :  { %v6959_v24 = vpop.eup %6958 }
0x1307   :  { %v3520_v32 = vmul.f32 %v6959_v24, %v6955_v0 }
0x1309   :  { %v3522_v28 = vpack.c.bf16 %v3520_v32, %v3520_v32  ;;  %v6798_v32 = vld [vmem:[%s8430_s2 + $0x2c0] ss:$8 sps:$4 sm:$0xff]  }
0x130b   :  { %6527 = vmatmul.mubr.msk.bf16.vlgmr.msra.gmra.mrb[52].mxu1 %vm3531_vm8, %v3522_v28  ;;  %6533 = vmatmul.mubr.msk.bf16.vlgmr.msra.gmra.mrb[56].mxu0 %vm1049_vm2, %v3635_v35 }
0x130c   :  { %6537 = vmatpush3.bf16.xpose.msra.mxu1 %v3692_v38  ;;  %6538 = vmatprep.mubr.msk.bf16.mxu1 %vm7012_vm1, %v7011_v15  ;;  %v6799_v38 = vld [vmem:[%s8430_s2 + $0x2d0] ss:$8 sps:$4 sm:$0xff]  }
0x130d   :  { %6548 = vmatprep.subr.bf16.mxu1 %v7011_v15  ;;  %6544 = vmatprep.mubr.msk.bf16.mxu0 %vm7012_vm1, %v7011_v15 }
0x1313   :  { %6539 = vmatmul.mubr.msk.bf16.vlgmr.msra.gmra.mrb[56].mxu1 %vm1049_vm2, %v3685_v13 }
0x1314   :  { %6550 = vmatprep.mubr.msk.bf16.mxu1 %vm7012_vm1, %v7011_v15 }
0x13d6   :  { %v7884_v2 = vpop.f32.mrb[52].mxu0 }
0x13d7   :  { %v6522_v34 = vpop.f32.mrb[53].mxu0 }
0x13d8   :  { %v3577_v26 = vpop.f32.mrb[54].mxu0 }
0x13d9   :  { %v6523_v52 = vpop.f32.mrb[55].mxu0 }
0x13de   :  { %v7886_v3 = vpop.f32.mrb[52].mxu1  ;;  %v3678_v46 = vpop.f32.mrb[56].mxu0 }
0x13df   :  { %v3734_v43 = vmul.f32 0.17677669, %v3678_v46  ;;  %v6528_v5 = vpop.f32.mrb[53].mxu1  ;;  %v6534_v8 = vpop.f32.mrb[57].mxu0 }
0x13e0   :  { %v3631_v6 = vpop.f32.mrb[54].mxu1  ;;  %v3681_v57 = vpop.f32.mrb[58].mxu0 }
0x13e1   :  { %v6529_v11 = vpop.f32.mrb[55].mxu1  ;;  %v6535_v50 = vpop.f32.mrb[59].mxu0  ;;  %v3736_v54 = vsel %vm3498_vm4, %v3734_v43, -inf }
0x13e2   :  { %3737 = vmax.xlane.f32.xlu0 %v3736_v54 }
0x13e6   :  { %v3728_v40 = vpop.f32.mrb[56].mxu1 }
0x13e7   :  { %v3735_v39 = vmul.f32 0.17677669, %v3728_v40  ;;  %v6540_v12 = vpop.f32.mrb[57].mxu1 }
0x13e8   :  { %v3731_v33 = vpop.f32.mrb[58].mxu1 }
0x13e9   :  { %v6541_v56 = vpop.f32.mrb[59].mxu1  ;;  %v3739_v20 = vsel %vm3498_vm4, %v3735_v39, -inf }
0x13ea   :  { %3740 = vmax.xlane.f32.xlu1 %v3739_v20 }
0x13fb   :  { %3808 = vrot.lane.b32.xlu1 %v7852_v14, %s7013_s0 }
0x146f   :  { %v3738_v23 = vpop.xlane.xlu0 %3737 }
0x1470   :  { %v3742_v17 = vsub.f32 %v3734_v43, %v3738_v23 }
0x1472   :  { %v3744_v55 = vmul.f32 1.442695, %v3742_v17 }
0x1474   :  { %6960 = vpow2.f32 %v3744_v55 }
0x1477   :  { %v3741_v7 = vpop.xlane.xlu1 %3740 }
0x1478   :  { %v3743_v21 = vsub.f32 %v3735_v39, %v3741_v7 }
0x147a   :  { %v3746_v47 = vmul.f32 1.442695, %v3743_v21 }
0x147b   :  { %v3809_v25 = vpop.permute.xlu1 %3808 }
0x147c   :  { %6962 = vpow2.f32 %v3746_v47  ;;  %v3814_v27 = vand.u32 %v3809_v25, %v7830_v37 }
0x147e   :  { %v6961_v18 = vpop.eup %6960  ;;  %6549 = vmatpush3.bf16.msra.mxu1 %v3814_v27 }
0x147f   :  { %v3748_v60 = vsel %vm3498_vm4, %v6961_v18, 0.0  ;;  %6566 = vmatprep.subr.bf16.mxu1 %v7011_v15 }
0x1480   :  { %3749 = vadd.xlane.f32.xlu0 %v3748_v60 }
0x1486   :  { %v6963_v59 = vpop.eup %6962 }
0x1487   :  { %v3751_v14 = vsel %vm3498_vm4, %v6963_v59, 0.0 }
0x1488   :  { %3752 = vadd.xlane.f32.xlu0 %v3751_v14 }
0x149e   :  { %3760 = vrot.lane.b32.xlu0 %v7834_v4, %s7013_s0 }
0x150d   :  { %v3750_v61 = vpop.xlane.xlu0 %3749 }
0x150e   :  { %6964 = vrcp.f32 %v3750_v61 }
0x1515   :  { %v3753_v51 = vpop.xlane.xlu0 %3752 }
0x1516   :  { %6966 = vrcp.f32 %v3753_v51 }
0x1518   :  { %v6965_v53 = vpop.eup %6964 }
0x1519   :  { %v3756_v63 = vmul.f32 %v6965_v53, %v6961_v18  ;;  %v3761_v31 = vpop.permute.xlu0 %3760 }
0x151a   :  { %v3766_v44 = vand.u32 %v3761_v31, %v7830_v37  ;;  %v2669_v31 = vld [vmem:[%s8431_s1 + $0x120] ss:$0 sm:$0xff] }
0x151b   :  { %v3758_v0 = vpack.c.bf16 %v3756_v63, %v3756_v63 }
0x151c   :  { %6543 = vmatpush3.bf16.msra.mxu0 %v3766_v44 }
0x151d   :  { %6554 = vmatprep.subr.bf16.mxu0 %v7011_v15 }
0x151f   :  { %6545 = vmatmul.mubr.msk.bf16.vlgmr.msra.gmra.mrb[60].mxu0 %vm3531_vm8, %v3758_v0 }
0x1520   :  { %v6967_v1 = vpop.eup %6966  ;;  %6562 = vmatprep.mubr.msk.bf16.mxu0 %vm7012_vm1, %v7011_v15  ;;  %6555 = vmatpush3.bf16.msra.mxu0 %v6796_v58 }
0x1521   :  { %v3757_v4 = vmul.f32 %v6967_v1, %v6963_v59  ;;  %6556 = vmatprep.subr.bf16.mxu0 %v7011_v15 }
0x1523   :  { %v3759_v30 = vpack.c.bf16 %v3757_v4, %v3757_v4 }
0x1524   :  { %6557 = vmatpush3.bf16.msra.mxu0 %v6797_v10 }
0x1525   :  { %6551 = vmatmul.mubr.msk.bf16.vlgmr.msra.gmra.mrb[60].mxu1 %vm3531_vm8, %v3759_v30  ;;  %6558 = vmatprep.subr.bf16.mxu0 %v7011_v15 }
0x1526   :  { %6574 = vmatprep.mubr.msk.bf16.mxu1 %vm7012_vm1, %v7011_v15 }
0x1528   :  { %6559 = vmatpush3.bf16.msra.mxu0 %v6798_v32 }
0x1529   :  { %6560 = vmatprep.subr.bf16.mxu0 %v7011_v15 }
0x152c   :  { %6561 = vmatpush3.bf16.msra.mxu0 %v6799_v38 }
0x152d   :  { %6578 = vmatprep.subr.bf16.mxu0 %v7011_v15 }
0x15f2   :  { %v3802_v48 = vpop.f32.mrb[60].mxu0 }
0x15f3   :  { %3858 = vrot.lane.b32.xlu1 %v3802_v48, %s7018_s22  ;;  %v6546_v41 = vpop.f32.mrb[61].mxu0 }
0x15f4   :  { %v3805_v29 = vpop.f32.mrb[62].mxu0 }
0x15f5   :  { %v6547_v9 = vpop.f32.mrb[63].mxu0 }
0x15f8   :  { %v3850_v49 = vpop.f32.mrb[60].mxu1 }
0x15f9   :  { %3860 = vrot.lane.b32.xlu1 %v3850_v49, %s7018_s22  ;;  %v6552_v24 = vpop.f32.mrb[61].mxu1 }
0x15fa   :  { %v3853_v28 = vpop.f32.mrb[62].mxu1 }
0x15fb   :  { %v6553_v35 = vpop.f32.mrb[63].mxu1 }
0x1665   :  { %v3859_v13 = vpop.permute.xlu1 %3858 }
0x1666   :  { %v3864_v34 = vsel %vm1049_vm2, %v7884_v2, %v3859_v13 }
0x1667   :  { %v3875_v26 = vrot.slane %v3864_v34, %v7640_v36  ;;  %v3868_v52 = vcombine.high %v3864_v34, %v3864_v34  ;;  %v6800_v34 = vld [vmem:[%s8430_s2 + $0x2e0] ss:$8 sps:$4 sm:$0xff]  }
0x1668   :  { %6567 = vmatpush3.bf16.msra.mxu1 %v6800_v34  ;;  %v2697_v34 = vld [vmem:[%s8431_s1 + $0x160] ss:$0 sm:$0xff] }
0x1669   :  { %v3883_v46 = vcombine.high %v3875_v26, %v3875_v26  ;;  %v3882_v8 = vrot.slane %v3868_v52, %v7640_v36  ;;  %v3890_v6 = vrot.slane %v3875_v26, %v7640_v36  ;;  %6568 = vmatprep.subr.bf16.mxu1 %v7011_v15  ;;  %v6801_v26 = vld [vmem:[%s8430_s2 + $0x2f0] ss:$8 sps:$4 sm:$0xff]   ;;  %v6802_v52 = vld [vmem:[%s8430_s2 + $0x300] ss:$8 sps:$4 sm:$0xff]  }
0x166b   :  { %v3904_v43 = vrot.slane %v3883_v46, %v7640_v36  ;;  %v3861_v5 = vpop.permute.xlu1 %3860  ;;  %v3897_v12 = vrot.slane %v3882_v8, %v7640_v36  ;;  %v6803_v46 = vld [vmem:[%s8430_s2 + $0x310] ss:$8 sps:$4 sm:$0xff]  }
0x166c   :  { %v3865_v57 = vsel %vm1049_vm2, %v7886_v3, %v3861_v5  ;;  %6569 = vmatpush3.bf16.msra.mxu1 %v6801_v26 }
0x166d   :  { %v3907_v11 = vcombine.high %v3865_v57, %v3865_v57  ;;  %v3914_v50 = vrot.slane %v3865_v57, %v7640_v36  ;;  %v3946_v54 = vcombine.low %v3890_v6, %v3904_v43  ;;  %v6072_v40 = vcombine.high %v3890_v6, %v3904_v43  ;;  %6570 = vmatprep.subr.bf16.mxu1 %v7011_v15 }
0x166f   :  { %v3921_v2 = vrot.slane %v3907_v11, %v7640_v36  ;;  %v3922_v39 = vcombine.high %v3914_v50, %v3914_v50  ;;  %v3929_v33 = vrot.slane %v3914_v50, %v7640_v36  ;;  %v3956_v20 = vrot.slane %v3946_v54, %v7640_v36 }
0x1670   :  { %v3963_v23 = vrot.slane %v6072_v40, %v7640_v36  ;;  %6571 = vmatpush3.bf16.msra.mxu1 %v6802_v52  ;;  %v2670_v40 = vld [vmem:[%s8431_s1 + $0x130] ss:$0 sm:$0xff] }
0x1671   :  { %v3943_v56 = vrot.slane %v3922_v39, %v7640_v36  ;;  %v3944_v17 = vcombine.high %v3929_v33, %v3929_v33  ;;  %v3948_v3 = vcombine.low %v3897_v12, %v3929_v33  ;;  %v3936_v55 = vrot.slane %v3921_v2, %v7640_v36  ;;  %6572 = vmatprep.subr.bf16.mxu1 %v7011_v15  ;;  %v2671_v33 = vld [vmem:[%s8431_s1 + $0x140] ss:$0 sm:$0xff] }
0x1672   :  { %v3978_v25 = vcombine.low %v3956_v20, %v3963_v23 }
0x1673   :  { %v3945_v7 = vcombine.high %v3943_v56, %v3943_v56  ;;  %v3949_v21 = vcombine.low %v3943_v56, %v3944_v17  ;;  %v3970_v27 = vrot.slane %v3948_v3, %v7640_v36  ;;  %v6804_v3 = vld [vmem:[%s8430_s2 + $0x320] ss:$8 sps:$4 sm:$0xff]  }
0x1674   :  { %v3986_v14 = vrot.slane %v3978_v25, %v7640_v36  ;;  %6573 = vmatpush3.bf16.msra.mxu1 %v6803_v46  ;;  %v6809_v25 = vld [vmem:[%s8430_s2 + $0x370] ss:$8 sps:$4 sm:$0xff]  }
0x1675   :  { %v3995_v47 = vcombine.low %v3945_v7, %v3936_v55  ;;  %v3977_v18 = vrot.slane %v3949_v21, %v7640_v36  ;;  %v6805_v55 = vld [vmem:[%s8430_s2 + $0x330] ss:$8 sps:$4 sm:$0xff]   ;;  %v6806_v7 = vld [vmem:[%s8430_s2 + $0x340] ss:$8 sps:$4 sm:$0xff]  }
0x1676   :  { %v6807_v21 = vld [vmem:[%s8430_s2 + $0x350] ss:$8 sps:$4 sm:$0xff]  }
0x1677   :  { %v3979_v60 = vcombine.low %v3970_v27, %v3977_v18  ;;  %v4002_v59 = vrot.slane %v3995_v47, %v7640_v36  ;;  %v6808_v47 = vld [vmem:[%s8430_s2 + $0x360] ss:$8 sps:$4 sm:$0xff]   ;;  %v6811_v18 = vld [vmem:[%s8430_s2 + $0x390] ss:$8 sps:$4 sm:$0xff]  }
0x1678   :  { %v6810_v27 = vld [vmem:[%s8430_s2 + $0x380] ss:$8 sps:$4 sm:$0xff]  }
0x1679   :  { %v3993_v61 = vrot.slane %v3979_v60, %v7640_v36  ;;  %v4009_v51 = vrot.slane %v4002_v59, %v7640_v36  ;;  %v2680_v60 = vld [vmem:[%s8431_s1 + $0x150] ss:$0 sm:$0xff] }
0x167b   :  { %v3994_v53 = vcombine.low %v3986_v14, %v3993_v61 }
0x167d   :  { %v4012_v63 = vpack.c.bf16 %v4009_v51, %v3994_v53 }
0x167f   :  { %6563 = vmatmul.mubr.msk.bf16.vlgmr.msra.gmra.mrb[64].mxu0 %vm525_vm0, %v4012_v63 }
0x1680   :  { %6594 = vmatprep.mubr.msk.bf16.mxu0 %vm7012_vm1, %v7011_v15  ;;  %6579 = vmatpush3.bf16.msra.mxu0 %v6804_v3  ;;  %v6817_v3 = vld [vmem:[%s8430_s2 + $0x3b4] ss:$8 sps:$4 sm:$0xff]  }
0x1681   :  { %6580 = vmatprep.subr.bf16.mxu0 %v7011_v15 }
0x1684   :  { %6581 = vmatpush3.bf16.msra.mxu0 %v6805_v55  ;;  %v6815_v55 = vld [vmem:[%s8430_s2 + $0x3b0] ss:$8 sps:$4 sm:$0xff]  }
0x1685   :  { %6582 = vmatprep.subr.bf16.mxu0 %v7011_v15 }
0x1688   :  { %6583 = vmatpush3.bf16.msra.mxu0 %v6806_v7  ;;  %v6820_v7 = vld [vmem:[%s8430_s2 + $0x3c4] ss:$8 sps:$4 sm:$0xff]  }
0x1689   :  { %6584 = vmatprep.subr.bf16.mxu0 %v7011_v15 }
0x168c   :  { %6585 = vmatpush3.bf16.msra.mxu0 %v6807_v21  ;;  %v6818_v21 = vld [vmem:[%s8430_s2 + $0x3c0] ss:$8 sps:$4 sm:$0xff]  }
0x168d   :  { %6586 = vmatprep.subr.bf16.mxu0 %v7011_v15 }
0x1690   :  { %6587 = vmatpush3.bf16.msra.mxu0 %v6808_v47  ;;  %v6823_v47 = vld [vmem:[%s8430_s2 + $0x3d4] ss:$8 sps:$4 sm:$0xff]  }
0x1691   :  { %6588 = vmatprep.subr.bf16.mxu0 %v7011_v15 }
0x1694   :  { %6589 = vmatpush3.bf16.msra.mxu0 %v6809_v25  ;;  %v6821_v25 = vld [vmem:[%s8430_s2 + $0x3d0] ss:$8 sps:$4 sm:$0xff]  }
0x1695   :  { %6590 = vmatprep.subr.bf16.mxu0 %v7011_v15 }
0x1698   :  { %6591 = vmatpush3.bf16.msra.mxu0 %v6810_v27 }
0x1699   :  { %6592 = vmatprep.subr.bf16.mxu0 %v7011_v15 }
0x169c   :  { %6593 = vmatpush3.bf16.msra.mxu0 %v6811_v18 }
0x169d   :  { %6610 = vmatprep.subr.bf16.mxu0 %v7011_v15 }
0x1752   :  { %v4074_v44 = vpop.f32.mrb[64].mxu0 }
0x1753   :  { %v4075_v0 = vadd.f32 %v4074_v44, %v2669_v31  ;;  %v6564_v1 = vpop.f32.mrb[65].mxu0 }
0x1754   :  { %v4077_v4 = vpop.f32.mrb[66].mxu0 }
0x1755   :  { %v7953_v30 = vadd.f32 %v4075_v0, %v7664_v19  ;;  %v4078_v58 = vadd.f32 %v4077_v4, %v2669_v31  ;;  %v6565_v48 = vpop.f32.mrb[67].mxu0 }
0x1757   :  { %v7956_v41 = vadd.f32 %v4078_v58, %v7658_v16  ;;  %v4083_v29 = vsel %vm525_vm0, %v7953_v30, 0.0 }
0x1758   :  { %4084 = vadd.xlane.f32.xlu0 %v4083_v29 }
0x1759   :  { %v4086_v9 = vsel %vm2767_vm6, %v7956_v41, 0.0 }
0x175a   :  { %4087 = vadd.xlane.f32.xlu1 %v4086_v9 }
0x17e5   :  { %v4085_v10 = vpop.xlane.xlu0 %4084 }
0x17e6   :  { %v4089_v49 = vmul.f32 0.015625, %v4085_v10 }
0x17e7   :  { %v4088_v24 = vpop.xlane.xlu1 %4087 }
0x17e8   :  { %v4091_v32 = vsub.f32 %v7953_v30, %v4089_v49  ;;  %v4090_v19 = vmul.f32 0.015625, %v4088_v24 }
0x17ea   :  { %v4092_v28 = vsub.f32 %v7956_v41, %v4090_v19  ;;  %v4093_v35 = vmul.f32 %v4091_v32, %v4091_v32 }
0x17ec   :  { %v4095_v16 = vsel %vm525_vm0, %v4093_v35, 0.0  ;;  %v4094_v38 = vmul.f32 %v4092_v28, %v4092_v28 }
0x17ed   :  { %4096 = vadd.xlane.f32.xlu0 %v4095_v16 }
0x17ee   :  { %v4098_v13 = vsel %vm2767_vm6, %v4094_v38, 0.0 }
0x17f1   :  { %4099 = vadd.xlane.f32.xlu0 %v4098_v13 }
0x187a   :  { %v4097_v43 = vpop.xlane.xlu0 %4096 }
0x187b   :  { %v4101_v5 = vmul.f32 0.015625, %v4097_v43 }
0x187d   :  { %v4103_v8 = vadd.f32 1e-05, %v4101_v5 }
0x187e   :  { %v4100_v6 = vpop.xlane.xlu0 %4099 }
0x187f   :  { %6968 = vrsqrt.f32 %v4103_v8  ;;  %v4102_v57 = vmul.f32 0.015625, %v4100_v6 }
0x1881   :  { %v4104_v11 = vadd.f32 1e-05, %v4102_v57 }
0x1883   :  { %6970 = vrsqrt.f32 %v4104_v11 }
0x1889   :  { %v6969_v50 = vpop.eup %6968 }
0x188a   :  { %v4107_v54 = vmul.f32 %v6969_v50, %v4091_v32 }
0x188c   :  { %v4109_v39 = vmul.f32 %v4107_v54, %v2670_v40 }
0x188d   :  { %v6971_v2 = vpop.eup %6970 }
0x188e   :  { %v4108_v12 = vmul.f32 %v6971_v2, %v4092_v28  ;;  %v4111_v20 = vadd.f32 %v4109_v39, %v2671_v33 }
0x1890   :  { %v4110_v56 = vmul.f32 %v4108_v12, %v2670_v40 }
0x1892   :  { %v4112_v23 = vadd.f32 %v4110_v56, %v2671_v33 }
0x1894   :  { %v4113_v17 = vpack.c.bf16 %v4112_v23, %v4111_v20  ;;  %v6814_v23 = vld [vmem:[%s8430_s2 + $0x3a4] ss:$8 sps:$4 sm:$0xff]  }
0x1895   :  { %4413 = vmatprep.subr.bf16.mxu1 %v6814_v23 }
0x1896   :  { %6575 = vmatmul.mubr.msk.bf16.vlgmr.msra.gmra.mrb[64].mxu1 %vm525_vm0, %v4113_v17  ;;  %v6812_v17 = vld [vmem:[%s8430_s2 + $0x3a0] ss:$8 sps:$4 sm:$0xff]  }
0x1897   :  { %4445 = vmatprep.mubr.bf16.mxu1 %v7016_v62  ;;  %4414 = vmatpush1.bf16.msra.mxu1 %v6812_v17 }
0x1898   :  { %4415 = vmatprep.subr.bf16.mxu1 %v6817_v3 }
0x189b   :  { %4416 = vmatpush1.bf16.msra.mxu1 %v6815_v55 }
0x189c   :  { %4417 = vmatprep.subr.bf16.mxu1 %v6820_v7 }
0x189f   :  { %4418 = vmatpush1.bf16.msra.mxu1 %v6818_v21 }
0x18a0   :  { %4419 = vmatprep.subr.bf16.mxu1 %v6823_v47 }
0x18a3   :  { %4420 = vmatpush1.bf16.msra.mxu1 %v6821_v25 }
0x18a4   :  { %6598 = vmatprep.subr.bf16.mxu1 %v7011_v15 }
0x1969   :  { %v4175_v59 = vpop.f32.mrb[64].mxu1 }
0x196a   :  { %v4176_v14 = vadd.f32 %v4175_v59, %v2680_v60  ;;  %v6576_v61 = vpop.f32.mrb[65].mxu1 }
0x196b   :  { %v4178_v51 = vpop.f32.mrb[66].mxu1 }
0x196c   :  { %v4184_v53 = vmul.f32 0.044715, %v4176_v14  ;;  %v4179_v63 = vadd.f32 %v4178_v51, %v2680_v60  ;;  %v6577_v31 = vpop.f32.mrb[67].mxu1  ;;  %v4182_v19 = vmul.f32 0.5, %v4176_v14 }
0x196e   :  { %v4186_v44 = vmul.f32 %v4184_v53, %v4176_v14  ;;  %v4185_v0 = vmul.f32 0.044715, %v4179_v63  ;;  %v4183_v28 = vmul.f32 0.5, %v4179_v63  ;;  %v4292_v53 = vld [vmem:[%s8431_s1 + $0x170] ss:$0 sm:$0xff] }
0x1970   :  { %v4188_v1 = vmul.f32 %v4186_v44, %v4176_v14  ;;  %v4187_v4 = vmul.f32 %v4185_v0, %v4179_v63 }
0x1972   :  { %v4190_v58 = vadd.f32 %v4188_v1, %v4176_v14  ;;  %v4189_v48 = vmul.f32 %v4187_v4, %v4179_v63  ;;  %v4293_v1 = vld [vmem:[%s8431_s1 + $0x180] ss:$0 sm:$0xff] }
0x1974   :  { %v4192_v29 = vmul.f32 0.7978846, %v4190_v58  ;;  %v4191_v9 = vadd.f32 %v4189_v48, %v4179_v63 }
0x1976   :  { %6972 = vtanh.f32 %v4192_v29  ;;  %v4193_v10 = vmul.f32 0.7978846, %v4191_v9 }
0x1978   :  { %6974 = vtanh.f32 %v4193_v10 }
0x1980   :  { %v6973_v49 = vpop.eup %6972 }
0x1981   :  { %v4196_v24 = vadd.f32 1.0, %v6973_v49 }
0x1982   :  { %v6975_v32 = vpop.eup %6974 }
0x1983   :  { %v4197_v35 = vadd.f32 1.0, %v6975_v32  ;;  %v4198_v16 = vmul.f32 %v4196_v24, %v4182_v19 }
0x1985   :  { %v4199_v38 = vmul.f32 %v4197_v35, %v4183_v28 }
0x1987   :  { %v4200_v13 = vpack.c.bf16 %v4199_v38, %v4198_v16 }
0x1989   :  { %6595 = vmatmul.mubr.bf16.vlgmr.msra.gmra.mrb[68].mxu0 %v4200_v13 }
0x198a   :  { %6612 = vmatprep.mubr.msk.bf16.mxu0 %vm7012_vm1, %v7011_v15 }
0x1a5c   :  { %v4283_v26 = vpop.f32.mrb[68].mxu0 }
0x1a5d   :  { %v4284_v52 = vadd.f32 %v4283_v26, %v2697_v34  ;;  %v6596_v46 = vpop.f32.mrb[69].mxu0 }
0x1a5e   :  { %v4286_v43 = vpop.f32.mrb[70].mxu0 }
0x1a5f   :  { %v8030_v5 = vadd.f32 %v4284_v52, %v7953_v30  ;;  %v4287_v8 = vadd.f32 %v4286_v43, %v2697_v34  ;;  %v6597_v6 = vpop.f32.mrb[71].mxu0 }
0x1a61   :  { %v8033_v57 = vadd.f32 %v4287_v8, %v7956_v41  ;;  %v4339_v11 = vsel %vm525_vm0, %v8030_v5, 0.0 }
0x1a62   :  { %4340 = vadd.xlane.f32.xlu0 %v4339_v11 }
0x1a63   :  { %v4342_v50 = vsel %vm2767_vm6, %v8033_v57, 0.0 }
0x1a64   :  { %4343 = vadd.xlane.f32.xlu1 %v4342_v50 }
0x1aef   :  { %v4341_v54 = vpop.xlane.xlu0 %4340 }
0x1af0   :  { %v4345_v40 = vmul.f32 0.015625, %v4341_v54 }
0x1af1   :  { %v4344_v2 = vpop.xlane.xlu1 %4343 }
0x1af2   :  { %v4347_v39 = vsub.f32 %v8030_v5, %v4345_v40  ;;  %v4346_v30 = vmul.f32 0.015625, %v4344_v2 }
0x1af4   :  { %v4348_v12 = vsub.f32 %v8033_v57, %v4346_v30  ;;  %v4349_v33 = vmul.f32 %v4347_v39, %v4347_v39 }
0x1af6   :  { %v4351_v41 = vsel %vm525_vm0, %v4349_v33, 0.0  ;;  %v4350_v56 = vmul.f32 %v4348_v12, %v4348_v12 }
0x1af7   :  { %4352 = vadd.xlane.f32.xlu0 %v4351_v41 }
0x1af8   :  { %v4354_v20 = vsel %vm2767_vm6, %v4350_v56, 0.0 }
0x1af9   :  { %4355 = vadd.xlane.f32.xlu1 %v4354_v20 }
0x1b84   :  { %v4353_v27 = vpop.xlane.xlu0 %4352 }
0x1b85   :  { %v4357_v18 = vmul.f32 0.015625, %v4353_v27 }
0x1b86   :  { %v4356_v60 = vpop.xlane.xlu1 %4355 }
0x1b87   :  { %v4359_v59 = vadd.f32 1e-05, %v4357_v18  ;;  %v4358_v14 = vmul.f32 0.015625, %v4356_v60 }
0x1b89   :  { %6976 = vrsqrt.f32 %v4359_v59  ;;  %v4360_v61 = vadd.f32 1e-05, %v4358_v14 }
0x1b8b   :  { %6978 = vrsqrt.f32 %v4360_v61 }
0x1b93   :  { %v6977_v51 = vpop.eup %6976 }
0x1b94   :  { %v4363_v63 = vmul.f32 %v6977_v51, %v4347_v39 }
0x1b95   :  { %v6979_v31 = vpop.eup %6978 }
0x1b96   :  { %v4365_v44 = vmul.f32 %v4363_v63, %v4292_v53  ;;  %v4364_v0 = vmul.f32 %v6979_v31, %v4348_v12 }
0x1b98   :  { %v4366_v4 = vmul.f32 %v4364_v0, %v4292_v53  ;;  %v4367_v58 = vadd.f32 %v4365_v44, %v4293_v1 }
0x1b9a   :  { %v4368_v48 = vadd.f32 %v4366_v4, %v4293_v1 }
0x1b9c   :  { %v4369_v29 = vpack.c.bf16 %v4368_v48, %v4367_v58 }
0x1b9e   :  { %6099 = vmatmul.mubr.msk.bf16.vlgmr.msra.gmra.mrb[68].mxu1 %vm525_vm0, %v4369_v29 }
0x1b9f   :  { %6600 = vmatprep.mubr.msk.bf16.mxu1 %vm7012_vm1, %v7011_v15 }
0x1c71   :  { %v4447_v9 = vpop.f32.mrb[68].mxu1 }
0x1c72   :  { %v4449_v10 = vpop.f32.mrb[69].mxu1 }
0x1c73   :  { %v6100_v49 = vpack.c.bf16 %v4449_v10, %v4447_v9  ;;  %v4451_v24 = vpop.f32.mrb[70].mxu1 }
0x1c74   :  { %v4453_v32 = vpop.f32.mrb[71].mxu1 }
0x1c75   :  { %v4468_v19 = vrot.slane %v6100_v49, %v7640_v36  ;;  %v6101_v28 = vpack.c.bf16 %v4453_v32, %v4451_v24 }
0x1c77   :  { %v4476_v35 = vcombine.high %v4468_v19, %v4468_v19  ;;  %v4483_v16 = vrot.slane %v4468_v19, %v7640_v36  ;;  %v4475_v38 = vrot.slane %v6101_v28, %v7640_v36 }
0x1c79   :  { %v4497_v13 = vrot.slane %v4476_v35, %v7640_v36  ;;  %v4498_v34 = vcombine.high %v4483_v16, %v4483_v16  ;;  %v4490_v26 = vrot.slane %v4475_v38, %v7640_v36 }
0x1c7b   :  { %v4499_v52 = vcombine.high %v4497_v13, %v4497_v13  ;;  %v4504_v46 = vunpack.i.l.s16 %v4498_v34  ;;  %v4505_v43 = vunpack.i.h.s16 %v4498_v34  ;;  %v4513_v8 = vcombine.low %v4483_v16, %v4497_v13 }
0x1c7c   :  { %v4509_v54 = vunpack.i.h.s16 %v4490_v26 }
0x1c7d   :  { %v4520_v6 = vrot.slane %v4513_v8, %v7640_v36  ;;  %v4527_v11 = vrot.slane %v4504_v46, %v7640_v36  ;;  %v4507_v50 = vunpack.i.h.s16 %v4499_v52  ;;  %v6103_v2 = vpack.i.b16 %v4499_v52, %v4505_v43 }
0x1c7e   :  { %v4601_v20 = vrot.slane %v4509_v54, %v7640_v36 }
0x1c7f   :  { %v4684_v40 = vcombine.high %v4520_v6, %v4527_v11  ;;  %v6104_v39 = vpack.i.b16 %v4490_v26, %v4507_v50  ;;  %v4528_v30 = vcombine.low %v4520_v6, %v4527_v11 }
0x1c81   :  { %v4587_v12 = vcombine.low %v6103_v2, %v6104_v39  ;;  %v4535_v33 = vrot.slane %v4528_v30, %v7640_v36  ;;  %v8086_v41 = vrot.slane %v4684_v40, %v7640_v36 }
0x1c83   :  { %v4594_v56 = vrot.slane %v4587_v12, %v7640_v36  ;;  %4536 = vrot.lane.b32.xlu0 %v4535_v33, %s7014_s28  ;;  %v4696_v23 = vand.u32 %v8086_v41, %v7830_v37 }
0x1c85   :  { %v4738_v17 = vcombine.high %v4594_v56, %v4601_v20  ;;  %6611 = vmatpush3.bf16.msra.mxu0 %v4696_v23  ;;  %v4602_v3 = vcombine.low %v4594_v56, %v4601_v20 }
0x1c86   :  { %6622 = vmatprep.subr.bf16.mxu0 %v7011_v15 }
0x1c87   :  { %v4609_v55 = vrot.slane %v4602_v3, %v7640_v36  ;;  %v8104_v27 = vrot.slane %v4738_v17, %v7640_v36 }
0x1c89   :  { %4610 = vrot.lane.b32.xlu1 %v4609_v55, %s7014_s28  ;;  %v4750_v18 = vand.u32 %v8104_v27, %v7830_v37 }
0x1cf5   :  { %v4537_v7 = vpop.permute.xlu0 %4536 }
0x1cf6   :  { %v4542_v21 = vsel %vm1049_vm2, %v4537_v7, 0 }
0x1cf7   :  { %6599 = vmatpush3.bf16.xpose.msra.mxu1 %v4542_v21 }
0x1cf8   :  { %6604 = vmatprep.subr.bf16.mxu1 %v7011_v15 }
0x1cfb   :  { %v4611_v47 = vpop.permute.xlu1 %4610 }
0x1cfc   :  { %v4616_v25 = vsel %vm1049_vm2, %v4611_v47, 0 }
0x1cfe   :  { %6601 = vmatmul.mubr.msk.bf16.vlgmr.msra.gmra.mrb[72].mxu1 %vm1049_vm2, %v4535_v33 }
0x1cff   :  { %6605 = vmatpush3.bf16.xpose.msra.mxu1 %v4616_v25  ;;  %6606 = vmatprep.mubr.msk.bf16.mxu1 %vm7012_vm1, %v7011_v15 }
0x1d00   :  { %6616 = vmatprep.subr.bf16.mxu1 %v7011_v15 }
0x1d06   :  { %6607 = vmatmul.mubr.msk.bf16.vlgmr.msra.gmra.mrb[76].mxu1 %vm1049_vm2, %v4609_v55 }
0x1d07   :  { %6617 = vmatpush3.bf16.msra.mxu1 %v4750_v18  ;;  %6618 = vmatprep.mubr.msk.bf16.mxu1 %vm7012_vm1, %v7011_v15 }
0x1d08   :  { %6628 = vmatprep.subr.bf16.mxu1 %v7011_v15 }
0x1dd1   :  { %v4578_v60 = vpop.f32.mrb[72].mxu1 }
0x1dd2   :  { %v4658_v59 = vmul.f32 0.17677669, %v4578_v60  ;;  %v6602_v14 = vpop.f32.mrb[73].mxu1 }
0x1dd3   :  { %v4581_v61 = vpop.f32.mrb[74].mxu1 }
0x1dd4   :  { %v6603_v51 = vpop.f32.mrb[75].mxu1  ;;  %v4660_v53 = vsel %vm3498_vm4, %v4658_v59, -inf }
0x1dd5   :  { %4661 = vmax.xlane.f32.xlu1 %v4660_v53 }
0x1dd9   :  { %v4652_v63 = vpop.f32.mrb[76].mxu1 }
0x1dda   :  { %v4659_v31 = vmul.f32 0.17677669, %v4652_v63  ;;  %v6608_v44 = vpop.f32.mrb[77].mxu1 }
0x1ddb   :  { %v4655_v0 = vpop.f32.mrb[78].mxu1 }
0x1ddc   :  { %v6609_v1 = vpop.f32.mrb[79].mxu1  ;;  %v4663_v4 = vsel %vm3498_vm4, %v4659_v31, -inf }
0x1ddd   :  { %4664 = vmax.xlane.f32.xlu0 %v4663_v4 }
0x1de6   :  { %4844 = vrot.lane.b32.xlu1 %v4609_v55, %s7018_s22 }
0x1e62   :  { %v4662_v58 = vpop.xlane.xlu1 %4661 }
0x1e63   :  { %v4666_v48 = vsub.f32 %v4658_v59, %v4662_v58 }
0x1e65   :  { %v4668_v29 = vmul.f32 1.442695, %v4666_v48 }
0x1e66   :  { %v4845_v16 = vpop.permute.xlu1 %4844 }
0x1e67   :  { %6980 = vpow2.f32 %v4668_v29  ;;  %v4850_v50 = vsel %vm1049_vm2, %v4845_v16, 0 }
0x1e6a   :  { %v4665_v9 = vpop.xlane.xlu0 %4664 }
0x1e6b   :  { %v4667_v10 = vsub.f32 %v4659_v31, %v4665_v9 }
0x1e6d   :  { %v4670_v49 = vmul.f32 1.442695, %v4667_v10 }
0x1e6f   :  { %6982 = vpow2.f32 %v4670_v49 }
0x1e71   :  { %v6981_v24 = vpop.eup %6980 }
0x1e72   :  { %v4672_v32 = vsel %vm3498_vm4, %v6981_v24, 0.0 }
0x1e73   :  { %4673 = vadd.xlane.f32.xlu0 %v4672_v32 }
0x1e79   :  { %v6983_v19 = vpop.eup %6982 }
0x1e7a   :  { %v4675_v28 = vsel %vm3498_vm4, %v6983_v19, 0.0 }
0x1e7b   :  { %4676 = vadd.xlane.f32.xlu1 %v4675_v28 }
0x1e89   :  { %4794 = vrot.lane.b32.xlu0 %v4535_v33, %s7018_s22 }
0x1e8c   :  { %4792 = vrot.lane.b32.xlu1 %v4535_v33, %s7013_s0 }
0x1e90   :  { %4842 = vrot.lane.b32.xlu1 %v4609_v55, %s7013_s0 }
0x1f00   :  { %v4674_v35 = vpop.xlane.xlu0 %4673 }
0x1f01   :  { %6984 = vrcp.f32 %v4674_v35 }
0x1f04   :  { %v4795_v26 = vpop.permute.xlu0 %4794 }
0x1f05   :  { %v4800_v46 = vsel %vm1049_vm2, %v4795_v26, 0 }
0x1f08   :  { %v4677_v38 = vpop.xlane.xlu1 %4676 }
0x1f09   :  { %6986 = vrcp.f32 %v4677_v38 }
0x1f0b   :  { %v6985_v13 = vpop.eup %6984 }
0x1f0c   :  { %v4680_v34 = vmul.f32 %v6985_v13, %v6981_v24  ;;  %v4793_v11 = vpop.permute.xlu1 %4792 }
0x1f0e   :  { %v4682_v52 = vpack.c.bf16 %v4680_v34, %v4680_v34  ;;  %v6825_v34 = vld [vmem:[%s8430_s2 + $0x3f0] ss:$8 sps:$4 sm:$0xff]  }
0x1f10   :  { %6613 = vmatmul.mubr.msk.bf16.vlgmr.msra.gmra.mrb[72].mxu0 %vm3531_vm8, %v4682_v52  ;;  %v4843_v54 = vpop.permute.xlu1 %4842 }
0x1f11   :  { %6623 = vmatpush3.bf16.xpose.msra.mxu0 %v4800_v46  ;;  %6624 = vmatprep.mubr.msk.bf16.mxu0 %vm7012_vm1, %v7011_v15  ;;  %v6826_v46 = vld [vmem:[%s8430_s2 + $0x400] ss:$8 sps:$4 sm:$0xff]  }
0x1f12   :  { %6634 = vmatprep.subr.bf16.mxu0 %v7011_v15 }
0x1f13   :  { %v6987_v43 = vpop.eup %6986 }
0x1f14   :  { %v4681_v8 = vmul.f32 %v6987_v43, %v6983_v19 }
0x1f16   :  { %v4683_v6 = vpack.c.bf16 %v4681_v8, %v4681_v8 }
0x1f18   :  { %6619 = vmatmul.mubr.msk.bf16.vlgmr.msra.gmra.mrb[80].mxu1 %vm3531_vm8, %v4683_v6  ;;  %6625 = vmatmul.mubr.msk.bf16.vlgmr.msra.gmra.mrb[76].mxu0 %vm1049_vm2, %v4793_v11  ;;  %v6827_v6 = vld [vmem:[%s8430_s2 + $0x410] ss:$8 sps:$4 sm:$0xff]  }
0x1f19   :  { %6629 = vmatpush3.bf16.xpose.msra.mxu1 %v4850_v50  ;;  %6630 = vmatprep.mubr.msk.bf16.mxu1 %vm7012_vm1, %v7011_v15 }
0x1f1a   :  { %6640 = vmatprep.subr.bf16.mxu1 %v7011_v15  ;;  %6636 = vmatprep.mubr.msk.bf16.mxu0 %vm7012_vm1, %v7011_v15 }
0x1f20   :  { %6631 = vmatmul.mubr.msk.bf16.vlgmr.msra.gmra.mrb[84].mxu1 %vm1049_vm2, %v4843_v54 }
0x1f21   :  { %6642 = vmatprep.mubr.msk.bf16.mxu1 %vm7012_vm1, %v7011_v15 }
0x1fe3   :  { %v8136_v40 = vpop.f32.mrb[72].mxu0 }
0x1fe4   :  { %v6614_v2 = vpop.f32.mrb[73].mxu0 }
0x1fe5   :  { %v4735_v39 = vpop.f32.mrb[74].mxu0 }
0x1fe6   :  { %v6615_v30 = vpop.f32.mrb[75].mxu0 }
0x1feb   :  { %v8138_v12 = vpop.f32.mrb[80].mxu1  ;;  %v4836_v33 = vpop.f32.mrb[76].mxu0 }
0x1fec   :  { %v4892_v56 = vmul.f32 0.17677669, %v4836_v33  ;;  %v6620_v20 = vpop.f32.mrb[81].mxu1  ;;  %v6626_v23 = vpop.f32.mrb[77].mxu0 }
0x1fed   :  { %v4789_v17 = vpop.f32.mrb[82].mxu1  ;;  %v4839_v3 = vpop.f32.mrb[78].mxu0 }
0x1fee   :  { %v6621_v55 = vpop.f32.mrb[83].mxu1  ;;  %v6627_v7 = vpop.f32.mrb[79].mxu0  ;;  %v4894_v21 = vsel %vm3498_vm4, %v4892_v56, -inf }
0x1fef   :  { %4895 = vmax.xlane.f32.xlu0 %v4894_v21 }
0x1ff3   :  { %v4886_v47 = vpop.f32.mrb[84].mxu1 }
0x1ff4   :  { %v4893_v25 = vmul.f32 0.17677669, %v4886_v47  ;;  %v6632_v18 = vpop.f32.mrb[85].mxu1 }
0x1ff5   :  { %v4889_v60 = vpop.f32.mrb[86].mxu1 }
0x1ff6   :  { %v6633_v59 = vpop.f32.mrb[87].mxu1  ;;  %v4897_v14 = vsel %vm3498_vm4, %v4893_v25, -inf }
0x1ff7   :  { %4898 = vmax.xlane.f32.xlu1 %v4897_v14 }
0x2008   :  { %4966 = vrot.lane.b32.xlu1 %v8104_v27, %s7013_s0 }
0x207c   :  { %v4896_v61 = vpop.xlane.xlu0 %4895 }
0x207d   :  { %v4900_v51 = vsub.f32 %v4892_v56, %v4896_v61 }
0x207f   :  { %v4902_v53 = vmul.f32 1.442695, %v4900_v51 }
0x2081   :  { %6988 = vpow2.f32 %v4902_v53 }
0x2084   :  { %v4899_v63 = vpop.xlane.xlu1 %4898 }
0x2085   :  { %v4901_v31 = vsub.f32 %v4893_v25, %v4899_v63 }
0x2087   :  { %v4904_v44 = vmul.f32 1.442695, %v4901_v31 }
0x2088   :  { %v4967_v0 = vpop.permute.xlu1 %4966 }
0x2089   :  { %6990 = vpow2.f32 %v4904_v44  ;;  %v4972_v1 = vand.u32 %v4967_v0, %v7830_v37 }
0x208b   :  { %v6989_v4 = vpop.eup %6988  ;;  %6641 = vmatpush3.bf16.msra.mxu1 %v4972_v1 }
0x208c   :  { %v4906_v58 = vsel %vm3498_vm4, %v6989_v4, 0.0  ;;  %6658 = vmatprep.subr.bf16.mxu1 %v7011_v15 }
0x208d   :  { %4907 = vadd.xlane.f32.xlu0 %v4906_v58 }
0x2093   :  { %v6991_v48 = vpop.eup %6990 }
0x2094   :  { %v4909_v27 = vsel %vm3498_vm4, %v6991_v48, 0.0 }
0x2095   :  { %4910 = vadd.xlane.f32.xlu0 %v4909_v27 }
0x20ab   :  { %4918 = vrot.lane.b32.xlu0 %v8086_v41, %s7013_s0 }
0x211a   :  { %v4908_v29 = vpop.xlane.xlu0 %4907 }
0x211b   :  { %6992 = vrcp.f32 %v4908_v29 }
0x2122   :  { %v4911_v9 = vpop.xlane.xlu0 %4910 }
0x2123   :  { %6994 = vrcp.f32 %v4911_v9 }
0x2125   :  { %v6993_v10 = vpop.eup %6992 }
0x2126   :  { %v4914_v49 = vmul.f32 %v6993_v10, %v6989_v4  ;;  %v4919_v24 = vpop.permute.xlu0 %4918 }
0x2127   :  { %v4924_v32 = vand.u32 %v4919_v24, %v7830_v37  ;;  %v6824_v37 = vld [vmem:[%s8430_s2 + $0x3e0] ss:$8 sps:$4 sm:$0xff]  }
0x2128   :  { %v4916_v19 = vpack.c.bf16 %v4914_v49, %v4914_v49  ;;  %v4310_v49 = vld [vmem:[%s8431_s1 + $0x190] ss:$0 sm:$0xff] }
0x2129   :  { %6635 = vmatpush3.bf16.msra.mxu0 %v4924_v32 }
0x212a   :  { %6646 = vmatprep.subr.bf16.mxu0 %v7011_v15 }
0x212c   :  { %6637 = vmatmul.mubr.msk.bf16.vlgmr.msra.gmra.mrb[80].mxu0 %vm3531_vm8, %v4916_v19 }
0x212d   :  { %v6995_v28 = vpop.eup %6994  ;;  %6654 = vmatprep.mubr.msk.bf16.mxu0 %vm7012_vm1, %v7011_v15  ;;  %6647 = vmatpush3.bf16.msra.mxu0 %v6824_v37 }
0x212e   :  { %v4915_v41 = vmul.f32 %v6995_v28, %v6991_v48  ;;  %6648 = vmatprep.subr.bf16.mxu0 %v7011_v15 }
0x2130   :  { %v4917_v35 = vpack.c.bf16 %v4915_v41, %v4915_v41 }
0x2131   :  { %6649 = vmatpush3.bf16.msra.mxu0 %v6825_v34 }
0x2132   :  { %6643 = vmatmul.mubr.msk.bf16.vlgmr.msra.gmra.mrb[88].mxu1 %vm3531_vm8, %v4917_v35  ;;  %6650 = vmatprep.subr.bf16.mxu0 %v7011_v15 }
0x2133   :  { %6666 = vmatprep.mubr.msk.bf16.mxu1 %vm7012_vm1, %v7011_v15 }
0x2135   :  { %6651 = vmatpush3.bf16.msra.mxu0 %v6826_v46 }
0x2136   :  { %6652 = vmatprep.subr.bf16.mxu0 %v7011_v15 }
0x2139   :  { %6653 = vmatpush3.bf16.msra.mxu0 %v6827_v6 }
0x213a   :  { %6670 = vmatprep.subr.bf16.mxu0 %v7011_v15 }
0x21ff   :  { %v4960_v16 = vpop.f32.mrb[80].mxu0 }
0x2200   :  { %5016 = vrot.lane.b32.xlu1 %v4960_v16, %s7018_s22  ;;  %v6638_v38 = vpop.f32.mrb[81].mxu0 }
0x2201   :  { %v4963_v13 = vpop.f32.mrb[82].mxu0 }
0x2202   :  { %v6639_v26 = vpop.f32.mrb[83].mxu0 }
0x2205   :  { %v5008_v52 = vpop.f32.mrb[88].mxu1 }
0x2206   :  { %5018 = vrot.lane.b32.xlu1 %v5008_v52, %s7018_s22  ;;  %v6644_v43 = vpop.f32.mrb[89].mxu1 }
0x2207   :  { %v5011_v8 = vpop.f32.mrb[90].mxu1 }
0x2208   :  { %v6645_v11 = vpop.f32.mrb[91].mxu1 }
0x2272   :  { %v5017_v50 = vpop.permute.xlu1 %5016 }
0x2273   :  { %v5022_v54 = vsel %vm1049_vm2, %v8136_v40, %v5017_v50  ;;  %v6828_v50 = vld [vmem:[%s8430_s2 + $0x420] ss:$8 sps:$4 sm:$0xff]  }
0x2274   :  { %v5033_v2 = vrot.slane %v5022_v54, %v7640_v36  ;;  %v5026_v39 = vcombine.high %v5022_v54, %v5022_v54  ;;  %6659 = vmatpush3.bf16.msra.mxu1 %v6828_v50  ;;  %v6829_v54 = vld [vmem:[%s8430_s2 + $0x430] ss:$8 sps:$4 sm:$0xff]   ;;  %v6843_v50 = vld [vmem:[%s8430_s2 + $0x4e0] ss:$8 sps:$4 sm:$0xff]  }
0x2275   :  { %6660 = vmatprep.subr.bf16.mxu1 %v7011_v15 }
0x2276   :  { %v5041_v30 = vcombine.high %v5033_v2, %v5033_v2  ;;  %v5040_v20 = vrot.slane %v5026_v39, %v7640_v36  ;;  %v5048_v23 = vrot.slane %v5033_v2, %v7640_v36  ;;  %v6830_v2 = vld [vmem:[%s8430_s2 + $0x440] ss:$8 sps:$4 sm:$0xff]   ;;  %v6831_v39 = vld [vmem:[%s8430_s2 + $0x450] ss:$8 sps:$4 sm:$0xff]  }
0x2278   :  { %v5062_v33 = vrot.slane %v5041_v30, %v7640_v36  ;;  %v5019_v56 = vpop.permute.xlu1 %5018  ;;  %v5055_v25 = vrot.slane %v5040_v20, %v7640_v36  ;;  %6661 = vmatpush3.bf16.msra.mxu1 %v6829_v54  ;;  %v6846_v54 = vld [vmem:[%s8430_s2 + $0x574] ss:$8 sps:$4 sm:$0xff]  }
0x2279   :  { %v5023_v17 = vsel %vm1049_vm2, %v8138_v12, %v5019_v56  ;;  %6662 = vmatprep.subr.bf16.mxu1 %v7011_v15 }
0x227a   :  { %v5065_v3 = vcombine.high %v5023_v17, %v5023_v17  ;;  %v5072_v55 = vrot.slane %v5023_v17, %v7640_v36  ;;  %v5104_v7 = vcombine.low %v5048_v23, %v5062_v33  ;;  %v6112_v21 = vcombine.high %v5048_v23, %v5062_v33 }
0x227c   :  { %v5079_v40 = vrot.slane %v5065_v3, %v7640_v36  ;;  %v5080_v47 = vcombine.high %v5072_v55, %v5072_v55  ;;  %v5087_v18 = vrot.slane %v5072_v55, %v7640_v36  ;;  %v5114_v59 = vrot.slane %v5104_v7, %v7640_v36  ;;  %6663 = vmatpush3.bf16.msra.mxu1 %v6830_v2  ;;  %v4311_v7 = vld [vmem:[%s8431_s1 + $0x1a0] ss:$0 sm:$0xff]  ;;  %v6844_v2 = vld [vmem:[%s8430_s2 + $0x570] ss:$8 sps:$4 sm:$0xff]  }
0x227d   :  { %v5121_v14 = vrot.slane %v6112_v21, %v7640_v36  ;;  %6664 = vmatprep.subr.bf16.mxu1 %v7011_v15 }
0x227e   :  { %v5101_v60 = vrot.slane %v5080_v47, %v7640_v36  ;;  %v5102_v61 = vcombine.high %v5087_v18, %v5087_v18  ;;  %v5106_v12 = vcombine.low %v5055_v25, %v5087_v18  ;;  %v5094_v51 = vrot.slane %v5079_v40, %v7640_v36  ;;  %v4312_v25 = vld [vmem:[%s8431_s1 + $0x1b0] ss:$0 sm:$0xff] }
0x227f   :  { %v5136_v44 = vcombine.low %v5114_v59, %v5121_v14 }
0x2280   :  { %v5103_v53 = vcombine.high %v5101_v60, %v5101_v60  ;;  %v5107_v63 = vcombine.low %v5101_v60, %v5102_v61  ;;  %v5128_v0 = vrot.slane %v5106_v12, %v7640_v36  ;;  %6665 = vmatpush3.bf16.msra.mxu1 %v6831_v39  ;;  %v6832_v61 = vld [vmem:[%s8430_s2 + $0x460] ss:$8 sps:$4 sm:$0xff]   ;;  %v6833_v12 = vld [vmem:[%s8430_s2 + $0x470] ss:$8 sps:$4 sm:$0xff]  }
0x2281   :  { %v5144_v48 = vrot.slane %v5136_v44, %v7640_v36  ;;  %6690 = vmatprep.subr.bf16.mxu1 %v7011_v15  ;;  %v6838_v44 = vld [vmem:[%s8430_s2 + $0x4c0] ss:$8 sps:$4 sm:$0xff]   ;;  %v6847_v39 = vld [vmem:[%s8430_s2 + $0x4f0] ss:$8 sps:$4 sm:$0xff]  }
0x2282   :  { %v5153_v31 = vcombine.low %v5103_v53, %v5094_v51  ;;  %v5135_v1 = vrot.slane %v5107_v63, %v7640_v36  ;;  %v6834_v51 = vld [vmem:[%s8430_s2 + $0x480] ss:$8 sps:$4 sm:$0xff]   ;;  %v6835_v53 = vld [vmem:[%s8430_s2 + $0x490] ss:$8 sps:$4 sm:$0xff]  }
0x2283   :  { %v6836_v63 = vld [vmem:[%s8430_s2 + $0x4a0] ss:$8 sps:$4 sm:$0xff]  }
0x2284   :  { %v5137_v4 = vcombine.low %v5128_v0, %v5135_v1  ;;  %v5160_v58 = vrot.slane %v5153_v31, %v7640_v36  ;;  %v6837_v31 = vld [vmem:[%s8430_s2 + $0x4b0] ss:$8 sps:$4 sm:$0xff]   ;;  %v4321_v1 = vld [vmem:[%s8431_s1 + $0x1c0] ss:$0 sm:$0xff] }
0x2285   :  { %v6839_v0 = vld [vmem:[%s8430_s2 + $0x4d0] ss:$8 sps:$4 sm:$0xff]  }
0x2286   :  { %v5151_v27 = vrot.slane %v5137_v4, %v7640_v36  ;;  %v5167_v29 = vrot.slane %v5160_v58, %v7640_v36 }
0x2288   :  { %v5152_v9 = vcombine.low %v5144_v48, %v5151_v27 }
0x228a   :  { %v5170_v10 = vpack.c.bf16 %v5167_v29, %v5152_v9 }
0x228c   :  { %6655 = vmatmul.mubr.msk.bf16.vlgmr.msra.gmra.mrb[84].mxu0 %vm525_vm0, %v5170_v10 }
0x228d   :  { %6686 = vmatprep.mubr.msk.bf16.mxu0 %vm7012_vm1, %v7011_v15  ;;  %6671 = vmatpush3.bf16.msra.mxu0 %v6832_v61 }
0x228e   :  { %6672 = vmatprep.subr.bf16.mxu0 %v7011_v15 }
0x2291   :  { %6673 = vmatpush3.bf16.msra.mxu0 %v6833_v12 }
0x2292   :  { %6674 = vmatprep.subr.bf16.mxu0 %v7011_v15 }
0x2295   :  { %6675 = vmatpush3.bf16.msra.mxu0 %v6834_v51 }
0x2296   :  { %6676 = vmatprep.subr.bf16.mxu0 %v7011_v15 }
0x2299   :  { %6677 = vmatpush3.bf16.msra.mxu0 %v6835_v53 }
0x229a   :  { %6678 = vmatprep.subr.bf16.mxu0 %v7011_v15 }
0x229d   :  { %6679 = vmatpush3.bf16.msra.mxu0 %v6836_v63 }
0x229e   :  { %6680 = vmatprep.subr.bf16.mxu0 %v7011_v15 }
0x22a1   :  { %6681 = vmatpush3.bf16.msra.mxu0 %v6837_v31 }
0x22a2   :  { %6682 = vmatprep.subr.bf16.mxu0 %v7011_v15 }
0x22a5   :  { %6683 = vmatpush3.bf16.msra.mxu0 %v6838_v44 }
0x22a6   :  { %6684 = vmatprep.subr.bf16.mxu0 %v7011_v15 }
0x22a9   :  { %6685 = vmatpush3.bf16.msra.mxu0 %v6839_v0 }
0x235f   :  { %v5232_v24 = vpop.f32.mrb[84].mxu0 }
0x2360   :  { %v5233_v32 = vadd.f32 %v5232_v24, %v4310_v49  ;;  %v6656_v19 = vpop.f32.mrb[85].mxu0 }
0x2361   :  { %v5235_v28 = vpop.f32.mrb[86].mxu0 }
0x2362   :  { %v8205_v41 = vadd.f32 %v5233_v32, %v8030_v5  ;;  %v5236_v35 = vadd.f32 %v5235_v28, %v4310_v49  ;;  %v6657_v37 = vpop.f32.mrb[87].mxu0 }
0x2364   :  { %v5240_v16 = vadd.f32 %v5236_v35, %v8033_v57  ;;  %v5241_v38 = vsel %vm525_vm0, %v8205_v41, 0.0 }
0x2365   :  { %5242 = vadd.xlane.f32.xlu0 %v5241_v38 }
0x2366   :  { %v5244_v13 = vsel %vm2767_vm6, %v5240_v16, 0.0 }
0x2367   :  { %5245 = vadd.xlane.f32.xlu1 %v5244_v13 }
0x23f2   :  { %v5243_v34 = vpop.xlane.xlu0 %5242 }
0x23f3   :  { %v5247_v26 = vmul.f32 0.015625, %v5243_v34 }
0x23f4   :  { %v5246_v52 = vpop.xlane.xlu1 %5245 }
0x23f5   :  { %v5249_v46 = vsub.f32 %v8205_v41, %v5247_v26  ;;  %v5248_v43 = vmul.f32 0.015625, %v5246_v52 }
0x23f7   :  { %v5250_v8 = vsub.f32 %v5240_v16, %v5248_v43  ;;  %v5251_v5 = vmul.f32 %v5249_v46, %v5249_v46 }
0x23f9   :  { %v5253_v6 = vsel %vm525_vm0, %v5251_v5, 0.0  ;;  %v5252_v11 = vmul.f32 %v5250_v8, %v5250_v8 }
0x23fa   :  { %5254 = vadd.xlane.f32.xlu0 %v5253_v6 }
0x23fb   :  { %v5256_v57 = vsel %vm2767_vm6, %v5252_v11, 0.0  ;;  %v6842_v11 = vld [vmem:[%s8430_s2 + $0x564] ss:$8 sps:$4 sm:$0xff]  }
0x23fc   :  { %5706 = vmatprep.subr.bf16.mxu0 %v6842_v11  ;;  %v6865_v11 = vld [vmem:[%s8430_s2 + $0x630] ss:$8 sps:$4 sm:$0xff]  }
0x23fe   :  { %5257 = vadd.xlane.f32.xlu0 %v5256_v57  ;;  %v6840_v57 = vld [vmem:[%s8430_s2 + $0x560] ss:$8 sps:$4 sm:$0xff]  }
0x2487   :  { %v5255_v30 = vpop.xlane.xlu0 %5254 }
0x2488   :  { %v5259_v33 = vmul.f32 0.015625, %v5255_v30  ;;  %v6850_v30 = vld [vmem:[%s8430_s2 + $0x584] ss:$8 sps:$4 sm:$0xff]  }
0x248a   :  { %v5261_v56 = vadd.f32 1e-05, %v5259_v33  ;;  %v6848_v33 = vld [vmem:[%s8430_s2 + $0x580] ss:$8 sps:$4 sm:$0xff]  }
0x248b   :  { %v5258_v20 = vpop.xlane.xlu0 %5257 }
0x248c   :  { %6996 = vrsqrt.f32 %v5261_v56  ;;  %v5260_v23 = vmul.f32 0.015625, %v5258_v20  ;;  %v6851_v56 = vld [vmem:[%s8430_s2 + $0x500] ss:$8 sps:$4 sm:$0xff]   ;;  %v6854_v20 = vld [vmem:[%s8430_s2 + $0x594] ss:$8 sps:$4 sm:$0xff]  }
0x248e   :  { %v5262_v17 = vadd.f32 1e-05, %v5260_v23  ;;  %v6852_v23 = vld [vmem:[%s8430_s2 + $0x590] ss:$8 sps:$4 sm:$0xff]  }
0x2490   :  { %6998 = vrsqrt.f32 %v5262_v17  ;;  %v6855_v17 = vld [vmem:[%s8430_s2 + $0x510] ss:$8 sps:$4 sm:$0xff]  }
0x2496   :  { %v6997_v3 = vpop.eup %6996 }
0x2497   :  { %v5265_v55 = vmul.f32 %v6997_v3, %v5249_v46  ;;  %v4338_v3 = vld [vmem:[%s8431_s1 + $0x1d0] ss:$0 sm:$0xff] }
0x2499   :  { %v5267_v40 = vmul.f32 %v5265_v55, %v4311_v7 }
0x249a   :  { %v6999_v21 = vpop.eup %6998 }
0x249b   :  { %v5266_v47 = vmul.f32 %v6999_v21, %v5250_v8  ;;  %v5269_v60 = vadd.f32 %v5267_v40, %v4312_v25 }
0x249d   :  { %v5268_v18 = vmul.f32 %v5266_v47, %v4311_v7 }
0x249f   :  { %v5270_v59 = vadd.f32 %v5268_v18, %v4312_v25 }
0x24a1   :  { %v5271_v14 = vpack.c.bf16 %v5270_v59, %v5269_v60 }
0x24a3   :  { %6667 = vmatmul.mubr.msk.bf16.vlgmr.msra.gmra.mrb[92].mxu1 %vm525_vm0, %v5271_v14 }
0x24a4   :  { %6698 = vmatprep.mubr.msk.bf16.mxu1 %vm7012_vm1, %v7011_v15  ;;  %6691 = vmatpush3.bf16.msra.mxu1 %v6843_v50  ;;  %v6867_v50 = vld [vmem:[%s8430_s2 + $0x650] ss:$8 sps:$4 sm:$0xff]  }
0x24a5   :  { %6692 = vmatprep.subr.bf16.mxu1 %v7011_v15 }
0x24a8   :  { %6693 = vmatpush3.bf16.msra.mxu1 %v6847_v39 }
0x24a9   :  { %6694 = vmatprep.subr.bf16.mxu1 %v7011_v15 }
0x24ac   :  { %6695 = vmatpush3.bf16.msra.mxu1 %v6851_v56  ;;  %v6871_v56 = vld [vmem:[%s8430_s2 + $0x690] ss:$8 sps:$4 sm:$0xff]  }
0x24ad   :  { %6696 = vmatprep.subr.bf16.mxu1 %v7011_v15 }
0x24b0   :  { %6697 = vmatpush3.bf16.msra.mxu1 %v6855_v17  ;;  %v6875_v17 = vld [vmem:[%s8430_s2 + $0x5d0] ss:$8 sps:$4 sm:$0xff]  }
0x24b1   :  { %6702 = vmatprep.subr.bf16.mxu1 %v7011_v15 }
0x2576   :  { %v5333_v4 = vpop.f32.mrb[92].mxu1 }
0x2577   :  { %v5334_v58 = vadd.f32 %v5333_v4, %v4321_v1  ;;  %v6668_v48 = vpop.f32.mrb[93].mxu1  ;;  %v6858_v4 = vld [vmem:[%s8430_s2 + $0x540] ss:$8 sps:$4 sm:$0xff]  }
0x2578   :  { %v5336_v27 = vpop.f32.mrb[94].mxu1  ;;  %v6872_v48 = vld [vmem:[%s8430_s2 + $0x5a0] ss:$8 sps:$4 sm:$0xff]  }
0x2579   :  { %v5342_v29 = vmul.f32 0.044715, %v5334_v58  ;;  %v5337_v9 = vadd.f32 %v5336_v27, %v4321_v1  ;;  %v6669_v10 = vpop.f32.mrb[95].mxu1  ;;  %v5340_v52 = vmul.f32 0.5, %v5334_v58  ;;  %v6873_v27 = vld [vmem:[%s8430_s2 + $0x5b0] ss:$8 sps:$4 sm:$0xff]  }
0x257b   :  { %v5344_v49 = vmul.f32 %v5342_v29, %v5334_v58  ;;  %v5343_v24 = vmul.f32 0.044715, %v5337_v9  ;;  %v5341_v46 = vmul.f32 0.5, %v5337_v9  ;;  %v6141_v29 = vld [vmem:[%s8431_s1 + $0x200] ss:$8 sm:$0x3] }
0x257c   :  { %v5663_v10 = vrot.slane %v6141_v29, %v7164_v45  ;;  %v6861_v45 = vld [vmem:[%s8430_s2 + $0x5f0] ss:$8 sps:$4 sm:$0xff]   ;;  %v5659_v39 = vrot.slane %v6141_v29, %v7161_v42 }
0x257d   :  { %v5346_v32 = vmul.f32 %v5344_v49, %v5334_v58  ;;  %v5345_v19 = vmul.f32 %v5343_v24, %v5337_v9 }
0x257f   :  { %v5348_v28 = vadd.f32 %v5346_v32, %v5334_v58  ;;  %v5347_v35 = vmul.f32 %v5345_v19, %v5337_v9  ;;  %v6859_v58 = vld [vmem:[%s8430_s2 + $0x550] ss:$8 sps:$4 sm:$0xff]  }
0x2581   :  { %v5350_v37 = vmul.f32 0.7978846, %v5348_v28  ;;  %v5349_v16 = vadd.f32 %v5347_v35, %v5337_v9  ;;  %v5491_v9 = vld [vmem:[%s8431_s1 + $0x1e0] ss:$0 sm:$0xff] }
0x2583   :  { %7000 = vtanh.f32 %v5350_v37  ;;  %v5351_v38 = vmul.f32 0.7978846, %v5349_v16 }
0x2585   :  { %7002 = vtanh.f32 %v5351_v38 }
0x258d   :  { %v7001_v13 = vpop.eup %7000 }
0x258e   :  { %v5354_v34 = vadd.f32 1.0, %v7001_v13 }
0x258f   :  { %v7003_v26 = vpop.eup %7002 }
0x2590   :  { %v5355_v43 = vadd.f32 1.0, %v7003_v26  ;;  %v5356_v8 = vmul.f32 %v5354_v34, %v5340_v52  ;;  %v6860_v52 = vld [vmem:[%s8430_s2 + $0x5e0] ss:$8 sps:$4 sm:$0xff]  }
0x2592   :  { %v5357_v5 = vmul.f32 %v5355_v43, %v5341_v46 }
0x2594   :  { %v5358_v6 = vpack.c.bf16 %v5357_v5, %v5356_v8  ;;  %v6862_v8 = vld [vmem:[%s8430_s2 + $0x600] ss:$8 sps:$4 sm:$0xff]   ;;  %v6863_v5 = vld [vmem:[%s8430_s2 + $0x610] ss:$8 sps:$4 sm:$0xff]  }
0x2596   :  { %6687 = vmatmul.mubr.bf16.vlgmr.msra.gmra.mrb[88].mxu0 %v5358_v6  ;;  %v6864_v6 = vld [vmem:[%s8430_s2 + $0x620] ss:$8 sps:$4 sm:$0xff]  }
0x2597   :  { %5738 = vmatprep.mubr.bf16.mxu0 %v7016_v62  ;;  %5707 = vmatpush1.bf16.msra.mxu0 %v6840_v57  ;;  %v6866_v57 = vld [vmem:[%s8430_s2 + $0x640] ss:$8 sps:$4 sm:$0xff]  }
0x2598   :  { %5708 = vmatprep.subr.bf16.mxu0 %v6846_v54  ;;  %v6868_v54 = vld [vmem:[%s8430_s2 + $0x660] ss:$8 sps:$4 sm:$0xff]  }
0x259b   :  { %5709 = vmatpush1.bf16.msra.mxu0 %v6844_v2  ;;  %v6869_v2 = vld [vmem:[%s8430_s2 + $0x670] ss:$8 sps:$4 sm:$0xff]  }
0x259c   :  { %5710 = vmatprep.subr.bf16.mxu0 %v6850_v30  ;;  %v6870_v30 = vld [vmem:[%s8430_s2 + $0x680] ss:$8 sps:$4 sm:$0xff]  }
0x259f   :  { %5711 = vmatpush1.bf16.msra.mxu0 %v6848_v33 }
0x25a0   :  { %5712 = vmatprep.subr.bf16.mxu0 %v6854_v20 }
0x25a3   :  { %5713 = vmatpush1.bf16.msra.mxu0 %v6852_v23  ;;  %v6874_v23 = vld [vmem:[%s8430_s2 + $0x5c0] ss:$8 sps:$4 sm:$0xff]  }
0x25a4   :  { %6714 = vmatprep.subr.bf16.mxu0 %v7011_v15 }
0x2669   :  { %v5441_v55 = vpop.f32.mrb[88].mxu0 }
0x266a   :  { %v5442_v7 = vadd.f32 %v5441_v55, %v4338_v3  ;;  %v6688_v21 = vpop.f32.mrb[89].mxu0  ;;  %v5576_v3 = vld [vmem:[%s8431_s1 + $0x1f0] ss:$0 sm:$0xff] }
0x266b   :  { %v5444_v40 = vpop.f32.mrb[90].mxu0 }
0x266c   :  { %v5447_v47 = vadd.f32 %v5442_v7, %v8205_v41  ;;  %v6689_v25 = vpop.f32.mrb[91].mxu0  ;;  %v6856_v41 = vld [vmem:[%s8430_s2 + $0x520] ss:$8 sps:$4 sm:$0xff]  }
0x266e   :  { %v5449_v18 = vcombine.high %v5447_v47, %v5447_v47  ;;  %v5456_v60 = vrot.slane %v5447_v47, %v7640_v36 }
0x2670   :  { %v5463_v59 = vrot.slane %v5449_v18, %v7640_v36  ;;  %v5471_v61 = vrot.slane %v5456_v60, %v7640_v36 }
0x2672   :  { %v5464_v14 = vcombine.high %v5463_v59, %v5463_v59  ;;  %v5481_v51 = vpack.c.bf16 %v5471_v61, %v5471_v61  ;;  %v5966_v61 = vld [vmem:[%s8431_s1 + $0x210] ss:$0 sm:$0xff] }
0x2674   :  { %v5478_v12 = vrot.slane %v5464_v14, %v7640_v36  ;;  %v5494_v31 = vunpack.c.l.b16 %v5481_v51  ;;  %v6857_v36 = vld [vmem:[%s8430_s2 + $0x530] ss:$8 sps:$4 sm:$0xff]  }
0x2676   :  { %v5482_v53 = vpack.c.bf16 %v5478_v12, %v5478_v12 }
0x2678   :  { %v5495_v63 = vunpack.c.l.b16 %v5482_v53 }
0x267a   :  { %v5496_v44 = vrot.slane %v5495_v63, 7 }
0x267c   :  { %v5497_v0 = vsel %vm2452_vm7, %v5496_v44, %v5494_v31 }
0x267d   :  { %v5498_v1 = vpack.c.b16 %v5497_v0, %v5497_v0 }
0x267f   :  { %6699 = vmatmul.mubr.msk.bf16.vlgmr.msra.gmra.mrb[96].mxu1 %vm525_vm0, %v5498_v1  ;;  %6150 = vmatmul.mubr.msk.bf16.vlgmr.msra.gmra.mrb[92].mxu0 %vm525_vm0, %v5498_v1  ;;  %v5969_v1 = vand.u32 127, %v74_v22 }
0x2680   :  { %6703 = vmatpush3.bf16.msra.mxu1 %v6856_v41  ;;  %6710 = vmatprep.mubr.msk.bf16.mxu1 %vm7012_vm1, %v7011_v15 }
0x2681   :  { %6704 = vmatprep.subr.bf16.mxu1 %v7011_v15  ;;  %6722 = vmatprep.mubr.msk.bf16.mxu0 %vm7012_vm1, %v7011_v15  ;;  %vm5971_vm1 = vcmp.lt.s32.totalorder %v5969_v1, 30 }
0x2682   :  { %6715 = vmatpush3.bf16.msra.mxu0 %v6872_v48 }
0x2683   :  { %6716 = vmatprep.subr.bf16.mxu0 %v7011_v15 }
0x2684   :  { %6705 = vmatpush3.bf16.msra.mxu1 %v6857_v36 }
0x2685   :  { %6706 = vmatprep.subr.bf16.mxu1 %v7011_v15 }
0x2686   :  { %6717 = vmatpush3.bf16.msra.mxu0 %v6873_v27 }
0x2687   :  { %6718 = vmatprep.subr.bf16.mxu0 %v7011_v15 }
0x2688   :  { %6707 = vmatpush3.bf16.msra.mxu1 %v6858_v4 }
0x2689   :  { %6708 = vmatprep.subr.bf16.mxu1 %v7011_v15 }
0x268a   :  { %6719 = vmatpush3.bf16.msra.mxu0 %v6874_v23 }
0x268b   :  { %6720 = vmatprep.subr.bf16.mxu0 %v7011_v15 }
0x268c   :  { %6709 = vmatpush3.bf16.msra.mxu1 %v6859_v58 }
0x268d   :  { %5859 = vmatprep.subr.bf16.mxu1 %v7016_v62 }
0x268e   :  { %6721 = vmatpush3.bf16.msra.mxu0 %v6875_v17 }
0x2752   :  { %v5560_v49 = vpop.f32.mrb[96].mxu1  ;;  %v5740_v24 = vpop.f32.mrb[92].mxu0 }
0x2753   :  { %v5561_v32 = vadd.f32 %v5560_v49, %v5491_v9  ;;  %v6700_v19 = vpop.f32.mrb[97].mxu1  ;;  %v5742_v28 = vpop.f32.mrb[93].mxu0  ;;  %v5741_v33 = vadd.f32 %v5740_v24, %v5659_v39 }
0x2754   :  { %v5743_v35 = vadd.f32 %v5742_v28, %v5663_v10  ;;  %v5563_v37 = vpop.f32.mrb[98].mxu1  ;;  %v5744_v16 = vpop.f32.mrb[94].mxu0 }
0x2755   :  { %v5566_v38 = vmax.f32 %v5561_v32, 0.0  ;;  %v6701_v13 = vpop.f32.mrb[99].mxu1  ;;  %v5745_v34 = vpop.f32.mrb[95].mxu0  ;;  %v5747_v20 = vmax.f32 %v5741_v33, 0.0 }
0x2756   :  { %v5748_v26 = vmax.f32 %v5743_v35, 0.0 }
0x2757   :  { %v5567_v46 = vpack.c.bf16 %v5566_v38, %v5566_v38  ;;  %v5758_v42 = vpack.c.bf16 %v5747_v20, %v5747_v20 }
0x2758   :  { %v5759_v43 = vpack.c.bf16 %v5748_v26, %v5748_v26 }
0x2759   :  { %6711 = vmatmul.mubr.msk.bf16.vlgmr.msra.gmra.mrb[100].mxu1 %vm525_vm0, %v5567_v46 }
0x275a   :  { %5860 = vmatpush1.bf16.msra.mxu1 %v6860_v52  ;;  %6163 = vmatprep.mubr.msk.bf16.mxu1 %vm525_vm0, %v5759_v43 }
0x275b   :  { %5861 = vmatprep.subr.bf16.mxu1 %v7016_v62 }
0x275e   :  { %5862 = vmatpush1.bf16.msra.mxu1 %v6861_v45 }
0x275f   :  { %5863 = vmatprep.subr.bf16.mxu1 %v7016_v62 }
0x2762   :  { %5864 = vmatpush1.bf16.msra.mxu1 %v6862_v8 }
0x2763   :  { %5865 = vmatprep.subr.bf16.mxu1 %v7016_v62 }
0x2766   :  { %5866 = vmatpush1.bf16.msra.mxu1 %v6863_v5 }
0x2767   :  { %5867 = vmatprep.subr.bf16.mxu1 %v7016_v62 }
0x276a   :  { %5868 = vmatpush1.bf16.msra.mxu1 %v6864_v6 }
0x276b   :  { %5869 = vmatprep.subr.bf16.mxu1 %v7016_v62 }
0x276e   :  { %5870 = vmatpush1.bf16.msra.mxu1 %v6865_v11 }
0x276f   :  { %5871 = vmatprep.subr.bf16.mxu1 %v7016_v62 }
0x2772   :  { %5872 = vmatpush1.bf16.msra.mxu1 %v6866_v57 }
0x2773   :  { %5873 = vmatprep.subr.bf16.mxu1 %v7016_v62 }
0x2776   :  { %5874 = vmatpush1.bf16.msra.mxu1 %v6867_v50 }
0x2777   :  { %5875 = vmatprep.subr.bf16.mxu1 %v7016_v62 }
0x277a   :  { %5876 = vmatpush1.bf16.msra.mxu1 %v6868_v54 }
0x277b   :  { %5877 = vmatprep.subr.bf16.mxu1 %v7016_v62 }
0x277e   :  { %5878 = vmatpush1.bf16.msra.mxu1 %v6869_v2 }
0x277f   :  { %5879 = vmatprep.subr.bf16.mxu1 %v7016_v62 }
0x2782   :  { %5880 = vmatpush1.bf16.msra.mxu1 %v6870_v30 }
0x2783   :  { %5881 = vmatprep.subr.bf16.mxu1 %v7016_v62 }
0x2786   :  { %5882 = vmatpush1.bf16.msra.mxu1 %v6871_v56 }
0x2789   :  { %5892 = vmatmul.mubr.bf16.vlgmr.msra.gmra.mrb[104].mxu1 %v5758_v42 }
0x282c   :  { %v5638_v62 = vpop.f32.mrb[100].mxu1 }
0x282d   :  { %v5639_v55 = vadd.f32 %v5638_v62, %v5576_v3  ;;  %v6712_v7 = vpop.f32.mrb[101].mxu1 }
0x282e   :  { %v5641_v21 = vpop.f32.mrb[102].mxu1 }
0x282f   :  { %v5644_v40 = vmax.f32 %v5639_v55, 0.0  ;;  %v6713_v47 = vpop.f32.mrb[103].mxu1 }
0x2831   :  { %v5749_v25 = vpack.c.bf16 %v5644_v40, %v5644_v40 }
0x2833   :  { %6723 = vmatmul.mubr.msk.bf16.vlgmr.msra.gmra.mrb[96].mxu0 %vm525_vm0, %v5749_v25  ;;  %vm5970_vm0 = vcmp.ge.s32.totalorder %v5969_v1, 6 }
0x2834   :  { %vm5972_vm2 = vmand %vm5970_vm0, %vm5971_vm1 }
0x285c   :  { %v5893_v18 = vpop.f32.mrb[104].mxu1 }
0x285d   :  { %v5895_v15 = vpop.f32.mrb[105].mxu1 }
0x285e   :  { %v5896_v60 = vpop.f32.mrb[106].mxu1 }
0x285f   :  { %v5897_v59 = vpop.f32.mrb[107].mxu1 }
0x2906   :  { %v5960_v14 = vpop.f32.mrb[96].mxu0 }
0x2907   :  { %v5961_v12 = vadd.f32 %v5960_v14, %v5893_v18  ;;  %v6724_v51 = vpop.f32.mrb[97].mxu0 }
0x2908   :  { %v5963_v53 = vpop.f32.mrb[98].mxu0 }
0x2909   :  { %v5967_v63 = vadd.f32 %v5966_v61, %v5961_v12  ;;  %v6725_v31 = vpop.f32.mrb[99].mxu0 }
0x290b   :  { %v6169_v44 = vmul.f32 -1.442695, %v5967_v63 }
0x290d   :  { %7004 = vpow2.f32 %v6169_v44 }
0x2917   :  { %v7005_v0 = vpop.eup %7004 }
0x2918   :  { %v5976_v41 = vadd.f32 1.0, %v7005_v0 }
0x291a   :  { %7006 = vrcp.f32 %v5976_v41 }
0x2924   :  { %v7007_v36 = vpop.eup %7006 }
0x2925   :  { %v5979_v4 = vsel %vm5972_vm2, %v7007_v36, %v5967_v63 }
0x2926   :  { %5980 = vst [vmem:[%s8432_s3] sm:$0x3] %v5979_v4 }

</bundles_post_ra>
